<compile_context>
chip_gen: v7x
topology: tpu7x:2x2x1
jax: 0.10.0
libtpu: 0.0.40
codegen_flags: <defaults>
</compile_context>

<pallas_src>
import functools

import numpy as np
import jax
import jax.numpy as jnp
from jax.experimental import pallas as pl
from jax.experimental.pallas import tpu as pltpu

LN_EPS = 1e-5
BN_EPS = 1e-5


def calc_same_padding(kernel_size):
    pad = kernel_size // 2
    return (pad, pad - (kernel_size + 1) % 2)


# ----------------------------- in-kernel helpers -----------------------------

def _layernorm(x, g, b):
    mu = jnp.mean(x, axis=-1, keepdims=True)
    var = jnp.mean(jnp.square(x - mu), axis=-1, keepdims=True)
    return (x - mu) * jax.lax.rsqrt(var + LN_EPS) * g + b


def _gelu_tanh(x):
    # TODO(synk): PyTorch nn.GELU() defaults to the exact erf form; the tanh form keeps the op on
    # the EUP (abs diff <~3e-3, covered by the loose f32-reference tolerance below).
    c = 0.7978845608028654  # sqrt(2/pi)
    return 0.5 * x * (1.0 + jnp.tanh(c * (x + 0.044715 * x * x * x)))


def _mm(a_f32, w_bf16):
    # bf16 MXU operands (weights pre-cast in the wrapper), f32 accumulation.
    return jnp.dot(a_f32.astype(jnp.bfloat16), w_bf16, preferred_element_type=jnp.float32)


def _ff_module(x, p):
    ln1_g, ln1_b, w1, b1, w2, b2, ln2_g, ln2_b = p
    h = _layernorm(x, ln1_g[0, 0, :], ln1_b[0, 0, :])
    h = _mm(h, w1[0]) + b1[0, 0, :]
    h = _gelu_tanh(h)
    h = _mm(h, w2[0]) + b2[0, 0, :]
    return _layernorm(h, ln2_g[0, 0, :], ln2_b[0, 0, :])


def _attn_module(x, p, *, bt, seq, heads):
    pre_g, pre_b, w_q, w_k, w_v, w_o, post_g, post_b = p
    rows, dim = x.shape
    h = _layernorm(x, pre_g[0, 0, :], pre_b[0, 0, :]).astype(jnp.bfloat16)
    o = jnp.zeros((rows, dim), jnp.float32)
    # Static unroll over heads (heads is small here).
    # TODO(synk): switch to lax.fori_loop + a (heads, ...) weight layout at large head counts.
    for hh in range(heads):
        # Per-head weights -> q/k/v produced at lane offset 0 (no 64-lane-offset slicing);
        # the 1/sqrt(dim_head) softmax scale is already folded into w_q.
        q = jnp.dot(h, w_q[0, hh], preferred_element_type=jnp.float32)
        k = jnp.dot(h, w_k[0, hh], preferred_element_type=jnp.float32)
        v = jnp.dot(h, w_v[0, hh], preferred_element_type=jnp.float32)
        dh = q.shape[-1]
        q3 = q.reshape(bt, seq, dh).astype(jnp.bfloat16)
        k3 = k.reshape(bt, seq, dh).astype(jnp.bfloat16)
        v3 = v.reshape(bt, seq, dh).astype(jnp.bfloat16)
        s = jnp.einsum("bqd,bkd->bqk", q3, k3, preferred_element_type=jnp.float32)
        s = s - jnp.max(s, axis=-1, keepdims=True)
        ps = jnp.exp(s)
        ps = ps / jnp.sum(ps, axis=-1, keepdims=True)   # exact softmax (matches PyTorch SDPA)
        oh = jnp.einsum("bqk,bkd->bqd", ps.astype(jnp.bfloat16), v3,
                        preferred_element_type=jnp.float32)
        # Fold the output projection per head -> single (rows, D) accumulator, no concatenation.
        o = o + jnp.dot(oh.reshape(rows, dh).astype(jnp.bfloat16), w_o[0, hh],
                        preferred_element_type=jnp.float32)
    return _layernorm(o, post_g[0, 0, :], post_b[0, 0, :])


def _conv_module(x, p, *, bt, seq, kernel_size, pad_left):
    ln_g, ln_b, w_pw1, b_pw1, w_dw, b_dw, w_pw2, b_pw2 = p
    rows = x.shape[0]
    h = _layernorm(x, ln_g[0, 0, :], ln_b[0, 0, :])
    h = _mm(h, w_pw1[0]) + b_pw1[0, 0, :]                 # pointwise Conv1d(dim, 2*inner, 1)
    ci = h.shape[-1] // 2
    h = h[:, :ci] * jax.nn.sigmoid(h[:, ci:])             # GLU (ci is a multiple of 128 -> aligned)
    # Depthwise Conv1d with 'same' padding: in-register static rolls + pad masks instead of a
    # zero-filled VMEM scratch round trip. The mask handles both the zero padding at sequence
    # edges and (for bt > 1) taps that would leak across packed-sequence boundaries.
    pos = jax.lax.broadcasted_iota(jnp.int32, (bt, seq, 1), 1).reshape(rows, 1)
    wdw = w_dw[0]                                          # (K, ci) f32, BatchNorm scale folded in
    acc = jnp.zeros_like(h)
    for t in range(kernel_size):                           # static unroll over taps
        d = t - pad_left
        shifted = h if d == 0 else jnp.roll(h, -d, axis=0)          # static sublane roll
        valid = jnp.logical_and(pos + d >= 0, pos + d < seq)
        acc = acc + jnp.where(valid, shifted, 0.0) * wdw[t, :]
    h = acc + b_dw[0, 0, :]                                # BatchNorm shift folded into the bias
    h = h * jax.nn.sigmoid(h)                              # Swish
    h = _mm(h, w_pw2[0]) + b_pw2[0, 0, :]                  # pointwise Conv1d(inner, dim, 1)
    # TODO(synk): Dropout omitted (eval identity); training-mode BatchNorm batch stats not modeled.
    return h


# --------------------------- fused depth-stack kernel --------------------------

def conformer_stack_kernel(x_ref, *refs, bt, seq, heads, kernel_size, pad_left):
    o_ref, act_ref = refs[-2], refs[-1]
    w = refs[:-2]                                          # 32 stacked per-block weight refs
    d = pl.program_id(1)

    @pl.when(d == 0)
    def _load():
        # Residual stream enters VMEM once per batch block and stays resident across all depth steps.
        act_ref[...] = x_ref[...].reshape(act_ref.shape)

    x = act_ref[...]
    x = x + _ff_module(x, w[0:8])
    x = x + _attn_module(x, w[8:16], bt=bt, seq=seq, heads=heads)
    x = x + _conv_module(x, w[16:24], bt=bt, seq=seq,
                         kernel_size=kernel_size, pad_left=pad_left)
    x = x + _ff_module(x, w[24:32])
    act_ref[...] = x

    @pl.when(d == pl.num_programs(1) - 1)
    def _store():
        o_ref[...] = x.reshape(o_ref.shape)


# --------------------------- parameter prep + wrapper --------------------------

def _prep_block_params(blk, *, heads, dim_head):
    """Per-block weight prep: bf16 matmul weights, per-head attn weights with the softmax scale
    folded into w_q, and eval-mode BatchNorm folded into the depthwise conv."""
    def ff_list(p):
        return [p["ln1_g"], p["ln1_b"], p["w1"].astype(jnp.bfloat16), p["b1"],
                p["w2"].astype(jnp.bfloat16), p["b2"], p["ln2_g"], p["ln2_b"]]

    at = blk["attn"]
    dim = at["w_qkv"].shape[0]
    inner = heads * dim_head
    wq, wk, wv = (at["w_qkv"][:, i * inner:(i + 1) * inner]
                  .reshape(dim, heads, dim_head).transpose(1, 0, 2) for i in range(3))
    wq = wq * (1.0 / (dim_head ** 0.5))        # fold softmax scale (exact for power-of-two dh)
    wo = at["w_out"].reshape(heads, dim_head, dim)
    attn_list = [at["pre_g"], at["pre_b"],
                 wq.astype(jnp.bfloat16), wk.astype(jnp.bfloat16),
                 wv.astype(jnp.bfloat16), wo.astype(jnp.bfloat16),
                 at["post_g"], at["post_b"]]

    cv = blk["conv"]
    bn_s = cv["bn_g"] * jax.lax.rsqrt(cv["bn_rv"] + BN_EPS)       # (1, ci)
    w_dw = cv["w_dw"] * bn_s                                      # fold BN scale into the taps
    b_dw = (cv["b_dw"] - cv["bn_rm"]) * bn_s + cv["bn_b"]         # fold BN shift into the bias
    conv_list = [cv["ln_g"], cv["ln_b"], cv["w_pw1"].astype(jnp.bfloat16), cv["b_pw1"],
                 w_dw, b_dw, cv["w_pw2"].astype(jnp.bfloat16), cv["b_pw2"]]

    return ff_list(blk["ff1"]) + attn_list + conv_list + ff_list(blk["ff2"])


def conformer_forward(x, params, *, heads, dim_head, conv_kernel_size, target_rows=256):
    B, N, D = x.shape
    depth = len(params)
    pad_l, _ = calc_same_padding(conv_kernel_size)

    # Pack several batch elements per grid step so matmuls see bt*N rows (MXU row occupancy).
    # TODO(synk): on v7x (2 TCs/chip) keep >=2 steps on the parallel axis once B is large enough.
    bt = 1
    for cand in range(1, B + 1):
        if B % cand == 0 and cand * N <= max(target_rows, N):
            bt = cand

    per_block = [_prep_block_params(blk, heads=heads, dim_head=dim_head) for blk in params]
    stacked = [jnp.stack([pb[i] for pb in per_block], axis=0)       # (depth, ...) per weight
               for i in range(len(per_block[0]))]

    ci = params[0]["conv"]["w_dw"].shape[1]
    mlp_dim = params[0]["ff1"]["w1"].shape[1]
    inner = heads * dim_head

    kern = functools.partial(conformer_stack_kernel, bt=bt, seq=N, heads=heads,
                             kernel_size=conv_kernel_size, pad_left=pad_l)

    x_spec = pl.BlockSpec((bt, N, D), lambda b, d: (b, 0, 0))       # constant in d -> fetched once

    def w_spec(p):
        n = p.ndim - 1
        # One block's weights per depth step, streamed (double-buffered) along the depth axis.
        return pl.BlockSpec((1,) + p.shape[1:], lambda b, d, _n=n: (d,) + (0,) * _n)

    w_specs = [w_spec(p) for p in stacked]

    param_bytes = sum(int(p.size) * p.dtype.itemsize for p in stacked)
    per_block_param_bytes = param_bytes // depth
    act_bytes = bt * N * D * 4
    # Leave headroom below the 64 MiB v7x physical VMEM (cap at 56 MiB).
    vmem_limit = int(min(max(2 * per_block_param_bytes + 5 * act_bytes + (16 << 20), 32 << 20),
                         56 << 20))

    rows = B * N
    flops = depth * (
        2 * (2 * rows * D * mlp_dim + 2 * rows * mlp_dim * D)            # ff1 + ff2
        + 2 * rows * D * 3 * inner + heads * 4 * B * N * N * dim_head    # qkv + scores + pv
        + 2 * rows * inner * D                                           # attn out projection
        + 2 * rows * D * 2 * ci + 2 * rows * conv_kernel_size * ci       # conv pw1 + depthwise
        + 2 * rows * ci * D)                                             # conv pw2
    transcendentals = depth * rows * (2 * mlp_dim + heads * N + 3 * ci + 8)
    bytes_accessed = 2 * B * N * D * 4 + param_bytes   # activation crosses HBM once per stack

    return pl.pallas_call(
        kern,
        out_shape=jax.ShapeDtypeStruct((B, N, D), jnp.float32),
        grid=(B // bt, depth),
        in_specs=[x_spec] + w_specs,
        out_specs=x_spec,
        scratch_shapes=[pltpu.VMEM((bt * N, D), jnp.float32)],   # depth-resident residual stream
        input_output_aliases={0: 0},
        compiler_params=pltpu.CompilerParams(
            dimension_semantics=("parallel", "arbitrary"),
            vmem_limit_bytes=vmem_limit),
        cost_estimate=pl.CostEstimate(flops=int(flops),
                                      transcendentals=int(transcendentals),
                                      bytes_accessed=int(bytes_accessed)),
    )(x, *stacked)


# ----------------------------- parameter init ---------------------------------

def _ff_params(key, dim, hidden, scale):
    k1, k2, k3, k4 = jax.random.split(key, 4)
    return dict(
        ln1_g=jnp.ones((1, dim), jnp.float32), ln1_b=jnp.zeros((1, dim), jnp.float32),
        w1=scale * jax.random.normal(k1, (dim, hidden), jnp.float32),
        b1=scale * jax.random.normal(k2, (1, hidden), jnp.float32),
        w2=scale * jax.random.normal(k3, (hidden, dim), jnp.float32),
        b2=scale * jax.random.normal(k4, (1, dim), jnp.float32),
        ln2_g=jnp.ones((1, dim), jnp.float32), ln2_b=jnp.zeros((1, dim), jnp.float32),
    )


def _attn_params(key, dim, heads, dim_head, scale):
    inner = heads * dim_head
    k1, k2 = jax.random.split(key, 2)
    return dict(
        pre_g=jnp.ones((1, dim), jnp.float32), pre_b=jnp.zeros((1, dim), jnp.float32),
        w_qkv=scale * jax.random.normal(k1, (dim, 3 * inner), jnp.float32),
        w_out=scale * jax.random.normal(k2, (inner, dim), jnp.float32),
        post_g=jnp.ones((1, dim), jnp.float32), post_b=jnp.zeros((1, dim), jnp.float32),
    )


def _conv_params(key, dim, expansion, ksize, scale):
    inner = dim * expansion
    k1, k2, k3, k4, k5, k6 = jax.random.split(key, 6)
    return dict(
        ln_g=jnp.ones((1, dim), jnp.float32), ln_b=jnp.zeros((1, dim), jnp.float32),
        w_pw1=scale * jax.random.normal(k1, (dim, 2 * inner), jnp.float32),
        b_pw1=scale * jax.random.normal(k2, (1, 2 * inner), jnp.float32),
        w_dw=scale * jax.random.normal(k3, (ksize, inner), jnp.float32),
        b_dw=scale * jax.random.normal(k4, (1, inner), jnp.float32),
        bn_g=jnp.ones((1, inner), jnp.float32), bn_b=jnp.zeros((1, inner), jnp.float32),
        bn_rm=jnp.zeros((1, inner), jnp.float32), bn_rv=jnp.ones((1, inner), jnp.float32),
        w_pw2=scale * jax.random.normal(k5, (inner, dim), jnp.float32),
        b_pw2=scale * jax.random.normal(k6, (1, dim), jnp.float32),
    )


def init_params(key, dim, depth, dim_head, heads, mlp_dim,
                conv_expansion_factor, conv_kernel_size, scale=0.05):
    blocks = []
    for _ in range(depth):
        key, kf1, ka, kc, kf2 = jax.random.split(key, 5)
        blocks.append(dict(
            ff1=_ff_params(kf1, dim, mlp_dim, scale),
            attn=_attn_params(ka, dim, heads, dim_head, scale),
            conv=_conv_params(kc, dim, conv_expansion_factor, conv_kernel_size, scale),
            ff2=_ff_params(kf2, dim, mlp_dim, scale),
        ))
    return blocks


# ---------------------------- pure-JAX references -------------------------------
# mm_dtype=jnp.float32,  approx_gelu=False -> exact (PyTorch eval-mode) semantics
# mm_dtype=jnp.bfloat16, approx_gelu=True  -> precision-matched reference (kernel's policy)

def _mm_ref(a, b, mm_dtype):
    return jnp.dot(a.astype(mm_dtype), b.astype(mm_dtype), preferred_element_type=jnp.float32)


def _ln_ref(x, g, b):
    mu = jnp.mean(x, axis=-1, keepdims=True)
    var = jnp.mean((x - mu) ** 2, axis=-1, keepdims=True)
    return (x - mu) / jnp.sqrt(var + LN_EPS) * g + b


def _ff_ref(x, p, mm_dtype, approx_gelu):
    h = _ln_ref(x, p["ln1_g"], p["ln1_b"])
    h = _mm_ref(h, p["w1"], mm_dtype) + p["b1"]
    h = jax.nn.gelu(h, approximate=approx_gelu)
    h = _mm_ref(h, p["w2"], mm_dtype) + p["b2"]
    h = _ln_ref(h, p["ln2_g"], p["ln2_b"])
    return h + x


def _attn_ref(x, p, heads, dim_head, mm_dtype):
    B, N, _ = x.shape
    inner = heads * dim_head
    h = _ln_ref(x, p["pre_g"], p["pre_b"])
    qkv = _mm_ref(h, p["w_qkv"], mm_dtype)
    q, k, v = jnp.split(qkv, 3, axis=-1)

    def split_heads(t):
        return t.reshape(B, N, heads, dim_head).transpose(0, 2, 1, 3)

    q, k, v = map(split_heads, (q, k, v))
    s = jnp.einsum("bhnd,bhmd->bhnm", q.astype(mm_dtype), k.astype(mm_dtype),
                   preferred_element_type=jnp.float32) / jnp.sqrt(jnp.float32(dim_head))
    a = jax.nn.softmax(s, axis=-1)
    o = jnp.einsum("bhnm,bhmd->bhnd", a.astype(mm_dtype), v.astype(mm_dtype),
                   preferred_element_type=jnp.float32)
    o = o.transpose(0, 2, 1, 3).reshape(B, N, inner)
    o = _mm_ref(o, p["w_out"], mm_dtype)
    o = _ln_ref(o, p["post_g"], p["post_b"])
    return o + x


def _conv_ref(x, p, kernel_size, mm_dtype):
    B, N, _ = x.shape
    pad_l, pad_r = calc_same_padding(kernel_size)
    h = _ln_ref(x, p["ln_g"], p["ln_b"])
    h = _mm_ref(h, p["w_pw1"], mm_dtype) + p["b_pw1"]
    inner = h.shape[-1] // 2
    h = h[..., :inner] * jax.nn.sigmoid(h[..., inner:])
    hp = jnp.pad(h, ((0, 0), (pad_l, pad_r), (0, 0)))
    acc = jnp.zeros((B, N, inner), jnp.float32)
    for t in range(kernel_size):
        acc = acc + hp[:, t:t + N, :] * p["w_dw"][t, :]
    h = acc + p["b_dw"]
    h = (h - p["bn_rm"]) / jnp.sqrt(p["bn_rv"] + BN_EPS) * p["bn_g"] + p["bn_b"]
    h = h * jax.nn.sigmoid(h)
    h = _mm_ref(h, p["w_pw2"], mm_dtype) + p["b_pw2"]
    return h + x


def conformer_ref(x, params, *, heads, dim_head, conv_kernel_size,
                  mm_dtype=jnp.float32, approx_gelu=False):
    for blk in params:
        x = _ff_ref(x, blk["ff1"], mm_dtype, approx_gelu)
        x = _attn_ref(x, blk["attn"], heads, dim_head, mm_dtype)
        x = _conv_ref(x, blk["conv"], conv_kernel_size, mm_dtype)
        x = _ff_ref(x, blk["ff2"], mm_dtype, approx_gelu)
    return x


# ----------------------------------- main --------------------------------------

if __name__ == "__main__":
    # Small but lane-dense demo shapes (feature dims are multiples of 128).
    B, N = 2, 8
    dim, depth = 128, 2
    heads, dim_head = 2, 64          # inner = 128
    mlp_dim = 256
    conv_expansion_factor, conv_kernel_size = 2, 7

    key = jax.random.PRNGKey(0)
    key, xk = jax.random.split(key)
    x = jax.random.normal(xk, (B, N, dim), jnp.float32)

    params = init_params(key, dim, depth, dim_head, heads, mlp_dim,
                         conv_expansion_factor, conv_kernel_size)

    fwd = jax.jit(functools.partial(conformer_forward, heads=heads, dim_head=dim_head,
                                    conv_kernel_size=conv_kernel_size))
    out = jax.block_until_ready(fwd(x, params))

    # (1) Tight check against a precision-matched reference (bf16 matmul operands, tanh GELU,
    #     exact softmax): validates the fused-kernel logic with the same numeric policy.
    ref_matched = conformer_ref(x, params, heads=heads, dim_head=dim_head,
                                conv_kernel_size=conv_kernel_size,
                                mm_dtype=jnp.bfloat16, approx_gelu=True)
    np.testing.assert_allclose(np.asarray(out), np.asarray(ref_matched), rtol=1e-2, atol=1e-2)

    # (2) Looser check against the exact f32 / erf-GELU reference: covers the deliberate
    #     bf16-matmul + tanh-GELU inference policy.
    ref_exact = conformer_ref(x, params, heads=heads, dim_head=dim_head,
                              conv_kernel_size=conv_kernel_size,
                              mm_dtype=jnp.float32, approx_gelu=False)
    np.testing.assert_allclose(np.asarray(out), np.asarray(ref_exact), rtol=5e-2, atol=1e-1)

    print("KERNEL_OK")
</pallas_src>

<mosaic_0001>
module attributes {stable_mosaic.version = 11 : i64} {
  func.func @conformer_stack_kernel(%arg0: i32, %arg1: i32, %arg2: memref<2x8x128xf32, #tpu.memory_space<vmem>>, %arg3: memref<1x1x128xf32, #tpu.memory_space<vmem>>, %arg4: memref<1x1x128xf32, #tpu.memory_space<vmem>>, %arg5: memref<1x128x256xbf16, #tpu.memory_space<vmem>>, %arg6: memref<1x1x256xf32, #tpu.memory_space<vmem>>, %arg7: memref<1x256x128xbf16, #tpu.memory_space<vmem>>, %arg8: memref<1x1x128xf32, #tpu.memory_space<vmem>>, %arg9: memref<1x1x128xf32, #tpu.memory_space<vmem>>, %arg10: memref<1x1x128xf32, #tpu.memory_space<vmem>>, %arg11: memref<1x1x128xf32, #tpu.memory_space<vmem>>, %arg12: memref<1x1x128xf32, #tpu.memory_space<vmem>>, %arg13: memref<1x2x128x64xbf16, #tpu.memory_space<vmem>>, %arg14: memref<1x2x128x64xbf16, #tpu.memory_space<vmem>>, %arg15: memref<1x2x128x64xbf16, #tpu.memory_space<vmem>>, %arg16: memref<1x2x64x128xbf16, #tpu.memory_space<vmem>>, %arg17: memref<1x1x128xf32, #tpu.memory_space<vmem>>, %arg18: memref<1x1x128xf32, #tpu.memory_space<vmem>>, %arg19: memref<1x1x128xf32, #tpu.memory_space<vmem>>, %arg20: memref<1x1x128xf32, #tpu.memory_space<vmem>>, %arg21: memref<1x128x512xbf16, #tpu.memory_space<vmem>>, %arg22: memref<1x1x512xf32, #tpu.memory_space<vmem>>, %arg23: memref<1x7x256xf32, #tpu.memory_space<vmem>>, %arg24: memref<1x1x256xf32, #tpu.memory_space<vmem>>, %arg25: memref<1x256x128xbf16, #tpu.memory_space<vmem>>, %arg26: memref<1x1x128xf32, #tpu.memory_space<vmem>>, %arg27: memref<1x1x128xf32, #tpu.memory_space<vmem>>, %arg28: memref<1x1x128xf32, #tpu.memory_space<vmem>>, %arg29: memref<1x128x256xbf16, #tpu.memory_space<vmem>>, %arg30: memref<1x1x256xf32, #tpu.memory_space<vmem>>, %arg31: memref<1x256x128xbf16, #tpu.memory_space<vmem>>, %arg32: memref<1x1x128xf32, #tpu.memory_space<vmem>>, %arg33: memref<1x1x128xf32, #tpu.memory_space<vmem>>, %arg34: memref<1x1x128xf32, #tpu.memory_space<vmem>>, %arg35: memref<2x8x128xf32, #tpu.memory_space<vmem>>, %arg36: memref<16x128xf32, #tpu.memory_space<vmem>>) attributes {dimension_semantics = [#tpu.dimension_semantics<parallel>, #tpu.dimension_semantics<arbitrary>], iteration_bounds = array<i64: 1, 2>, scalar_prefetch = 0 : i64, scratch_operands = 1 : i64, tpu.core_type = #tpu.core_type<tc>, window_params = [{transform_indices = @transform_0, window_bounds = array<i64: 2, 8, 128>}, {transform_indices = @transform_1, window_bounds = array<i64: 1, 1, 128>}, {transform_indices = @transform_2, window_bounds = array<i64: 1, 1, 128>}, {transform_indices = @transform_3, window_bounds = array<i64: 1, 128, 256>}, {transform_indices = @transform_4, window_bounds = array<i64: 1, 1, 256>}, {transform_indices = @transform_5, window_bounds = array<i64: 1, 256, 128>}, {transform_indices = @transform_6, window_bounds = array<i64: 1, 1, 128>}, {transform_indices = @transform_7, window_bounds = array<i64: 1, 1, 128>}, {transform_indices = @transform_8, window_bounds = array<i64: 1, 1, 128>}, {transform_indices = @transform_9, window_bounds = array<i64: 1, 1, 128>}, {transform_indices = @transform_10, window_bounds = array<i64: 1, 1, 128>}, {transform_indices = @transform_11, window_bounds = array<i64: 1, 2, 128, 64>}, {transform_indices = @transform_12, window_bounds = array<i64: 1, 2, 128, 64>}, {transform_indices = @transform_13, window_bounds = array<i64: 1, 2, 128, 64>}, {transform_indices = @transform_14, window_bounds = array<i64: 1, 2, 64, 128>}, {transform_indices = @transform_15, window_bounds = array<i64: 1, 1, 128>}, {transform_indices = @transform_16, window_bounds = array<i64: 1, 1, 128>}, {transform_indices = @transform_17, window_bounds = array<i64: 1, 1, 128>}, {transform_indices = @transform_18, window_bounds = array<i64: 1, 1, 128>}, {transform_indices = @transform_19, window_bounds = array<i64: 1, 128, 512>}, {transform_indices = @transform_20, window_bounds = array<i64: 1, 1, 512>}, {transform_indices = @transform_21, window_bounds = array<i64: 1, 7, 256>}, {transform_indices = @transform_22, window_bounds = array<i64: 1, 1, 256>}, {transform_indices = @transform_23, window_bounds = array<i64: 1, 256, 128>}, {transform_indices = @transform_24, window_bounds = array<i64: 1, 1, 128>}, {transform_indices = @transform_25, window_bounds = array<i64: 1, 1, 128>}, {transform_indices = @transform_26, window_bounds = array<i64: 1, 1, 128>}, {transform_indices = @transform_27, window_bounds = array<i64: 1, 128, 256>}, {transform_indices = @transform_28, window_bounds = array<i64: 1, 1, 256>}, {transform_indices = @transform_29, window_bounds = array<i64: 1, 256, 128>}, {transform_indices = @transform_30, window_bounds = array<i64: 1, 1, 128>}, {transform_indices = @transform_31, window_bounds = array<i64: 1, 1, 128>}, {transform_indices = @transform_32, window_bounds = array<i64: 1, 1, 128>}, {transform_indices = @transform_33, window_bounds = array<i64: 2, 8, 128>}]} {
    %c0_i32 = arith.constant 0 : i32
    %0 = arith.cmpi eq, %arg1, %c0_i32 : i32
    %1 = arith.extui %0 : i1 to i32
    %c0_i32_0 = arith.constant 0 : i32
    %2 = arith.cmpi ne, %1, %c0_i32_0 : i32
    scf.if %2 {
      %c0_217 = arith.constant 0 : index
      %c0_218 = arith.constant 0 : index
      %c0_219 = arith.constant 0 : index
      %531 = vector.load %arg2[%c0_217, %c0_218, %c0_219] : memref<2x8x128xf32, #tpu.memory_space<vmem>>, vector<2x8x128xf32>
      %532 = vector.shape_cast %531 : vector<2x8x128xf32> to vector<16x128xf32>
      %c0_220 = arith.constant 0 : index
      %c0_221 = arith.constant 0 : index
      %533 = vector.load %arg36[%c0_220, %c0_221] : memref<16x128xf32, #tpu.memory_space<vmem>>, vector<16x128xf32>
      tpu.vector_store %arg36[%c0_220, %c0_221], %532 {strides = array<i32>} : memref<16x128xf32, #tpu.memory_space<vmem>>, vector<16x128xf32>,
    } else {
    }
    %c0 = arith.constant 0 : index
    %c0_1 = arith.constant 0 : index
    %3 = vector.load %arg36[%c0, %c0_1] : memref<16x128xf32, #tpu.memory_space<vmem>>, vector<16x128xf32>
    %c0_2 = arith.constant 0 : index
    %c0_3 = arith.constant 0 : index
    %c0_4 = arith.constant 0 : index
    %4 = vector.load %arg3[%c0_2, %c0_3, %c0_4] : memref<1x1x128xf32, #tpu.memory_space<vmem>>, vector<1x1x128xf32>
    %5 = vector.shape_cast %4 : vector<1x1x128xf32> to vector<128xf32>
    %c0_5 = arith.constant 0 : index
    %c0_6 = arith.constant 0 : index
    %c0_7 = arith.constant 0 : index
    %6 = vector.load %arg4[%c0_5, %c0_6, %c0_7] : memref<1x1x128xf32, #tpu.memory_space<vmem>>, vector<1x1x128xf32>
    %7 = vector.shape_cast %6 : vector<1x1x128xf32> to vector<128xf32>
    %cst = arith.constant dense<0.000000e+00> : vector<16xf32>
    %8 = vector.multi_reduction <add>, %3, %cst [1] : vector<16x128xf32> to vector<16xf32>
    %9 = vector.shape_cast %8 : vector<16xf32> to vector<16x1xf32>
    %cst_8 = arith.constant 1.280000e+02 : f32
    %10 = vector.broadcast %cst_8 : f32 to vector<16x1xf32>
    %11 = arith.divf %9, %10 : vector<16x1xf32>
    %12 = vector.broadcast %11 : vector<16x1xf32> to vector<16x128xf32>
    %13 = arith.subf %3, %12 : vector<16x128xf32>
    %14 = arith.mulf %13, %13 : vector<16x128xf32>
    %cst_9 = arith.constant dense<0.000000e+00> : vector<16xf32>
    %15 = vector.multi_reduction <add>, %14, %cst_9 [1] : vector<16x128xf32> to vector<16xf32>
    %16 = vector.shape_cast %15 : vector<16xf32> to vector<16x1xf32>
    %cst_10 = arith.constant 1.280000e+02 : f32
    %17 = vector.broadcast %cst_10 : f32 to vector<16x1xf32>
    %18 = arith.divf %16, %17 : vector<16x1xf32>
    %19 = vector.broadcast %11 : vector<16x1xf32> to vector<16x128xf32>
    %20 = arith.subf %3, %19 : vector<16x128xf32>
    %cst_11 = arith.constant 9.99999974E-6 : f32
    %21 = vector.broadcast %cst_11 : f32 to vector<16x1xf32>
    %22 = arith.addf %18, %21 : vector<16x1xf32>
    %23 = math.rsqrt %22 : vector<16x1xf32>
    %24 = vector.broadcast %23 : vector<16x1xf32> to vector<16x128xf32>
    %25 = arith.mulf %20, %24 : vector<16x128xf32>
    %26 = vector.shape_cast %5 : vector<128xf32> to vector<1x128xf32>
    %27 = vector.broadcast %26 : vector<1x128xf32> to vector<16x128xf32>
    %28 = arith.mulf %25, %27 : vector<16x128xf32>
    %29 = vector.shape_cast %7 : vector<128xf32> to vector<1x128xf32>
    %30 = vector.broadcast %29 : vector<1x128xf32> to vector<16x128xf32>
    %31 = arith.addf %28, %30 : vector<16x128xf32>
    %c0_12 = arith.constant 0 : index
    %c0_13 = arith.constant 0 : index
    %c0_14 = arith.constant 0 : index
    %32 = vector.load %arg5[%c0_12, %c0_13, %c0_14] : memref<1x128x256xbf16, #tpu.memory_space<vmem>>, vector<1x128x256xbf16>
    %33 = vector.shape_cast %32 : vector<1x128x256xbf16> to vector<128x256xbf16>
    %34 = arith.truncf %31 : vector<16x128xf32> to vector<16x128xbf16>
    %cst_15 = arith.constant dense<0.000000e+00> : vector<16x256xf32>
    %35 = tpu.matmul %34, %33, %cst_15 {dimension_numbers = #tpu.dot_dimension_numbers<[1], [0], [0], [1], [0, 0, 1, 1], [], []>} : vector<16x128xbf16>, vector<128x256xbf16>, vector<16x256xf32> -> vector<16x256xf32>
    %c0_16 = arith.constant 0 : index
    %c0_17 = arith.constant 0 : index
    %c0_18 = arith.constant 0 : index
    %36 = vector.load %arg6[%c0_16, %c0_17, %c0_18] : memref<1x1x256xf32, #tpu.memory_space<vmem>>, vector<1x1x256xf32>
    %37 = vector.shape_cast %36 : vector<1x1x256xf32> to vector<256xf32>
    %38 = vector.shape_cast %37 : vector<256xf32> to vector<1x256xf32>
    %39 = vector.broadcast %38 : vector<1x256xf32> to vector<16x256xf32>
    %40 = arith.addf %35, %39 : vector<16x256xf32>
    %cst_19 = arith.constant 5.000000e-01 : f32
    %41 = vector.broadcast %cst_19 : f32 to vector<16x256xf32>
    %42 = arith.mulf %41, %40 : vector<16x256xf32>
    %cst_20 = arith.constant 4.471500e-02 : f32
    %43 = vector.broadcast %cst_20 : f32 to vector<16x256xf32>
    %44 = arith.mulf %43, %40 : vector<16x256xf32>
    %45 = arith.mulf %44, %40 : vector<16x256xf32>
    %46 = arith.mulf %45, %40 : vector<16x256xf32>
    %47 = arith.addf %40, %46 : vector<16x256xf32>
    %cst_21 = arith.constant 0.797884583 : f32
    %48 = vector.broadcast %cst_21 : f32 to vector<16x256xf32>
    %49 = arith.mulf %48, %47 : vector<16x256xf32>
    %50 = math.tanh %49 : vector<16x256xf32>
    %cst_22 = arith.constant 1.000000e+00 : f32
    %51 = vector.broadcast %cst_22 : f32 to vector<16x256xf32>
    %52 = arith.addf %51, %50 : vector<16x256xf32>
    %53 = arith.mulf %42, %52 : vector<16x256xf32>
    %c0_23 = arith.constant 0 : index
    %c0_24 = arith.constant 0 : index
    %c0_25 = arith.constant 0 : index
    %54 = vector.load %arg7[%c0_23, %c0_24, %c0_25] : memref<1x256x128xbf16, #tpu.memory_space<vmem>>, vector<1x256x128xbf16>
    %55 = vector.shape_cast %54 : vector<1x256x128xbf16> to vector<256x128xbf16>
    %56 = arith.truncf %53 : vector<16x256xf32> to vector<16x256xbf16>
    %cst_26 = arith.constant dense<0.000000e+00> : vector<16x128xf32>
    %57 = tpu.matmul %56, %55, %cst_26 {dimension_numbers = #tpu.dot_dimension_numbers<[1], [0], [0], [1], [0, 0, 1, 1], [], []>} : vector<16x256xbf16>, vector<256x128xbf16>, vector<16x128xf32> -> vector<16x128xf32>
    %c0_27 = arith.constant 0 : index
    %c0_28 = arith.constant 0 : index
    %c0_29 = arith.constant 0 : index
    %58 = vector.load %arg8[%c0_27, %c0_28, %c0_29] : memref<1x1x128xf32, #tpu.memory_space<vmem>>, vector<1x1x128xf32>
    %59 = vector.shape_cast %58 : vector<1x1x128xf32> to vector<128xf32>
    %60 = vector.shape_cast %59 : vector<128xf32> to vector<1x128xf32>
    %61 = vector.broadcast %60 : vector<1x128xf32> to vector<16x128xf32>
    %62 = arith.addf %57, %61 : vector<16x128xf32>
    %c0_30 = arith.constant 0 : index
    %c0_31 = arith.constant 0 : index
    %c0_32 = arith.constant 0 : index
    %63 = vector.load %arg9[%c0_30, %c0_31, %c0_32] : memref<1x1x128xf32, #tpu.memory_space<vmem>>, vector<1x1x128xf32>
    %64 = vector.shape_cast %63 : vector<1x1x128xf32> to vector<128xf32>
    %c0_33 = arith.constant 0 : index
    %c0_34 = arith.constant 0 : index
    %c0_35 = arith.constant 0 : index
    %65 = vector.load %arg10[%c0_33, %c0_34, %c0_35] : memref<1x1x128xf32, #tpu.memory_space<vmem>>, vector<1x1x128xf32>
    %66 = vector.shape_cast %65 : vector<1x1x128xf32> to vector<128xf32>
    %cst_36 = arith.constant dense<0.000000e+00> : vector<16xf32>
    %67 = vector.multi_reduction <add>, %62, %cst_36 [1] : vector<16x128xf32> to vector<16xf32>
    %68 = vector.shape_cast %67 : vector<16xf32> to vector<16x1xf32>
    %cst_37 = arith.constant 1.280000e+02 : f32
    %69 = vector.broadcast %cst_37 : f32 to vector<16x1xf32>
    %70 = arith.divf %68, %69 : vector<16x1xf32>
    %71 = vector.broadcast %70 : vector<16x1xf32> to vector<16x128xf32>
    %72 = arith.subf %62, %71 : vector<16x128xf32>
    %73 = arith.mulf %72, %72 : vector<16x128xf32>
    %cst_38 = arith.constant dense<0.000000e+00> : vector<16xf32>
    %74 = vector.multi_reduction <add>, %73, %cst_38 [1] : vector<16x128xf32> to vector<16xf32>
    %75 = vector.shape_cast %74 : vector<16xf32> to vector<16x1xf32>
    %cst_39 = arith.constant 1.280000e+02 : f32
    %76 = vector.broadcast %cst_39 : f32 to vector<16x1xf32>
    %77 = arith.divf %75, %76 : vector<16x1xf32>
    %78 = vector.broadcast %70 : vector<16x1xf32> to vector<16x128xf32>
    %79 = arith.subf %62, %78 : vector<16x128xf32>
    %cst_40 = arith.constant 9.99999974E-6 : f32
    %80 = vector.broadcast %cst_40 : f32 to vector<16x1xf32>
    %81 = arith.addf %77, %80 : vector<16x1xf32>
    %82 = math.rsqrt %81 : vector<16x1xf32>
    %83 = vector.broadcast %82 : vector<16x1xf32> to vector<16x128xf32>
    %84 = arith.mulf %79, %83 : vector<16x128xf32>
    %85 = vector.shape_cast %64 : vector<128xf32> to vector<1x128xf32>
    %86 = vector.broadcast %85 : vector<1x128xf32> to vector<16x128xf32>
    %87 = arith.mulf %84, %86 : vector<16x128xf32>
    %88 = vector.shape_cast %66 : vector<128xf32> to vector<1x128xf32>
    %89 = vector.broadcast %88 : vector<1x128xf32> to vector<16x128xf32>
    %90 = arith.addf %87, %89 : vector<16x128xf32>
    %91 = arith.addf %3, %90 : vector<16x128xf32>
    %c0_41 = arith.constant 0 : index
    %c0_42 = arith.constant 0 : index
    %c0_43 = arith.constant 0 : index
    %92 = vector.load %arg11[%c0_41, %c0_42, %c0_43] : memref<1x1x128xf32, #tpu.memory_space<vmem>>, vector<1x1x128xf32>
    %93 = vector.shape_cast %92 : vector<1x1x128xf32> to vector<128xf32>
    %c0_44 = arith.constant 0 : index
    %c0_45 = arith.constant 0 : index
    %c0_46 = arith.constant 0 : index
    %94 = vector.load %arg12[%c0_44, %c0_45, %c0_46] : memref<1x1x128xf32, #tpu.memory_space<vmem>>, vector<1x1x128xf32>
    %95 = vector.shape_cast %94 : vector<1x1x128xf32> to vector<128xf32>
    %cst_47 = arith.constant dense<0.000000e+00> : vector<16xf32>
    %96 = vector.multi_reduction <add>, %91, %cst_47 [1] : vector<16x128xf32> to vector<16xf32>
    %97 = vector.shape_cast %96 : vector<16xf32> to vector<16x1xf32>
    %cst_48 = arith.constant 1.280000e+02 : f32
    %98 = vector.broadcast %cst_48 : f32 to vector<16x1xf32>
    %99 = arith.divf %97, %98 : vector<16x1xf32>
    %100 = vector.broadcast %99 : vector<16x1xf32> to vector<16x128xf32>
    %101 = arith.subf %91, %100 : vector<16x128xf32>
    %102 = arith.mulf %101, %101 : vector<16x128xf32>
    %cst_49 = arith.constant dense<0.000000e+00> : vector<16xf32>
    %103 = vector.multi_reduction <add>, %102, %cst_49 [1] : vector<16x128xf32> to vector<16xf32>
    %104 = vector.shape_cast %103 : vector<16xf32> to vector<16x1xf32>
    %cst_50 = arith.constant 1.280000e+02 : f32
    %105 = vector.broadcast %cst_50 : f32 to vector<16x1xf32>
    %106 = arith.divf %104, %105 : vector<16x1xf32>
    %107 = vector.broadcast %99 : vector<16x1xf32> to vector<16x128xf32>
    %108 = arith.subf %91, %107 : vector<16x128xf32>
    %cst_51 = arith.constant 9.99999974E-6 : f32
    %109 = vector.broadcast %cst_51 : f32 to vector<16x1xf32>
    %110 = arith.addf %106, %109 : vector<16x1xf32>
    %111 = math.rsqrt %110 : vector<16x1xf32>
    %112 = vector.broadcast %111 : vector<16x1xf32> to vector<16x128xf32>
    %113 = arith.mulf %108, %112 : vector<16x128xf32>
    %114 = vector.shape_cast %93 : vector<128xf32> to vector<1x128xf32>
    %115 = vector.broadcast %114 : vector<1x128xf32> to vector<16x128xf32>
    %116 = arith.mulf %113, %115 : vector<16x128xf32>
    %117 = vector.shape_cast %95 : vector<128xf32> to vector<1x128xf32>
    %118 = vector.broadcast %117 : vector<1x128xf32> to vector<16x128xf32>
    %119 = arith.addf %116, %118 : vector<16x128xf32>
    %120 = arith.truncf %119 : vector<16x128xf32> to vector<16x128xbf16>
    %cst_52 = arith.constant 0.000000e+00 : f32
    %121 = vector.broadcast %cst_52 : f32 to vector<16x128xf32>
    %c0_53 = arith.constant 0 : index
    %c0_54 = arith.constant 0 : index
    %c0_55 = arith.constant 0 : index
    %c0_56 = arith.constant 0 : index
    %122 = vector.load %arg13[%c0_53, %c0_54, %c0_55, %c0_56] : memref<1x2x128x64xbf16, #tpu.memory_space<vmem>>, vector<1x1x128x64xbf16>
    %123 = vector.shape_cast %122 : vector<1x1x128x64xbf16> to vector<128x64xbf16>
    %cst_57 = arith.constant dense<0.000000e+00> : vector<16x64xf32>
    %124 = tpu.matmul %120, %123, %cst_57 {dimension_numbers = #tpu.dot_dimension_numbers<[1], [0], [0], [1], [0, 0, 1, 1], [], []>} : vector<16x128xbf16>, vector<128x64xbf16>, vector<16x64xf32> -> vector<16x64xf32>
    %c0_58 = arith.constant 0 : index
    %c0_59 = arith.constant 0 : index
    %c0_60 = arith.constant 0 : index
    %c0_61 = arith.constant 0 : index
    %125 = vector.load %arg14[%c0_58, %c0_59, %c0_60, %c0_61] : memref<1x2x128x64xbf16, #tpu.memory_space<vmem>>, vector<1x1x128x64xbf16>
    %126 = vector.shape_cast %125 : vector<1x1x128x64xbf16> to vector<128x64xbf16>
    %cst_62 = arith.constant dense<0.000000e+00> : vector<16x64xf32>
    %127 = tpu.matmul %120, %126, %cst_62 {dimension_numbers = #tpu.dot_dimension_numbers<[1], [0], [0], [1], [0, 0, 1, 1], [], []>} : vector<16x128xbf16>, vector<128x64xbf16>, vector<16x64xf32> -> vector<16x64xf32>
    %c0_63 = arith.constant 0 : index
    %c0_64 = arith.constant 0 : index
    %c0_65 = arith.constant 0 : index
    %c0_66 = arith.constant 0 : index
    %128 = vector.load %arg15[%c0_63, %c0_64, %c0_65, %c0_66] : memref<1x2x128x64xbf16, #tpu.memory_space<vmem>>, vector<1x1x128x64xbf16>
    %129 = vector.shape_cast %128 : vector<1x1x128x64xbf16> to vector<128x64xbf16>
    %cst_67 = arith.constant dense<0.000000e+00> : vector<16x64xf32>
    %130 = tpu.matmul %120, %129, %cst_67 {dimension_numbers = #tpu.dot_dimension_numbers<[1], [0], [0], [1], [0, 0, 1, 1], [], []>} : vector<16x128xbf16>, vector<128x64xbf16>, vector<16x64xf32> -> vector<16x64xf32>
    %131 = vector.shape_cast %124 : vector<16x64xf32> to vector<2x8x64xf32>
    %132 = arith.truncf %131 : vector<2x8x64xf32> to vector<2x8x64xbf16>
    %133 = vector.shape_cast %127 : vector<16x64xf32> to vector<2x8x64xf32>
    %134 = arith.truncf %133 : vector<2x8x64xf32> to vector<2x8x64xbf16>
    %135 = vector.shape_cast %130 : vector<16x64xf32> to vector<2x8x64xf32>
    %136 = arith.truncf %135 : vector<2x8x64xf32> to vector<2x8x64xbf16>
    "tpu.trace_start"() <{level = 10 : i32, message = "bqd,bkd->bqk"}> : () -> ()
    %cst_68 = arith.constant dense<0.000000e+00> : vector<2x8x8xf32>
    %137 = tpu.matmul %132, %134, %cst_68 {dimension_numbers = #tpu.dot_dimension_numbers<[2], [2], [1], [1], [0, 0, 0, 1, 1, 1], [0], [0]>} : vector<2x8x64xbf16>, vector<2x8x64xbf16>, vector<2x8x8xf32> -> vector<2x8x8xf32>
    "tpu.trace_stop"() : () -> ()
    %cst_69 = arith.constant dense<0xFF800000> : vector<2x8xf32>
    %138 = vector.multi_reduction <maximumf>, %137, %cst_69 [2] : vector<2x8x8xf32> to vector<2x8xf32>
    %139 = vector.shape_cast %138 : vector<2x8xf32> to vector<2x8x1xf32>
    %140 = vector.broadcast %139 : vector<2x8x1xf32> to vector<2x8x8xf32>
    %141 = arith.subf %137, %140 : vector<2x8x8xf32>
    %142 = math.exp %141 : vector<2x8x8xf32>
    %cst_70 = arith.constant dense<0.000000e+00> : vector<2x8xf32>
    %143 = vector.multi_reduction <add>, %142, %cst_70 [2] : vector<2x8x8xf32> to vector<2x8xf32>
    %144 = vector.shape_cast %143 : vector<2x8xf32> to vector<2x8x1xf32>
    %145 = vector.broadcast %144 : vector<2x8x1xf32> to vector<2x8x8xf32>
    %146 = arith.divf %142, %145 : vector<2x8x8xf32>
    %147 = arith.truncf %146 : vector<2x8x8xf32> to vector<2x8x8xbf16>
    "tpu.trace_start"() <{level = 10 : i32, message = "bqk,bkd->bqd"}> : () -> ()
    %cst_71 = arith.constant dense<0.000000e+00> : vector<2x8x64xf32>
    %148 = tpu.matmul %147, %136, %cst_71 {dimension_numbers = #tpu.dot_dimension_numbers<[2], [1], [1], [2], [0, 0, 0, 1, 1, 2], [0], [0]>} : vector<2x8x8xbf16>, vector<2x8x64xbf16>, vector<2x8x64xf32> -> vector<2x8x64xf32>
    "tpu.trace_stop"() : () -> ()
    %149 = vector.shape_cast %148 : vector<2x8x64xf32> to vector<16x64xf32>
    %150 = arith.truncf %149 : vector<16x64xf32> to vector<16x64xbf16>
    %c0_72 = arith.constant 0 : index
    %c0_73 = arith.constant 0 : index
    %c0_74 = arith.constant 0 : index
    %c0_75 = arith.constant 0 : index
    %151 = vector.load %arg16[%c0_72, %c0_73, %c0_74, %c0_75] : memref<1x2x64x128xbf16, #tpu.memory_space<vmem>>, vector<1x1x64x128xbf16>
    %152 = vector.shape_cast %151 : vector<1x1x64x128xbf16> to vector<64x128xbf16>
    %cst_76 = arith.constant dense<0.000000e+00> : vector<16x128xf32>
    %153 = tpu.matmul %150, %152, %cst_76 {dimension_numbers = #tpu.dot_dimension_numbers<[1], [0], [0], [1], [0, 0, 1, 1], [], []>} : vector<16x64xbf16>, vector<64x128xbf16>, vector<16x128xf32> -> vector<16x128xf32>
    %154 = arith.addf %121, %153 : vector<16x128xf32>
    %c0_77 = arith.constant 0 : index
    %c1 = arith.constant 1 : index
    %c0_78 = arith.constant 0 : index
    %c0_79 = arith.constant 0 : index
    %155 = vector.load %arg13[%c0_77, %c1, %c0_78, %c0_79] : memref<1x2x128x64xbf16, #tpu.memory_space<vmem>>, vector<1x1x128x64xbf16>
    %156 = vector.shape_cast %155 : vector<1x1x128x64xbf16> to vector<128x64xbf16>
    %cst_80 = arith.constant dense<0.000000e+00> : vector<16x64xf32>
    %157 = tpu.matmul %120, %156, %cst_80 {dimension_numbers = #tpu.dot_dimension_numbers<[1], [0], [0], [1], [0, 0, 1, 1], [], []>} : vector<16x128xbf16>, vector<128x64xbf16>, vector<16x64xf32> -> vector<16x64xf32>
    %c0_81 = arith.constant 0 : index
    %c1_82 = arith.constant 1 : index
    %c0_83 = arith.constant 0 : index
    %c0_84 = arith.constant 0 : index
    %158 = vector.load %arg14[%c0_81, %c1_82, %c0_83, %c0_84] : memref<1x2x128x64xbf16, #tpu.memory_space<vmem>>, vector<1x1x128x64xbf16>
    %159 = vector.shape_cast %158 : vector<1x1x128x64xbf16> to vector<128x64xbf16>
    %cst_85 = arith.constant dense<0.000000e+00> : vector<16x64xf32>
    %160 = tpu.matmul %120, %159, %cst_85 {dimension_numbers = #tpu.dot_dimension_numbers<[1], [0], [0], [1], [0, 0, 1, 1], [], []>} : vector<16x128xbf16>, vector<128x64xbf16>, vector<16x64xf32> -> vector<16x64xf32>
    %c0_86 = arith.constant 0 : index
    %c1_87 = arith.constant 1 : index
    %c0_88 = arith.constant 0 : index
    %c0_89 = arith.constant 0 : index
    %161 = vector.load %arg15[%c0_86, %c1_87, %c0_88, %c0_89] : memref<1x2x128x64xbf16, #tpu.memory_space<vmem>>, vector<1x1x128x64xbf16>
    %162 = vector.shape_cast %161 : vector<1x1x128x64xbf16> to vector<128x64xbf16>
    %cst_90 = arith.constant dense<0.000000e+00> : vector<16x64xf32>
    %163 = tpu.matmul %120, %162, %cst_90 {dimension_numbers = #tpu.dot_dimension_numbers<[1], [0], [0], [1], [0, 0, 1, 1], [], []>} : vector<16x128xbf16>, vector<128x64xbf16>, vector<16x64xf32> -> vector<16x64xf32>
    %164 = vector.shape_cast %157 : vector<16x64xf32> to vector<2x8x64xf32>
    %165 = arith.truncf %164 : vector<2x8x64xf32> to vector<2x8x64xbf16>
    %166 = vector.shape_cast %160 : vector<16x64xf32> to vector<2x8x64xf32>
    %167 = arith.truncf %166 : vector<2x8x64xf32> to vector<2x8x64xbf16>
    %168 = vector.shape_cast %163 : vector<16x64xf32> to vector<2x8x64xf32>
    %169 = arith.truncf %168 : vector<2x8x64xf32> to vector<2x8x64xbf16>
    "tpu.trace_start"() <{level = 10 : i32, message = "bqd,bkd->bqk"}> : () -> ()
    %cst_91 = arith.constant dense<0.000000e+00> : vector<2x8x8xf32>
    %170 = tpu.matmul %165, %167, %cst_91 {dimension_numbers = #tpu.dot_dimension_numbers<[2], [2], [1], [1], [0, 0, 0, 1, 1, 1], [0], [0]>} : vector<2x8x64xbf16>, vector<2x8x64xbf16>, vector<2x8x8xf32> -> vector<2x8x8xf32>
    "tpu.trace_stop"() : () -> ()
    %cst_92 = arith.constant dense<0xFF800000> : vector<2x8xf32>
    %171 = vector.multi_reduction <maximumf>, %170, %cst_92 [2] : vector<2x8x8xf32> to vector<2x8xf32>
    %172 = vector.shape_cast %171 : vector<2x8xf32> to vector<2x8x1xf32>
    %173 = vector.broadcast %172 : vector<2x8x1xf32> to vector<2x8x8xf32>
    %174 = arith.subf %170, %173 : vector<2x8x8xf32>
    %175 = math.exp %174 : vector<2x8x8xf32>
    %cst_93 = arith.constant dense<0.000000e+00> : vector<2x8xf32>
    %176 = vector.multi_reduction <add>, %175, %cst_93 [2] : vector<2x8x8xf32> to vector<2x8xf32>
    %177 = vector.shape_cast %176 : vector<2x8xf32> to vector<2x8x1xf32>
    %178 = vector.broadcast %177 : vector<2x8x1xf32> to vector<2x8x8xf32>
    %179 = arith.divf %175, %178 : vector<2x8x8xf32>
    %180 = arith.truncf %179 : vector<2x8x8xf32> to vector<2x8x8xbf16>
    "tpu.trace_start"() <{level = 10 : i32, message = "bqk,bkd->bqd"}> : () -> ()
    %cst_94 = arith.constant dense<0.000000e+00> : vector<2x8x64xf32>
    %181 = tpu.matmul %180, %169, %cst_94 {dimension_numbers = #tpu.dot_dimension_numbers<[2], [1], [1], [2], [0, 0, 0, 1, 1, 2], [0], [0]>} : vector<2x8x8xbf16>, vector<2x8x64xbf16>, vector<2x8x64xf32> -> vector<2x8x64xf32>
    "tpu.trace_stop"() : () -> ()
    %182 = vector.shape_cast %181 : vector<2x8x64xf32> to vector<16x64xf32>
    %183 = arith.truncf %182 : vector<16x64xf32> to vector<16x64xbf16>
    %c0_95 = arith.constant 0 : index
    %c1_96 = arith.constant 1 : index
    %c0_97 = arith.constant 0 : index
    %c0_98 = arith.constant 0 : index
    %184 = vector.load %arg16[%c0_95, %c1_96, %c0_97, %c0_98] : memref<1x2x64x128xbf16, #tpu.memory_space<vmem>>, vector<1x1x64x128xbf16>
    %185 = vector.shape_cast %184 : vector<1x1x64x128xbf16> to vector<64x128xbf16>
    %cst_99 = arith.constant dense<0.000000e+00> : vector<16x128xf32>
    %186 = tpu.matmul %183, %185, %cst_99 {dimension_numbers = #tpu.dot_dimension_numbers<[1], [0], [0], [1], [0, 0, 1, 1], [], []>} : vector<16x64xbf16>, vector<64x128xbf16>, vector<16x128xf32> -> vector<16x128xf32>
    %187 = arith.addf %154, %186 : vector<16x128xf32>
    %c0_100 = arith.constant 0 : index
    %c0_101 = arith.constant 0 : index
    %c0_102 = arith.constant 0 : index
    %188 = vector.load %arg17[%c0_100, %c0_101, %c0_102] : memref<1x1x128xf32, #tpu.memory_space<vmem>>, vector<1x1x128xf32>
    %189 = vector.shape_cast %188 : vector<1x1x128xf32> to vector<128xf32>
    %c0_103 = arith.constant 0 : index
    %c0_104 = arith.constant 0 : index
    %c0_105 = arith.constant 0 : index
    %190 = vector.load %arg18[%c0_103, %c0_104, %c0_105] : memref<1x1x128xf32, #tpu.memory_space<vmem>>, vector<1x1x128xf32>
    %191 = vector.shape_cast %190 : vector<1x1x128xf32> to vector<128xf32>
    %cst_106 = arith.constant dense<0.000000e+00> : vector<16xf32>
    %192 = vector.multi_reduction <add>, %187, %cst_106 [1] : vector<16x128xf32> to vector<16xf32>
    %193 = vector.shape_cast %192 : vector<16xf32> to vector<16x1xf32>
    %cst_107 = arith.constant 1.280000e+02 : f32
    %194 = vector.broadcast %cst_107 : f32 to vector<16x1xf32>
    %195 = arith.divf %193, %194 : vector<16x1xf32>
    %196 = vector.broadcast %195 : vector<16x1xf32> to vector<16x128xf32>
    %197 = arith.subf %187, %196 : vector<16x128xf32>
    %198 = arith.mulf %197, %197 : vector<16x128xf32>
    %cst_108 = arith.constant dense<0.000000e+00> : vector<16xf32>
    %199 = vector.multi_reduction <add>, %198, %cst_108 [1] : vector<16x128xf32> to vector<16xf32>
    %200 = vector.shape_cast %199 : vector<16xf32> to vector<16x1xf32>
    %cst_109 = arith.constant 1.280000e+02 : f32
    %201 = vector.broadcast %cst_109 : f32 to vector<16x1xf32>
    %202 = arith.divf %200, %201 : vector<16x1xf32>
    %203 = vector.broadcast %195 : vector<16x1xf32> to vector<16x128xf32>
    %204 = arith.subf %187, %203 : vector<16x128xf32>
    %cst_110 = arith.constant 9.99999974E-6 : f32
    %205 = vector.broadcast %cst_110 : f32 to vector<16x1xf32>
    %206 = arith.addf %202, %205 : vector<16x1xf32>
    %207 = math.rsqrt %206 : vector<16x1xf32>
    %208 = vector.broadcast %207 : vector<16x1xf32> to vector<16x128xf32>
    %209 = arith.mulf %204, %208 : vector<16x128xf32>
    %210 = vector.shape_cast %189 : vector<128xf32> to vector<1x128xf32>
    %211 = vector.broadcast %210 : vector<1x128xf32> to vector<16x128xf32>
    %212 = arith.mulf %209, %211 : vector<16x128xf32>
    %213 = vector.shape_cast %191 : vector<128xf32> to vector<1x128xf32>
    %214 = vector.broadcast %213 : vector<1x128xf32> to vector<16x128xf32>
    %215 = arith.addf %212, %214 : vector<16x128xf32>
    %216 = arith.addf %91, %215 : vector<16x128xf32>
    %c0_111 = arith.constant 0 : index
    %c0_112 = arith.constant 0 : index
    %c0_113 = arith.constant 0 : index
    %217 = vector.load %arg19[%c0_111, %c0_112, %c0_113] : memref<1x1x128xf32, #tpu.memory_space<vmem>>, vector<1x1x128xf32>
    %218 = vector.shape_cast %217 : vector<1x1x128xf32> to vector<128xf32>
    %c0_114 = arith.constant 0 : index
    %c0_115 = arith.constant 0 : index
    %c0_116 = arith.constant 0 : index
    %219 = vector.load %arg20[%c0_114, %c0_115, %c0_116] : memref<1x1x128xf32, #tpu.memory_space<vmem>>, vector<1x1x128xf32>
    %220 = vector.shape_cast %219 : vector<1x1x128xf32> to vector<128xf32>
    %cst_117 = arith.constant dense<0.000000e+00> : vector<16xf32>
    %221 = vector.multi_reduction <add>, %216, %cst_117 [1] : vector<16x128xf32> to vector<16xf32>
    %222 = vector.shape_cast %221 : vector<16xf32> to vector<16x1xf32>
    %cst_118 = arith.constant 1.280000e+02 : f32
    %223 = vector.broadcast %cst_118 : f32 to vector<16x1xf32>
    %224 = arith.divf %222, %223 : vector<16x1xf32>
    %225 = vector.broadcast %224 : vector<16x1xf32> to vector<16x128xf32>
    %226 = arith.subf %216, %225 : vector<16x128xf32>
    %227 = arith.mulf %226, %226 : vector<16x128xf32>
    %cst_119 = arith.constant dense<0.000000e+00> : vector<16xf32>
    %228 = vector.multi_reduction <add>, %227, %cst_119 [1] : vector<16x128xf32> to vector<16xf32>
    %229 = vector.shape_cast %228 : vector<16xf32> to vector<16x1xf32>
    %cst_120 = arith.constant 1.280000e+02 : f32
    %230 = vector.broadcast %cst_120 : f32 to vector<16x1xf32>
    %231 = arith.divf %229, %230 : vector<16x1xf32>
    %232 = vector.broadcast %224 : vector<16x1xf32> to vector<16x128xf32>
    %233 = arith.subf %216, %232 : vector<16x128xf32>
    %cst_121 = arith.constant 9.99999974E-6 : f32
    %234 = vector.broadcast %cst_121 : f32 to vector<16x1xf32>
    %235 = arith.addf %231, %234 : vector<16x1xf32>
    %236 = math.rsqrt %235 : vector<16x1xf32>
    %237 = vector.broadcast %236 : vector<16x1xf32> to vector<16x128xf32>
    %238 = arith.mulf %233, %237 : vector<16x128xf32>
    %239 = vector.shape_cast %218 : vector<128xf32> to vector<1x128xf32>
    %240 = vector.broadcast %239 : vector<1x128xf32> to vector<16x128xf32>
    %241 = arith.mulf %238, %240 : vector<16x128xf32>
    %242 = vector.shape_cast %220 : vector<128xf32> to vector<1x128xf32>
    %243 = vector.broadcast %242 : vector<1x128xf32> to vector<16x128xf32>
    %244 = arith.addf %241, %243 : vector<16x128xf32>
    %c0_122 = arith.constant 0 : index
    %c0_123 = arith.constant 0 : index
    %c0_124 = arith.constant 0 : index
    %245 = vector.load %arg21[%c0_122, %c0_123, %c0_124] : memref<1x128x512xbf16, #tpu.memory_space<vmem>>, vector<1x128x512xbf16>
    %246 = vector.shape_cast %245 : vector<1x128x512xbf16> to vector<128x512xbf16>
    %247 = arith.truncf %244 : vector<16x128xf32> to vector<16x128xbf16>
    %cst_125 = arith.constant dense<0.000000e+00> : vector<16x512xf32>
    %248 = tpu.matmul %247, %246, %cst_125 {dimension_numbers = #tpu.dot_dimension_numbers<[1], [0], [0], [1], [0, 0, 1, 1], [], []>} : vector<16x128xbf16>, vector<128x512xbf16>, vector<16x512xf32> -> vector<16x512xf32>
    %c0_126 = arith.constant 0 : index
    %c0_127 = arith.constant 0 : index
    %c0_128 = arith.constant 0 : index
    %249 = vector.load %arg22[%c0_126, %c0_127, %c0_128] : memref<1x1x512xf32, #tpu.memory_space<vmem>>, vector<1x1x512xf32>
    %250 = vector.shape_cast %249 : vector<1x1x512xf32> to vector<512xf32>
    %251 = vector.shape_cast %250 : vector<512xf32> to vector<1x512xf32>
    %252 = vector.broadcast %251 : vector<1x512xf32> to vector<16x512xf32>
    %253 = arith.addf %248, %252 : vector<16x512xf32>
    %254 = vector.extract_strided_slice %253 {offsets = [0, 0], sizes = [16, 256], strides = [1, 1]} : vector<16x512xf32> to vector<16x256xf32>
    %255 = vector.extract_strided_slice %253 {offsets = [0, 256], sizes = [16, 256], strides = [1, 1]} : vector<16x512xf32> to vector<16x256xf32>
    %256 = arith.negf %255 : vector<16x256xf32>
    %257 = math.exp %256 : vector<16x256xf32>
    %cst_129 = arith.constant 1.000000e+00 : f32
    %258 = vector.broadcast %cst_129 : f32 to vector<16x256xf32>
    %259 = arith.addf %258, %257 : vector<16x256xf32>
    %260 = arith.divf %258, %259 : vector<16x256xf32>
    %261 = arith.mulf %254, %260 : vector<16x256xf32>
    %262 = tpu.iota {dimensions = array<i32: 1>} : vector<2x8x1xi32>
    %263 = vector.shape_cast %262 : vector<2x8x1xi32> to vector<16x1xi32>
    %c0_130 = arith.constant 0 : index
    %c0_131 = arith.constant 0 : index
    %c0_132 = arith.constant 0 : index
    %264 = vector.load %arg23[%c0_130, %c0_131, %c0_132] : memref<1x7x256xf32, #tpu.memory_space<vmem>>, vector<1x7x256xf32>
    %265 = vector.shape_cast %264 : vector<1x7x256xf32> to vector<7x256xf32>
    %cst_133 = arith.constant 0.000000e+00 : f32
    %266 = vector.broadcast %cst_133 : f32 to vector<16x256xf32>
    %267 = vector.extract_strided_slice %261 {offsets = [13, 0], sizes = [3, 256], strides = [1, 1]} : vector<16x256xf32> to vector<3x256xf32>
    %268 = vector.extract_strided_slice %261 {offsets = [0, 0], sizes = [13, 256], strides = [1, 1]} : vector<16x256xf32> to vector<13x256xf32>
    %269 = tpu.concatenate %267, %268 in 0 : vector<3x256xf32>, vector<13x256xf32> -> vector<16x256xf32>
    %c-3_i32 = arith.constant -3 : i32
    %270 = vector.broadcast %c-3_i32 : i32 to vector<16x1xi32>
    %271 = arith.addi %263, %270 : vector<16x1xi32>
    %c0_i32_134 = arith.constant 0 : i32
    %272 = vector.broadcast %c0_i32_134 : i32 to vector<16x1xi32>
    %273 = arith.cmpi sge, %271, %272 : vector<16x1xi32>
    %c-3_i32_135 = arith.constant -3 : i32
    %274 = vector.broadcast %c-3_i32_135 : i32 to vector<16x1xi32>
    %275 = arith.addi %263, %274 : vector<16x1xi32>
    %c8_i32 = arith.constant 8 : i32
    %276 = vector.broadcast %c8_i32 : i32 to vector<16x1xi32>
    %277 = arith.cmpi slt, %275, %276 : vector<16x1xi32>
    %278 = arith.andi %273, %277 : vector<16x1xi1>
    %cst_136 = arith.constant 0.000000e+00 : f32
    %279 = vector.shape_cast %278 : vector<16x1xi1> to vector<16x1xi1>
    %280 = vector.broadcast %279 : vector<16x1xi1> to vector<16x256xi1>
    %281 = vector.broadcast %cst_136 : f32 to vector<16x256xf32>
    %282 = arith.select %280, %269, %281 : vector<16x256xi1>, vector<16x256xf32>
    %283 = vector.extract_strided_slice %265 {offsets = [0, 0], sizes = [1, 256], strides = [1, 1]} : vector<7x256xf32> to vector<1x256xf32>
    %284 = vector.shape_cast %283 : vector<1x256xf32> to vector<256xf32>
    %285 = vector.shape_cast %284 : vector<256xf32> to vector<1x256xf32>
    %286 = vector.broadcast %285 : vector<1x256xf32> to vector<16x256xf32>
    %287 = arith.mulf %282, %286 : vector<16x256xf32>
    %288 = arith.addf %266, %287 : vector<16x256xf32>
    %289 = vector.extract_strided_slice %261 {offsets = [14, 0], sizes = [2, 256], strides = [1, 1]} : vector<16x256xf32> to vector<2x256xf32>
    %290 = vector.extract_strided_slice %261 {offsets = [0, 0], sizes = [14, 256], strides = [1, 1]} : vector<16x256xf32> to vector<14x256xf32>
    %291 = tpu.concatenate %289, %290 in 0 : vector<2x256xf32>, vector<14x256xf32> -> vector<16x256xf32>
    %c-2_i32 = arith.constant -2 : i32
    %292 = vector.broadcast %c-2_i32 : i32 to vector<16x1xi32>
    %293 = arith.addi %263, %292 : vector<16x1xi32>
    %c0_i32_137 = arith.constant 0 : i32
    %294 = vector.broadcast %c0_i32_137 : i32 to vector<16x1xi32>
    %295 = arith.cmpi sge, %293, %294 : vector<16x1xi32>
    %c-2_i32_138 = arith.constant -2 : i32
    %296 = vector.broadcast %c-2_i32_138 : i32 to vector<16x1xi32>
    %297 = arith.addi %263, %296 : vector<16x1xi32>
    %c8_i32_139 = arith.constant 8 : i32
    %298 = vector.broadcast %c8_i32_139 : i32 to vector<16x1xi32>
    %299 = arith.cmpi slt, %297, %298 : vector<16x1xi32>
    %300 = arith.andi %295, %299 : vector<16x1xi1>
    %cst_140 = arith.constant 0.000000e+00 : f32
    %301 = vector.shape_cast %300 : vector<16x1xi1> to vector<16x1xi1>
    %302 = vector.broadcast %301 : vector<16x1xi1> to vector<16x256xi1>
    %303 = vector.broadcast %cst_140 : f32 to vector<16x256xf32>
    %304 = arith.select %302, %291, %303 : vector<16x256xi1>, vector<16x256xf32>
    %305 = vector.extract_strided_slice %265 {offsets = [1, 0], sizes = [1, 256], strides = [1, 1]} : vector<7x256xf32> to vector<1x256xf32>
    %306 = vector.shape_cast %305 : vector<1x256xf32> to vector<256xf32>
    %307 = vector.shape_cast %306 : vector<256xf32> to vector<1x256xf32>
    %308 = vector.broadcast %307 : vector<1x256xf32> to vector<16x256xf32>
    %309 = arith.mulf %304, %308 : vector<16x256xf32>
    %310 = arith.addf %288, %309 : vector<16x256xf32>
    %311 = vector.extract_strided_slice %261 {offsets = [15, 0], sizes = [1, 256], strides = [1, 1]} : vector<16x256xf32> to vector<1x256xf32>
    %312 = vector.extract_strided_slice %261 {offsets = [0, 0], sizes = [15, 256], strides = [1, 1]} : vector<16x256xf32> to vector<15x256xf32>
    %313 = tpu.concatenate %311, %312 in 0 : vector<1x256xf32>, vector<15x256xf32> -> vector<16x256xf32>
    %c-1_i32 = arith.constant -1 : i32
    %314 = vector.broadcast %c-1_i32 : i32 to vector<16x1xi32>
    %315 = arith.addi %263, %314 : vector<16x1xi32>
    %c0_i32_141 = arith.constant 0 : i32
    %316 = vector.broadcast %c0_i32_141 : i32 to vector<16x1xi32>
    %317 = arith.cmpi sge, %315, %316 : vector<16x1xi32>
    %c-1_i32_142 = arith.constant -1 : i32
    %318 = vector.broadcast %c-1_i32_142 : i32 to vector<16x1xi32>
    %319 = arith.addi %263, %318 : vector<16x1xi32>
    %c8_i32_143 = arith.constant 8 : i32
    %320 = vector.broadcast %c8_i32_143 : i32 to vector<16x1xi32>
    %321 = arith.cmpi slt, %319, %320 : vector<16x1xi32>
    %322 = arith.andi %317, %321 : vector<16x1xi1>
    %cst_144 = arith.constant 0.000000e+00 : f32
    %323 = vector.shape_cast %322 : vector<16x1xi1> to vector<16x1xi1>
    %324 = vector.broadcast %323 : vector<16x1xi1> to vector<16x256xi1>
    %325 = vector.broadcast %cst_144 : f32 to vector<16x256xf32>
    %326 = arith.select %324, %313, %325 : vector<16x256xi1>, vector<16x256xf32>
    %327 = vector.extract_strided_slice %265 {offsets = [2, 0], sizes = [1, 256], strides = [1, 1]} : vector<7x256xf32> to vector<1x256xf32>
    %328 = vector.shape_cast %327 : vector<1x256xf32> to vector<256xf32>
    %329 = vector.shape_cast %328 : vector<256xf32> to vector<1x256xf32>
    %330 = vector.broadcast %329 : vector<1x256xf32> to vector<16x256xf32>
    %331 = arith.mulf %326, %330 : vector<16x256xf32>
    %332 = arith.addf %310, %331 : vector<16x256xf32>
    %c0_i32_145 = arith.constant 0 : i32
    %333 = vector.broadcast %c0_i32_145 : i32 to vector<16x1xi32>
    %334 = arith.addi %263, %333 : vector<16x1xi32>
    %c0_i32_146 = arith.constant 0 : i32
    %335 = vector.broadcast %c0_i32_146 : i32 to vector<16x1xi32>
    %336 = arith.cmpi sge, %334, %335 : vector<16x1xi32>
    %c0_i32_147 = arith.constant 0 : i32
    %337 = vector.broadcast %c0_i32_147 : i32 to vector<16x1xi32>
    %338 = arith.addi %263, %337 : vector<16x1xi32>
    %c8_i32_148 = arith.constant 8 : i32
    %339 = vector.broadcast %c8_i32_148 : i32 to vector<16x1xi32>
    %340 = arith.cmpi slt, %338, %339 : vector<16x1xi32>
    %341 = arith.andi %336, %340 : vector<16x1xi1>
    %cst_149 = arith.constant 0.000000e+00 : f32
    %342 = vector.shape_cast %341 : vector<16x1xi1> to vector<16x1xi1>
    %343 = vector.broadcast %342 : vector<16x1xi1> to vector<16x256xi1>
    %344 = vector.broadcast %cst_149 : f32 to vector<16x256xf32>
    %345 = arith.select %343, %261, %344 : vector<16x256xi1>, vector<16x256xf32>
    %346 = vector.extract_strided_slice %265 {offsets = [3, 0], sizes = [1, 256], strides = [1, 1]} : vector<7x256xf32> to vector<1x256xf32>
    %347 = vector.shape_cast %346 : vector<1x256xf32> to vector<256xf32>
    %348 = vector.shape_cast %347 : vector<256xf32> to vector<1x256xf32>
    %349 = vector.broadcast %348 : vector<1x256xf32> to vector<16x256xf32>
    %350 = arith.mulf %345, %349 : vector<16x256xf32>
    %351 = arith.addf %332, %350 : vector<16x256xf32>
    %352 = vector.extract_strided_slice %261 {offsets = [1, 0], sizes = [15, 256], strides = [1, 1]} : vector<16x256xf32> to vector<15x256xf32>
    %353 = vector.extract_strided_slice %261 {offsets = [0, 0], sizes = [1, 256], strides = [1, 1]} : vector<16x256xf32> to vector<1x256xf32>
    %354 = tpu.concatenate %352, %353 in 0 : vector<15x256xf32>, vector<1x256xf32> -> vector<16x256xf32>
    %c1_i32 = arith.constant 1 : i32
    %355 = vector.broadcast %c1_i32 : i32 to vector<16x1xi32>
    %356 = arith.addi %263, %355 : vector<16x1xi32>
    %c0_i32_150 = arith.constant 0 : i32
    %357 = vector.broadcast %c0_i32_150 : i32 to vector<16x1xi32>
    %358 = arith.cmpi sge, %356, %357 : vector<16x1xi32>
    %c1_i32_151 = arith.constant 1 : i32
    %359 = vector.broadcast %c1_i32_151 : i32 to vector<16x1xi32>
    %360 = arith.addi %263, %359 : vector<16x1xi32>
    %c8_i32_152 = arith.constant 8 : i32
    %361 = vector.broadcast %c8_i32_152 : i32 to vector<16x1xi32>
    %362 = arith.cmpi slt, %360, %361 : vector<16x1xi32>
    %363 = arith.andi %358, %362 : vector<16x1xi1>
    %cst_153 = arith.constant 0.000000e+00 : f32
    %364 = vector.shape_cast %363 : vector<16x1xi1> to vector<16x1xi1>
    %365 = vector.broadcast %364 : vector<16x1xi1> to vector<16x256xi1>
    %366 = vector.broadcast %cst_153 : f32 to vector<16x256xf32>
    %367 = arith.select %365, %354, %366 : vector<16x256xi1>, vector<16x256xf32>
    %368 = vector.extract_strided_slice %265 {offsets = [4, 0], sizes = [1, 256], strides = [1, 1]} : vector<7x256xf32> to vector<1x256xf32>
    %369 = vector.shape_cast %368 : vector<1x256xf32> to vector<256xf32>
    %370 = vector.shape_cast %369 : vector<256xf32> to vector<1x256xf32>
    %371 = vector.broadcast %370 : vector<1x256xf32> to vector<16x256xf32>
    %372 = arith.mulf %367, %371 : vector<16x256xf32>
    %373 = arith.addf %351, %372 : vector<16x256xf32>
    %374 = vector.extract_strided_slice %261 {offsets = [2, 0], sizes = [14, 256], strides = [1, 1]} : vector<16x256xf32> to vector<14x256xf32>
    %375 = vector.extract_strided_slice %261 {offsets = [0, 0], sizes = [2, 256], strides = [1, 1]} : vector<16x256xf32> to vector<2x256xf32>
    %376 = tpu.concatenate %374, %375 in 0 : vector<14x256xf32>, vector<2x256xf32> -> vector<16x256xf32>
    %c2_i32 = arith.constant 2 : i32
    %377 = vector.broadcast %c2_i32 : i32 to vector<16x1xi32>
    %378 = arith.addi %263, %377 : vector<16x1xi32>
    %c0_i32_154 = arith.constant 0 : i32
    %379 = vector.broadcast %c0_i32_154 : i32 to vector<16x1xi32>
    %380 = arith.cmpi sge, %378, %379 : vector<16x1xi32>
    %c2_i32_155 = arith.constant 2 : i32
    %381 = vector.broadcast %c2_i32_155 : i32 to vector<16x1xi32>
    %382 = arith.addi %263, %381 : vector<16x1xi32>
    %c8_i32_156 = arith.constant 8 : i32
    %383 = vector.broadcast %c8_i32_156 : i32 to vector<16x1xi32>
    %384 = arith.cmpi slt, %382, %383 : vector<16x1xi32>
    %385 = arith.andi %380, %384 : vector<16x1xi1>
    %cst_157 = arith.constant 0.000000e+00 : f32
    %386 = vector.shape_cast %385 : vector<16x1xi1> to vector<16x1xi1>
    %387 = vector.broadcast %386 : vector<16x1xi1> to vector<16x256xi1>
    %388 = vector.broadcast %cst_157 : f32 to vector<16x256xf32>
    %389 = arith.select %387, %376, %388 : vector<16x256xi1>, vector<16x256xf32>
    %390 = vector.extract_strided_slice %265 {offsets = [5, 0], sizes = [1, 256], strides = [1, 1]} : vector<7x256xf32> to vector<1x256xf32>
    %391 = vector.shape_cast %390 : vector<1x256xf32> to vector<256xf32>
    %392 = vector.shape_cast %391 : vector<256xf32> to vector<1x256xf32>
    %393 = vector.broadcast %392 : vector<1x256xf32> to vector<16x256xf32>
    %394 = arith.mulf %389, %393 : vector<16x256xf32>
    %395 = arith.addf %373, %394 : vector<16x256xf32>
    %396 = vector.extract_strided_slice %261 {offsets = [3, 0], sizes = [13, 256], strides = [1, 1]} : vector<16x256xf32> to vector<13x256xf32>
    %397 = vector.extract_strided_slice %261 {offsets = [0, 0], sizes = [3, 256], strides = [1, 1]} : vector<16x256xf32> to vector<3x256xf32>
    %398 = tpu.concatenate %396, %397 in 0 : vector<13x256xf32>, vector<3x256xf32> -> vector<16x256xf32>
    %c3_i32 = arith.constant 3 : i32
    %399 = vector.broadcast %c3_i32 : i32 to vector<16x1xi32>
    %400 = arith.addi %263, %399 : vector<16x1xi32>
    %c0_i32_158 = arith.constant 0 : i32
    %401 = vector.broadcast %c0_i32_158 : i32 to vector<16x1xi32>
    %402 = arith.cmpi sge, %400, %401 : vector<16x1xi32>
    %c3_i32_159 = arith.constant 3 : i32
    %403 = vector.broadcast %c3_i32_159 : i32 to vector<16x1xi32>
    %404 = arith.addi %263, %403 : vector<16x1xi32>
    %c8_i32_160 = arith.constant 8 : i32
    %405 = vector.broadcast %c8_i32_160 : i32 to vector<16x1xi32>
    %406 = arith.cmpi slt, %404, %405 : vector<16x1xi32>
    %407 = arith.andi %402, %406 : vector<16x1xi1>
    %cst_161 = arith.constant 0.000000e+00 : f32
    %408 = vector.shape_cast %407 : vector<16x1xi1> to vector<16x1xi1>
    %409 = vector.broadcast %408 : vector<16x1xi1> to vector<16x256xi1>
    %410 = vector.broadcast %cst_161 : f32 to vector<16x256xf32>
    %411 = arith.select %409, %398, %410 : vector<16x256xi1>, vector<16x256xf32>
    %412 = vector.extract_strided_slice %265 {offsets = [6, 0], sizes = [1, 256], strides = [1, 1]} : vector<7x256xf32> to vector<1x256xf32>
    %413 = vector.shape_cast %412 : vector<1x256xf32> to vector<256xf32>
    %414 = vector.shape_cast %413 : vector<256xf32> to vector<1x256xf32>
    %415 = vector.broadcast %414 : vector<1x256xf32> to vector<16x256xf32>
    %416 = arith.mulf %411, %415 : vector<16x256xf32>
    %417 = arith.addf %395, %416 : vector<16x256xf32>
    %c0_162 = arith.constant 0 : index
    %c0_163 = arith.constant 0 : index
    %c0_164 = arith.constant 0 : index
    %418 = vector.load %arg24[%c0_162, %c0_163, %c0_164] : memref<1x1x256xf32, #tpu.memory_space<vmem>>, vector<1x1x256xf32>
    %419 = vector.shape_cast %418 : vector<1x1x256xf32> to vector<256xf32>
    %420 = vector.shape_cast %419 : vector<256xf32> to vector<1x256xf32>
    %421 = vector.broadcast %420 : vector<1x256xf32> to vector<16x256xf32>
    %422 = arith.addf %417, %421 : vector<16x256xf32>
    %423 = arith.negf %422 : vector<16x256xf32>
    %424 = math.exp %423 : vector<16x256xf32>
    %cst_165 = arith.constant 1.000000e+00 : f32
    %425 = vector.broadcast %cst_165 : f32 to vector<16x256xf32>
    %426 = arith.addf %425, %424 : vector<16x256xf32>
    %427 = arith.divf %425, %426 : vector<16x256xf32>
    %428 = arith.mulf %422, %427 : vector<16x256xf32>
    %c0_166 = arith.constant 0 : index
    %c0_167 = arith.constant 0 : index
    %c0_168 = arith.constant 0 : index
    %429 = vector.load %arg25[%c0_166, %c0_167, %c0_168] : memref<1x256x128xbf16, #tpu.memory_space<vmem>>, vector<1x256x128xbf16>
    %430 = vector.shape_cast %429 : vector<1x256x128xbf16> to vector<256x128xbf16>
    %431 = arith.truncf %428 : vector<16x256xf32> to vector<16x256xbf16>
    %cst_169 = arith.constant dense<0.000000e+00> : vector<16x128xf32>
    %432 = tpu.matmul %431, %430, %cst_169 {dimension_numbers = #tpu.dot_dimension_numbers<[1], [0], [0], [1], [0, 0, 1, 1], [], []>} : vector<16x256xbf16>, vector<256x128xbf16>, vector<16x128xf32> -> vector<16x128xf32>
    %c0_170 = arith.constant 0 : index
    %c0_171 = arith.constant 0 : index
    %c0_172 = arith.constant 0 : index
    %433 = vector.load %arg26[%c0_170, %c0_171, %c0_172] : memref<1x1x128xf32, #tpu.memory_space<vmem>>, vector<1x1x128xf32>
    %434 = vector.shape_cast %433 : vector<1x1x128xf32> to vector<128xf32>
    %435 = vector.shape_cast %434 : vector<128xf32> to vector<1x128xf32>
    %436 = vector.broadcast %435 : vector<1x128xf32> to vector<16x128xf32>
    %437 = arith.addf %432, %436 : vector<16x128xf32>
    %438 = arith.addf %216, %437 : vector<16x128xf32>
    %c0_173 = arith.constant 0 : index
    %c0_174 = arith.constant 0 : index
    %c0_175 = arith.constant 0 : index
    %439 = vector.load %arg27[%c0_173, %c0_174, %c0_175] : memref<1x1x128xf32, #tpu.memory_space<vmem>>, vector<1x1x128xf32>
    %440 = vector.shape_cast %439 : vector<1x1x128xf32> to vector<128xf32>
    %c0_176 = arith.constant 0 : index
    %c0_177 = arith.constant 0 : index
    %c0_178 = arith.constant 0 : index
    %441 = vector.load %arg28[%c0_176, %c0_177, %c0_178] : memref<1x1x128xf32, #tpu.memory_space<vmem>>, vector<1x1x128xf32>
    %442 = vector.shape_cast %441 : vector<1x1x128xf32> to vector<128xf32>
    %cst_179 = arith.constant dense<0.000000e+00> : vector<16xf32>
    %443 = vector.multi_reduction <add>, %438, %cst_179 [1] : vector<16x128xf32> to vector<16xf32>
    %444 = vector.shape_cast %443 : vector<16xf32> to vector<16x1xf32>
    %cst_180 = arith.constant 1.280000e+02 : f32
    %445 = vector.broadcast %cst_180 : f32 to vector<16x1xf32>
    %446 = arith.divf %444, %445 : vector<16x1xf32>
    %447 = vector.broadcast %446 : vector<16x1xf32> to vector<16x128xf32>
    %448 = arith.subf %438, %447 : vector<16x128xf32>
    %449 = arith.mulf %448, %448 : vector<16x128xf32>
    %cst_181 = arith.constant dense<0.000000e+00> : vector<16xf32>
    %450 = vector.multi_reduction <add>, %449, %cst_181 [1] : vector<16x128xf32> to vector<16xf32>
    %451 = vector.shape_cast %450 : vector<16xf32> to vector<16x1xf32>
    %cst_182 = arith.constant 1.280000e+02 : f32
    %452 = vector.broadcast %cst_182 : f32 to vector<16x1xf32>
    %453 = arith.divf %451, %452 : vector<16x1xf32>
    %454 = vector.broadcast %446 : vector<16x1xf32> to vector<16x128xf32>
    %455 = arith.subf %438, %454 : vector<16x128xf32>
    %cst_183 = arith.constant 9.99999974E-6 : f32
    %456 = vector.broadcast %cst_183 : f32 to vector<16x1xf32>
    %457 = arith.addf %453, %456 : vector<16x1xf32>
    %458 = math.rsqrt %457 : vector<16x1xf32>
    %459 = vector.broadcast %458 : vector<16x1xf32> to vector<16x128xf32>
    %460 = arith.mulf %455, %459 : vector<16x128xf32>
    %461 = vector.shape_cast %440 : vector<128xf32> to vector<1x128xf32>
    %462 = vector.broadcast %461 : vector<1x128xf32> to vector<16x128xf32>
    %463 = arith.mulf %460, %462 : vector<16x128xf32>
    %464 = vector.shape_cast %442 : vector<128xf32> to vector<1x128xf32>
    %465 = vector.broadcast %464 : vector<1x128xf32> to vector<16x128xf32>
    %466 = arith.addf %463, %465 : vector<16x128xf32>
    %c0_184 = arith.constant 0 : index
    %c0_185 = arith.constant 0 : index
    %c0_186 = arith.constant 0 : index
    %467 = vector.load %arg29[%c0_184, %c0_185, %c0_186] : memref<1x128x256xbf16, #tpu.memory_space<vmem>>, vector<1x128x256xbf16>
    %468 = vector.shape_cast %467 : vector<1x128x256xbf16> to vector<128x256xbf16>
    %469 = arith.truncf %466 : vector<16x128xf32> to vector<16x128xbf16>
    %cst_187 = arith.constant dense<0.000000e+00> : vector<16x256xf32>
    %470 = tpu.matmul %469, %468, %cst_187 {dimension_numbers = #tpu.dot_dimension_numbers<[1], [0], [0], [1], [0, 0, 1, 1], [], []>} : vector<16x128xbf16>, vector<128x256xbf16>, vector<16x256xf32> -> vector<16x256xf32>
    %c0_188 = arith.constant 0 : index
    %c0_189 = arith.constant 0 : index
    %c0_190 = arith.constant 0 : index
    %471 = vector.load %arg30[%c0_188, %c0_189, %c0_190] : memref<1x1x256xf32, #tpu.memory_space<vmem>>, vector<1x1x256xf32>
    %472 = vector.shape_cast %471 : vector<1x1x256xf32> to vector<256xf32>
    %473 = vector.shape_cast %472 : vector<256xf32> to vector<1x256xf32>
    %474 = vector.broadcast %473 : vector<1x256xf32> to vector<16x256xf32>
    %475 = arith.addf %470, %474 : vector<16x256xf32>
    %cst_191 = arith.constant 5.000000e-01 : f32
    %476 = vector.broadcast %cst_191 : f32 to vector<16x256xf32>
    %477 = arith.mulf %476, %475 : vector<16x256xf32>
    %cst_192 = arith.constant 4.471500e-02 : f32
    %478 = vector.broadcast %cst_192 : f32 to vector<16x256xf32>
    %479 = arith.mulf %478, %475 : vector<16x256xf32>
    %480 = arith.mulf %479, %475 : vector<16x256xf32>
    %481 = arith.mulf %480, %475 : vector<16x256xf32>
    %482 = arith.addf %475, %481 : vector<16x256xf32>
    %cst_193 = arith.constant 0.797884583 : f32
    %483 = vector.broadcast %cst_193 : f32 to vector<16x256xf32>
    %484 = arith.mulf %483, %482 : vector<16x256xf32>
    %485 = math.tanh %484 : vector<16x256xf32>
    %cst_194 = arith.constant 1.000000e+00 : f32
    %486 = vector.broadcast %cst_194 : f32 to vector<16x256xf32>
    %487 = arith.addf %486, %485 : vector<16x256xf32>
    %488 = arith.mulf %477, %487 : vector<16x256xf32>
    %c0_195 = arith.constant 0 : index
    %c0_196 = arith.constant 0 : index
    %c0_197 = arith.constant 0 : index
    %489 = vector.load %arg31[%c0_195, %c0_196, %c0_197] : memref<1x256x128xbf16, #tpu.memory_space<vmem>>, vector<1x256x128xbf16>
    %490 = vector.shape_cast %489 : vector<1x256x128xbf16> to vector<256x128xbf16>
    %491 = arith.truncf %488 : vector<16x256xf32> to vector<16x256xbf16>
    %cst_198 = arith.constant dense<0.000000e+00> : vector<16x128xf32>
    %492 = tpu.matmul %491, %490, %cst_198 {dimension_numbers = #tpu.dot_dimension_numbers<[1], [0], [0], [1], [0, 0, 1, 1], [], []>} : vector<16x256xbf16>, vector<256x128xbf16>, vector<16x128xf32> -> vector<16x128xf32>
    %c0_199 = arith.constant 0 : index
    %c0_200 = arith.constant 0 : index
    %c0_201 = arith.constant 0 : index
    %493 = vector.load %arg32[%c0_199, %c0_200, %c0_201] : memref<1x1x128xf32, #tpu.memory_space<vmem>>, vector<1x1x128xf32>
    %494 = vector.shape_cast %493 : vector<1x1x128xf32> to vector<128xf32>
    %495 = vector.shape_cast %494 : vector<128xf32> to vector<1x128xf32>
    %496 = vector.broadcast %495 : vector<1x128xf32> to vector<16x128xf32>
    %497 = arith.addf %492, %496 : vector<16x128xf32>
    %c0_202 = arith.constant 0 : index
    %c0_203 = arith.constant 0 : index
    %c0_204 = arith.constant 0 : index
    %498 = vector.load %arg33[%c0_202, %c0_203, %c0_204] : memref<1x1x128xf32, #tpu.memory_space<vmem>>, vector<1x1x128xf32>
    %499 = vector.shape_cast %498 : vector<1x1x128xf32> to vector<128xf32>
    %c0_205 = arith.constant 0 : index
    %c0_206 = arith.constant 0 : index
    %c0_207 = arith.constant 0 : index
    %500 = vector.load %arg34[%c0_205, %c0_206, %c0_207] : memref<1x1x128xf32, #tpu.memory_space<vmem>>, vector<1x1x128xf32>
    %501 = vector.shape_cast %500 : vector<1x1x128xf32> to vector<128xf32>
    %cst_208 = arith.constant dense<0.000000e+00> : vector<16xf32>
    %502 = vector.multi_reduction <add>, %497, %cst_208 [1] : vector<16x128xf32> to vector<16xf32>
    %503 = vector.shape_cast %502 : vector<16xf32> to vector<16x1xf32>
    %cst_209 = arith.constant 1.280000e+02 : f32
    %504 = vector.broadcast %cst_209 : f32 to vector<16x1xf32>
    %505 = arith.divf %503, %504 : vector<16x1xf32>
    %506 = vector.broadcast %505 : vector<16x1xf32> to vector<16x128xf32>
    %507 = arith.subf %497, %506 : vector<16x128xf32>
    %508 = arith.mulf %507, %507 : vector<16x128xf32>
    %cst_210 = arith.constant dense<0.000000e+00> : vector<16xf32>
    %509 = vector.multi_reduction <add>, %508, %cst_210 [1] : vector<16x128xf32> to vector<16xf32>
    %510 = vector.shape_cast %509 : vector<16xf32> to vector<16x1xf32>
    %cst_211 = arith.constant 1.280000e+02 : f32
    %511 = vector.broadcast %cst_211 : f32 to vector<16x1xf32>
    %512 = arith.divf %510, %511 : vector<16x1xf32>
    %513 = vector.broadcast %505 : vector<16x1xf32> to vector<16x128xf32>
    %514 = arith.subf %497, %513 : vector<16x128xf32>
    %cst_212 = arith.constant 9.99999974E-6 : f32
    %515 = vector.broadcast %cst_212 : f32 to vector<16x1xf32>
    %516 = arith.addf %512, %515 : vector<16x1xf32>
    %517 = math.rsqrt %516 : vector<16x1xf32>
    %518 = vector.broadcast %517 : vector<16x1xf32> to vector<16x128xf32>
    %519 = arith.mulf %514, %518 : vector<16x128xf32>
    %520 = vector.shape_cast %499 : vector<128xf32> to vector<1x128xf32>
    %521 = vector.broadcast %520 : vector<1x128xf32> to vector<16x128xf32>
    %522 = arith.mulf %519, %521 : vector<16x128xf32>
    %523 = vector.shape_cast %501 : vector<128xf32> to vector<1x128xf32>
    %524 = vector.broadcast %523 : vector<1x128xf32> to vector<16x128xf32>
    %525 = arith.addf %522, %524 : vector<16x128xf32>
    %526 = arith.addf %438, %525 : vector<16x128xf32>
    %c0_213 = arith.constant 0 : index
    %c0_214 = arith.constant 0 : index
    %527 = vector.load %arg36[%c0_213, %c0_214] : memref<16x128xf32, #tpu.memory_space<vmem>>, vector<16x128xf32>
    tpu.vector_store %arg36[%c0_213, %c0_214], %526 {strides = array<i32>} : memref<16x128xf32, #tpu.memory_space<vmem>>, vector<16x128xf32>,
    %c1_i32_215 = arith.constant 1 : i32
    %528 = arith.cmpi eq, %arg1, %c1_i32_215 : i32
    %529 = arith.extui %528 : i1 to i32
    %c0_i32_216 = arith.constant 0 : i32
    %530 = arith.cmpi ne, %529, %c0_i32_216 : i32
    scf.if %530 {
      %531 = vector.shape_cast %526 : vector<16x128xf32> to vector<2x8x128xf32>
      %c0_217 = arith.constant 0 : index
      %c0_218 = arith.constant 0 : index
      %c0_219 = arith.constant 0 : index
      %532 = vector.load %arg35[%c0_217, %c0_218, %c0_219] : memref<2x8x128xf32, #tpu.memory_space<vmem>>, vector<2x8x128xf32>
      tpu.vector_store %arg35[%c0_217, %c0_218, %c0_219], %531 {strides = array<i32>} : memref<2x8x128xf32, #tpu.memory_space<vmem>>, vector<2x8x128xf32>,
    } else {
    }
    return
  }
  func.func @transform_0(%arg0: i32, %arg1: i32) -> (i32, i32, i32) {
    %c0_i32 = arith.constant 0 : i32
    %c0_i32_0 = arith.constant 0 : i32
    %c0_i32_1 = arith.constant 0 : i32
    return %arg0, %c0_i32, %c0_i32_0 : i32, i32, i32
  }
  func.func @transform_1(%arg0: i32, %arg1: i32) -> (i32, i32, i32) {
    %c0_i32 = arith.constant 0 : i32
    %c0_i32_0 = arith.constant 0 : i32
    %c0_i32_1 = arith.constant 0 : i32
    return %arg1, %c0_i32, %c0_i32_0 : i32, i32, i32
  }
  func.func @transform_2(%arg0: i32, %arg1: i32) -> (i32, i32, i32) {
    %c0_i32 = arith.constant 0 : i32
    %c0_i32_0 = arith.constant 0 : i32
    %c0_i32_1 = arith.constant 0 : i32
    return %arg1, %c0_i32, %c0_i32_0 : i32, i32, i32
  }
  func.func @transform_3(%arg0: i32, %arg1: i32) -> (i32, i32, i32) {
    %c0_i32 = arith.constant 0 : i32
    %c0_i32_0 = arith.constant 0 : i32
    %c0_i32_1 = arith.constant 0 : i32
    return %arg1, %c0_i32, %c0_i32_0 : i32, i32, i32
  }
  func.func @transform_4(%arg0: i32, %arg1: i32) -> (i32, i32, i32) {
    %c0_i32 = arith.constant 0 : i32
    %c0_i32_0 = arith.constant 0 : i32
    %c0_i32_1 = arith.constant 0 : i32
    return %arg1, %c0_i32, %c0_i32_0 : i32, i32, i32
  }
  func.func @transform_5(%arg0: i32, %arg1: i32) -> (i32, i32, i32) {
    %c0_i32 = arith.constant 0 : i32
    %c0_i32_0 = arith.constant 0 : i32
    %c0_i32_1 = arith.constant 0 : i32
    return %arg1, %c0_i32, %c0_i32_0 : i32, i32, i32
  }
  func.func @transform_6(%arg0: i32, %arg1: i32) -> (i32, i32, i32) {
    %c0_i32 = arith.constant 0 : i32
    %c0_i32_0 = arith.constant 0 : i32
    %c0_i32_1 = arith.constant 0 : i32
    return %arg1, %c0_i32, %c0_i32_0 : i32, i32, i32
  }
  func.func @transform_7(%arg0: i32, %arg1: i32) -> (i32, i32, i32) {
    %c0_i32 = arith.constant 0 : i32
    %c0_i32_0 = arith.constant 0 : i32
    %c0_i32_1 = arith.constant 0 : i32
    return %arg1, %c0_i32, %c0_i32_0 : i32, i32, i32
  }
  func.func @transform_8(%arg0: i32, %arg1: i32) -> (i32, i32, i32) {
    %c0_i32 = arith.constant 0 : i32
    %c0_i32_0 = arith.constant 0 : i32
    %c0_i32_1 = arith.constant 0 : i32
    return %arg1, %c0_i32, %c0_i32_0 : i32, i32, i32
  }
  func.func @transform_9(%arg0: i32, %arg1: i32) -> (i32, i32, i32) {
    %c0_i32 = arith.constant 0 : i32
    %c0_i32_0 = arith.constant 0 : i32
    %c0_i32_1 = arith.constant 0 : i32
    return %arg1, %c0_i32, %c0_i32_0 : i32, i32, i32
  }
  func.func @transform_10(%arg0: i32, %arg1: i32) -> (i32, i32, i32) {
    %c0_i32 = arith.constant 0 : i32
    %c0_i32_0 = arith.constant 0 : i32
    %c0_i32_1 = arith.constant 0 : i32
    return %arg1, %c0_i32, %c0_i32_0 : i32, i32, i32
  }
  func.func @transform_11(%arg0: i32, %arg1: i32) -> (i32, i32, i32, i32) {
    %c0_i32 = arith.constant 0 : i32
    %c0_i32_0 = arith.constant 0 : i32
    %c0_i32_1 = arith.constant 0 : i32
    %c0_i32_2 = arith.constant 0 : i32
    return %arg1, %c0_i32, %c0_i32_0, %c0_i32_1 : i32, i32, i32, i32
  }
  func.func @transform_12(%arg0: i32, %arg1: i32) -> (i32, i32, i32, i32) {
    %c0_i32 = arith.constant 0 : i32
    %c0_i32_0 = arith.constant 0 : i32
    %c0_i32_1 = arith.constant 0 : i32
    %c0_i32_2 = arith.constant 0 : i32
    return %arg1, %c0_i32, %c0_i32_0, %c0_i32_1 : i32, i32, i32, i32
  }
  func.func @transform_13(%arg0: i32, %arg1: i32) -> (i32, i32, i32, i32) {
    %c0_i32 = arith.constant 0 : i32
    %c0_i32_0 = arith.constant 0 : i32
    %c0_i32_1 = arith.constant 0 : i32
    %c0_i32_2 = arith.constant 0 : i32
    return %arg1, %c0_i32, %c0_i32_0, %c0_i32_1 : i32, i32, i32, i32
  }
  func.func @transform_14(%arg0: i32, %arg1: i32) -> (i32, i32, i32, i32) {
    %c0_i32 = arith.constant 0 : i32
    %c0_i32_0 = arith.constant 0 : i32
    %c0_i32_1 = arith.constant 0 : i32
    %c0_i32_2 = arith.constant 0 : i32
    return %arg1, %c0_i32, %c0_i32_0, %c0_i32_1 : i32, i32, i32, i32
  }
  func.func @transform_15(%arg0: i32, %arg1: i32) -> (i32, i32, i32) {
    %c0_i32 = arith.constant 0 : i32
    %c0_i32_0 = arith.constant 0 : i32
    %c0_i32_1 = arith.constant 0 : i32
    return %arg1, %c0_i32, %c0_i32_0 : i32, i32, i32
  }
  func.func @transform_16(%arg0: i32, %arg1: i32) -> (i32, i32, i32) {
    %c0_i32 = arith.constant 0 : i32
    %c0_i32_0 = arith.constant 0 : i32
    %c0_i32_1 = arith.constant 0 : i32
    return %arg1, %c0_i32, %c0_i32_0 : i32, i32, i32
  }
  func.func @transform_17(%arg0: i32, %arg1: i32) -> (i32, i32, i32) {
    %c0_i32 = arith.constant 0 : i32
    %c0_i32_0 = arith.constant 0 : i32
    %c0_i32_1 = arith.constant 0 : i32
    return %arg1, %c0_i32, %c0_i32_0 : i32, i32, i32
  }
  func.func @transform_18(%arg0: i32, %arg1: i32) -> (i32, i32, i32) {
    %c0_i32 = arith.constant 0 : i32
    %c0_i32_0 = arith.constant 0 : i32
    %c0_i32_1 = arith.constant 0 : i32
    return %arg1, %c0_i32, %c0_i32_0 : i32, i32, i32
  }
  func.func @transform_19(%arg0: i32, %arg1: i32) -> (i32, i32, i32) {
    %c0_i32 = arith.constant 0 : i32
    %c0_i32_0 = arith.constant 0 : i32
    %c0_i32_1 = arith.constant 0 : i32
    return %arg1, %c0_i32, %c0_i32_0 : i32, i32, i32
  }
  func.func @transform_20(%arg0: i32, %arg1: i32) -> (i32, i32, i32) {
    %c0_i32 = arith.constant 0 : i32
    %c0_i32_0 = arith.constant 0 : i32
    %c0_i32_1 = arith.constant 0 : i32
    return %arg1, %c0_i32, %c0_i32_0 : i32, i32, i32
  }
  func.func @transform_21(%arg0: i32, %arg1: i32) -> (i32, i32, i32) {
    %c0_i32 = arith.constant 0 : i32
    %c0_i32_0 = arith.constant 0 : i32
    %c0_i32_1 = arith.constant 0 : i32
    return %arg1, %c0_i32, %c0_i32_0 : i32, i32, i32
  }
  func.func @transform_22(%arg0: i32, %arg1: i32) -> (i32, i32, i32) {
    %c0_i32 = arith.constant 0 : i32
    %c0_i32_0 = arith.constant 0 : i32
    %c0_i32_1 = arith.constant 0 : i32
    return %arg1, %c0_i32, %c0_i32_0 : i32, i32, i32
  }
  func.func @transform_23(%arg0: i32, %arg1: i32) -> (i32, i32, i32) {
    %c0_i32 = arith.constant 0 : i32
    %c0_i32_0 = arith.constant 0 : i32
    %c0_i32_1 = arith.constant 0 : i32
    return %arg1, %c0_i32, %c0_i32_0 : i32, i32, i32
  }
  func.func @transform_24(%arg0: i32, %arg1: i32) -> (i32, i32, i32) {
    %c0_i32 = arith.constant 0 : i32
    %c0_i32_0 = arith.constant 0 : i32
    %c0_i32_1 = arith.constant 0 : i32
    return %arg1, %c0_i32, %c0_i32_0 : i32, i32, i32
  }
  func.func @transform_25(%arg0: i32, %arg1: i32) -> (i32, i32, i32) {
    %c0_i32 = arith.constant 0 : i32
    %c0_i32_0 = arith.constant 0 : i32
    %c0_i32_1 = arith.constant 0 : i32
    return %arg1, %c0_i32, %c0_i32_0 : i32, i32, i32
  }
  func.func @transform_26(%arg0: i32, %arg1: i32) -> (i32, i32, i32) {
    %c0_i32 = arith.constant 0 : i32
    %c0_i32_0 = arith.constant 0 : i32
    %c0_i32_1 = arith.constant 0 : i32
    return %arg1, %c0_i32, %c0_i32_0 : i32, i32, i32
  }
  func.func @transform_27(%arg0: i32, %arg1: i32) -> (i32, i32, i32) {
    %c0_i32 = arith.constant 0 : i32
    %c0_i32_0 = arith.constant 0 : i32
    %c0_i32_1 = arith.constant 0 : i32
    return %arg1, %c0_i32, %c0_i32_0 : i32, i32, i32
  }
  func.func @transform_28(%arg0: i32, %arg1: i32) -> (i32, i32, i32) {
    %c0_i32 = arith.constant 0 : i32
    %c0_i32_0 = arith.constant 0 : i32
    %c0_i32_1 = arith.constant 0 : i32
    return %arg1, %c0_i32, %c0_i32_0 : i32, i32, i32
  }
  func.func @transform_29(%arg0: i32, %arg1: i32) -> (i32, i32, i32) {
    %c0_i32 = arith.constant 0 : i32
    %c0_i32_0 = arith.constant 0 : i32
    %c0_i32_1 = arith.constant 0 : i32
    return %arg1, %c0_i32, %c0_i32_0 : i32, i32, i32
  }
  func.func @transform_30(%arg0: i32, %arg1: i32) -> (i32, i32, i32) {
    %c0_i32 = arith.constant 0 : i32
    %c0_i32_0 = arith.constant 0 : i32
    %c0_i32_1 = arith.constant 0 : i32
    return %arg1, %c0_i32, %c0_i32_0 : i32, i32, i32
  }
  func.func @transform_31(%arg0: i32, %arg1: i32) -> (i32, i32, i32) {
    %c0_i32 = arith.constant 0 : i32
    %c0_i32_0 = arith.constant 0 : i32
    %c0_i32_1 = arith.constant 0 : i32
    return %arg1, %c0_i32, %c0_i32_0 : i32, i32, i32
  }
  func.func @transform_32(%arg0: i32, %arg1: i32) -> (i32, i32, i32) {
    %c0_i32 = arith.constant 0 : i32
    %c0_i32_0 = arith.constant 0 : i32
    %c0_i32_1 = arith.constant 0 : i32
    return %arg1, %c0_i32, %c0_i32_0 : i32, i32, i32
  }
  func.func @transform_33(%arg0: i32, %arg1: i32) -> (i32, i32, i32) {
    %c0_i32 = arith.constant 0 : i32
    %c0_i32_0 = arith.constant 0 : i32
    %c0_i32_1 = arith.constant 0 : i32
    return %arg0, %c0_i32, %c0_i32_0 : i32, i32, i32
  }
}

</mosaic_0001>

<bundles_post_ra>
// kernel: conformer_forward.1
= control target key start
LH: loop header
LB: loop body
LE: loop exit
PB: predicated region body
PF: predicated region fallthrough
CT: control target
= control target key end

     0   :  { %s6179_s6 = smov 1   ;;  %s6180_s10 = smov 2   ;;  %s7241_s0 = inlined_call_operand.smem [shape: u32[34], index: -1, kind: input, shape index: {}] }
   0x1   :  { %s6229_s5 = sld [smem:[%s7241_s0]]   ;;  %s6181_s14 = smov 3  }
   0x2   :  { %s6234_s9 = sld [smem:[%s7241_s0 + %s6179_s6]]   ;;  %s6182_s18 = smov 4  }
   0x3   :  { %s6239_s13 = sld [smem:[%s7241_s0 + %s6180_s10]]   ;;  %s6183_s22 = smov 5  }
   0x4   :  { %s6244_s17 = sld [smem:[%s7241_s0 + %s6181_s14]]   ;;  %s6184_s26 = smov 6  }
   0x5   :  { %s6249_s21 = sld [smem:[%s7241_s0 + %s6182_s18]]   ;;  %s6185_s30 = smov 7  }
   0x6   :  { %s6254_s25 = sld [smem:[%s7241_s0 + %s6183_s22]]   ;;  %s6186_s4 = smov 8  }
   0x7   :  { %7258 = sst [smem:[#allocation9_spill]] %s6229_s5  ;;  %s6187_s10 = smov 9  }
   0x8   :  { %7259 = sst [smem:[#allocation10_spill]] %s6234_s9  ;;  %s6188_s15 = smov 10  }
   0x9   :  { %7260 = sst [smem:[#allocation11_spill]] %s6239_s13  ;;  %s6189_s20 = smov 11  }
   0xa   :  { %7261 = sst [smem:[#allocation12_spill]] %s6244_s17  ;;  %s6191_s1 = smov 13  }
   0xb   :  { %7262 = sst [smem:[#allocation13_spill]] %s6249_s21  ;;  %s6192_s7 = smov 14  }
   0xc   :  { %7263 = sst [smem:[#allocation14_spill]] %s6254_s25  ;;  %s6194_s22 = smov 16  }
   0xd   :  { %s6259_s29 = sld [smem:[%s7241_s0 + %s6184_s26]]   ;;  %s6190_s26 = smov 12  }
   0xe   :  { %s6264_s3 = sld [smem:[%s7241_s0 + %s6185_s30]]   ;;  %s6195_s28 = smov 17  }
   0xf   :  { %s6269_s8 = sld [smem:[%s7241_s0 + %s6186_s4]]  }
  0x10   :  { %s6274_s14 = sld [smem:[%s7241_s0 + %s6187_s10]]  }
  0x11   :  { %s6279_s19 = sld [smem:[%s7241_s0 + %s6188_s15]]   ;;  %s6193_s15 = smov 15  }
  0x12   :  { %s6284_s24 = sld [smem:[%s7241_s0 + %s6189_s20]]  }
  0x13   :  { %7264 = sst [smem:[#allocation15_spill]] %s6259_s29 }
  0x14   :  { %7265 = sst [smem:[#allocation16_spill]] %s6264_s3 }
  0x15   :  { %7266 = sst [smem:[#allocation17_spill]] %s6269_s8 }
  0x16   :  { %7267 = sst [smem:[#allocation18_spill]] %s6274_s14 }
  0x17   :  { %7268 = sst [smem:[#allocation19_spill]] %s6279_s19 }
  0x18   :  { %7269 = sst [smem:[#allocation20_spill]] %s6284_s24 }
  0x19   :  { %s6289_s30 = sld [smem:[%s7241_s0 + %s6190_s26]]  }
  0x1a   :  { %s6294_s6 = sld [smem:[%s7241_s0 + %s6191_s1]]  }
  0x1b   :  { %s6299_s12 = sld [smem:[%s7241_s0 + %s6192_s7]]   ;;  %s6196_s7 = smov 18  }
  0x1c   :  { %s6304_s20 = sld [smem:[%s7241_s0 + %s6193_s15]]   ;;  %s6197_s15 = smov 19  }
  0x1d   :  { %s6309_s27 = sld [smem:[%s7241_s0 + %s6194_s22]]   ;;  %s6198_s22 = smov 20  }
  0x1e   :  { %s6314_s4 = sld [smem:[%s7241_s0 + %s6195_s28]]   ;;  %s6199_s28 = smov 21  }
  0x1f   :  { %7270 = sst [smem:[#allocation21_spill]] %s6289_s30 }
  0x20   :  { %7271 = sst [smem:[#allocation22_spill]] %s6294_s6 }
  0x21   :  { %7272 = sst [smem:[#allocation23_spill]] %s6299_s12 }
  0x22   :  { %7273 = sst [smem:[#allocation24_spill]] %s6304_s20 }
  0x23   :  { %7274 = sst [smem:[#allocation25_spill]] %s6309_s27 }
  0x24   :  { %7275 = sst [smem:[#allocation26_spill]] %s6314_s4 }
  0x25   :  { %s6319_s12 = sld [smem:[%s7241_s0 + %s6196_s7]]   ;;  %s6200_s7 = smov 22  }
  0x26   :  { %s6324_s20 = sld [smem:[%s7241_s0 + %s6197_s15]]   ;;  %s6201_s15 = smov 23  }
  0x27   :  { %s6329_s27 = sld [smem:[%s7241_s0 + %s6198_s22]]   ;;  %s6202_s22 = smov 24  }
  0x28   :  { %s6334_s4 = sld [smem:[%s7241_s0 + %s6199_s28]]   ;;  %s6203_s28 = smov 25  }
  0x2b   :  { %7276 = sst [smem:[#allocation27_spill]] %s6319_s12 }
  0x2c   :  { %7277 = sst [smem:[#allocation28_spill]] %s6324_s20 }
  0x2d   :  { %7278 = sst [smem:[#allocation29_spill]] %s6329_s27 }
  0x2e   :  { %7279 = sst [smem:[#allocation30_spill]] %s6334_s4 }
  0x2f   :  { %s6339_s12 = sld [smem:[%s7241_s0 + %s6200_s7]]   ;;  %s6204_s7 = smov 26  }
  0x30   :  { %s6344_s20 = sld [smem:[%s7241_s0 + %s6201_s15]]   ;;  %s6205_s15 = smov 27  }
  0x31   :  { %s6349_s27 = sld [smem:[%s7241_s0 + %s6202_s22]]   ;;  %s6206_s22 = smov 28  }
  0x32   :  { %s6354_s4 = sld [smem:[%s7241_s0 + %s6203_s28]]   ;;  %s6207_s28 = smov 29  }
  0x35   :  { %7280 = sst [smem:[#allocation31_spill]] %s6339_s12 }
  0x36   :  { %7281 = sst [smem:[#allocation32_spill]] %s6344_s20 }
  0x37   :  { %7282 = sst [smem:[#allocation33_spill]] %s6349_s27 }
  0x38   :  { %7283 = sst [smem:[#allocation34_spill]] %s6354_s4 }
  0x39   :  { %s6359_s12 = sld [smem:[%s7241_s0 + %s6204_s7]]   ;;  %s6208_s7 = smov 30  }
  0x3a   :  { %s6364_s20 = sld [smem:[%s7241_s0 + %s6205_s15]]   ;;  %s6209_s15 = smov 31  }
  0x3b   :  { %s6369_s27 = sld [smem:[%s7241_s0 + %s6206_s22]]   ;;  %s6210_s22 = smov 32  }
  0x3c   :  { %s6374_s4 = sld [smem:[%s7241_s0 + %s6207_s28]]   ;;  %s6211_s28 = smov 33  }
  0x3f   :  { %7284 = sst [smem:[#allocation35_spill]] %s6359_s12 }
  0x40   :  { %7285 = sst [smem:[#allocation36_spill]] %s6364_s20 }
  0x41   :  { %7286 = sst [smem:[#allocation37_spill]] %s6369_s27 }
  0x42   :  { %7287 = sst [smem:[#allocation38_spill]] %s6374_s4 }
  0x43   :  { %s6379_s12 = sld [smem:[%s7241_s0 + %s6208_s7]]  }
  0x44   :  { %s6384_s20 = sld [smem:[%s7241_s0 + %s6209_s15]]  }
  0x45   :  { %s6389_s27 = sld [smem:[%s7241_s0 + %s6210_s22]]  }
  0x46   :  { %s6394_s4 = sld [smem:[%s7241_s0 + %s6211_s28]]  }
  0x4a   :  { %7288 = sst [smem:[#allocation39_spill]] %s6384_s20 }
  0x4b   :  { %7289 = sst [smem:[#allocation40_spill]] %s6389_s27 }
  0x4c   :  { %7290 = sst [smem:[#allocation41_spill]] %s6394_s4 }
  0x4d   :  { %72 = vsyncpa [#allocation4], 0 }
  0x4e   :  { %73 = vsyncpa [#allocation5], 0  ;;  %s6396_s7 = smov 0   ;;  %s6398_s10 = smov 0  }
  0x4f   :  { %s6400_s11 = smov 0  }
  0x50 LB: > { %s7291_s5 = sld [smem:[#allocation9_spill]]  ;;  %7292 = sst [smem:[#allocation42_spill]] %s6169_s7  ;;  %s6169_s7 = sphi %s6396_s7, %s7385_s7   ;;  %s6177_s11 = sphi %s6400_s11, %s79_s11   ;;  %s6173_s10 = sphi %s6398_s10, %s7386_s10  }
  0x51   : > { %7293 = sst [smem:[#allocation43_spill]] %s6173_s10  ;;  %s7245_s0 = sadd.s32 4294967295, %s6177_s11  }
  0x52   : > { %7294 = sst [smem:[#allocation44_spill]] %s6177_s11  ;;  %s88_s15 = sadd.s32 1, %s6173_s10 }
  0x53   : > { %p89_p0 = scmp.ge.s32.totalorder %s88_s15, 2  ;;  %p5070_p1 = scmp.ge.s32.totalorder %s6177_s11, 1 }
  0x54   : > { %p980_p2 = scmp.lt.s32.totalorder %s6177_s11, 3  ;;  %p6423_p4 = scmp.eq.s32.totalorder %s7245_s0, 0 }
  0x55   : > { %s7388_s15 = smov (%p89_p0, %s88_s15), 0  ;;  %s6212_s22 = smov [#allocation3]  }
  0x56   : > { %7295 = sst [smem:[#allocation45_spill]] %s7388_s15  ;;  %p6417_p3 = pnand %p5070_p1, %p980_p2 }
  0x57   : > { %s7297_s18 = scalar_select %p6423_p4, 1, 0 }
  0x58   : > { %s7296_s16 = scalar_select %p6417_p3, 1, 0 }
  0x59   : > { %p5727_p5 = pneg %p6417_p3  ;;  %s995_s23 = sshll.u32 %s6212_s22, 4  ;;  %s996_s23 = int_to_ptr.vmem [resolvable:$true] %s995_s23 }
  0x5a   : > { %s6093_s28 = scalar_lea.hbm %s7291_s5, 256 }
  0x5b   : > { %p6431_p6 = pnand %p6423_p4, %p5727_p5  ;;  %p6094_p7 = scmp.ne.s32.totalorder %s7291_s5, %s6093_s28 }
  0x5c   : > { %p6100_p11 = scmp.lt.u32.totalorder %s6093_s28, %s7291_s5 }
  0x5d   : > { %p6095_p8 = pneg %p6431_p6 }
  0x5f   : > { %p6096_p9 = pnand %p6095_p8, %p6094_p7 }
  0x61   : > { %p6097_p10 = pneg %p6096_p9 }
  0x63   : > { %p6102_p12 = pnand %p6100_p11, %p6097_p10 }
  0x65   : > { %6105 = shalt.err (!%p6102_p12)
}
  0x66   : > { %s6106_s1 = scalar_lea.vmem %s996_s23, 256  ;;  %p6114_p2 = scmp.lt.s32.totalorder %s996_s23, %s996_s23 }
  0x67   : > { %p6107_p13 = scmp.ne.s32.totalorder %s996_s23, %s6106_s1  ;;  %p6115_p3 = scmp.lt.s32.totalorder %s6106_s1, %s6106_s1 }
  0x69   : > { %p6109_p0 = pnand %p6107_p13, %p6095_p8  ;;  %p6116_p5 = por %p6115_p3, %p6114_p2 }
  0x6b   : > { %p6110_p1 = pneg %p6109_p0 }
  0x6d   : > { %p6117_p4 = pnand %p6116_p5, %p6110_p1 }
  0x6f   : > { %6120 = shalt.err (!%p6117_p4)
}
  0x70   : > { %s6213_s2 = smov 128   ;;  %s6214_s22 = smov 8  }
  0x71   : > { %5730 = dma.hbm_to_vmem [thread:$0]  (!%p6431_p6), %s7291_s5, 256, %s996_s23, [#allocation4], %s6213_s2, %s6213_s2, %s6214_s22  }
  0x72   : > { %p7299_p7 = scmp.ne.s32.totalorder %s7296_s16, 0 }
  0x74   : > { %1229 = sbr.rel (%p7299_p7) target bundleno = 5854 (0x16de), region = 152 }
  0x7b   : > { %p7300_p9 = scmp.ne.s32.totalorder %s7297_s18, 0 }
  0x7d   : > { %6160 = dma.done.wait (%p7300_p9), [#allocation4], 256  }
  0x7e   : > { %6162 = vsyncadd (%p7300_p9), [#allocation4], 4294967040  ;;  %s7303_s17 = sld [smem:[#allocation12_spill]]  ;;  %s7305_s25 = sld [smem:[#allocation14_spill]] }
  0x7f   : > { %s7311_s24 = sld [smem:[#allocation20_spill]]  ;;  %s7312_s30 = sld [smem:[#allocation21_spill]] }
  0x80   : > { %p1426_p3 = scmp.lt.s32.totalorder %s6169_s7, 1  ;;  %s7313_s6 = sld [smem:[#allocation22_spill]] }
  0x81   : > { %s7314_s23 = sld [smem:[#allocation23_spill]]  ;;  %s7321_s10 = sld [smem:[#allocation28_spill]] }
  0x82   : > { %s6451_s16 = scalar_select %p1426_p3, %s6169_s7, 1 }
  0x83   : > { %s7322_s13 = sld [smem:[#allocation29_spill]]  ;;  %s7323_s27 = sld [smem:[#allocation30_spill]] }
  0x84   : > { %s6458_s1 = sshll.u32 %s6451_s16, 7  ;;  %s6461_s22 = sshll.u32 %s6451_s16, 1 }
  0x85   : > { %s6465_s0 = scalar_lea.vmem %s7303_s17, %s6458_s1  ;;  %s6471_s15 = scalar_lea.vmem %s7305_s25, %s6458_s1 }
  0x86   : > { %7317 = sst [smem:[#allocation46_spill]] %s6465_s0  ;;  %s7324_s17 = sld [smem:[#allocation31_spill]] }
  0x87   : > { %7320 = sst [smem:[#allocation47_spill]] %s6471_s15  ;;  %s6485_s0 = scalar_lea.vmem %s7311_s24, %s6458_s1 }
  0x88   : > { %7325 = sst [smem:[#allocation48_spill]] %s6485_s0  ;;  %s6489_s21 = scalar_lea.vmem %s7312_s30, %s6458_s1 }
  0x89   : > { %s7326_s5 = sld [smem:[#allocation32_spill]]  ;;  %7327 = sst [smem:[#allocation49_spill]] %s6489_s21 }
  0x8a   : > { %s7328_s25 = sld [smem:[#allocation33_spill]]  ;;  %s6493_s15 = scalar_lea.vmem %s7313_s6, %s6458_s1 }
  0x8b   : > { %7329 = sst [smem:[#allocation50_spill]] %s6493_s15  ;;  %s5371_s4 = sshll.u32 %s6451_s16, 6 }
  0x8c   : > { %s7330_s11 = sld [smem:[#allocation34_spill]]  ;;  %s7331_s9 = sld [smem:[#allocation35_spill]] }
  0x8d   : > { %s6497_s7 = scalar_lea.vmem %s7314_s23, %s5371_s4  ;;  %s7333_s20 = sld [smem:[#allocation36_spill]] }
  0x8e   : > { %7332 = sst [smem:[#allocation51_spill]] %s6497_s7  ;;  %s7334_s24 = sld [smem:[#allocation37_spill]] }
  0x8f   : > { %s7335_s30 = sld [smem:[#allocation38_spill]]  ;;  %s7336_s15 = sld [smem:[#allocation39_spill]] }
  0x90   : > { %s5372_s0 = sshll.u32 %s6451_s16, 8  ;;  %s7337_s8 = sld [smem:[#allocation40_spill]] }
  0x91   : > { %s6509_s3 = scalar_lea.vmem %s7321_s10, %s5372_s0  ;;  %s5090_s4 = sshll.u32 %s6451_s16, 2 }
  0x92   : > { %7338 = sst [smem:[#allocation52_spill]] %s6509_s3  ;;  %s6513_s23 = scalar_lea.vmem %s7322_s13, %s5090_s4 }
  0x93   : > { %s5373_s28 = sshll.u32 %s6451_s16, 4  ;;  %s1510_s2 = scalar_lea.vmem %s7324_s17, %s6461_s22 }
  0x94   : > { %s6517_s19 = scalar_lea.vmem %s7323_s27, %s5373_s28  ;;  %s6523_s14 = scalar_lea.vmem %s7326_s5, %s6458_s1 }
  0x95   : > { %s1518_s18 = scalar_lea.vmem %s7328_s25, %s6451_s16  ;;  %s1521_s21 = scalar_lea.vmem %s7330_s11, %s6451_s16 }
  0x96   : > { %s1524_s7 = scalar_lea.vmem %s7331_s9, %s6451_s16  ;;  %s6533_s26 = scalar_lea.vmem %s7333_s20, %s6458_s1 }
  0x97   : > { %s1533_s6 = scalar_lea.vmem %s7334_s24, %s6461_s22  ;;  %s6539_s29 = scalar_lea.vmem %s7335_s30, %s6458_s1 }
  0x98   : > { %s1541_s0 = scalar_lea.vmem %s6379_s12, %s6451_s16  ;;  %s1544_s10 = scalar_lea.vmem %s7336_s15, %s6451_s16 }
  0x99   : > { %s1547_s3 = scalar_lea.vmem %s7337_s8, %s6451_s16  ;;  %s7339_s4 = sld [smem:[#allocation42_spill]] }
  0x9f   : > { %p5101_p4 = scmp.ne.s32.totalorder %s7339_s4, 0 }
  0xa0   : > { %v1554_v0 = vld [vmem:[#allocation3] sm:$0xff] (!%p5101_p4)  ;;  %v1555_v1 = vld [vmem:[#allocation3 + $0x8] sm:$0xff] (!%p5101_p4) }
  0xa1   : > { %1553 = sbr.rel (%p5101_p4) target bundleno = 168 (0xa8), region = 160  ;;  %1556 = vst [vmem:[#allocation2] sm:$0xff] (!%p5101_p4), %v1554_v0  ;;  %1557 = vst [vmem:[#allocation2 + $0x8] sm:$0xff] (!%p5101_p4), %v1555_v1 }
  0xa8 PF: > { %v6548_v2 = vld [vmem:[#allocation2] sm:$0xff]  ;;  %s7340_s5 = sld [smem:[#allocation46_spill]]  ;;  %v6550_v3 = vld [vmem:[#allocation2 + $0x8] sm:$0xff]  ;;  %v6215_v23 = vmov 0   ;;  %s7341_s9 = sld [smem:[#allocation10_spill]]  ;;  %v1620_v62 = vlaneseq  ;;  %vm6217_vm0 = vmmov 0  }
  0xa9   : > { %1562 = vadd.xlane.f32.xlu0 %v6548_v2  ;;  %1742 = vmatprep.mubr.bf16.mxu0 %v6215_v23  ;;  %s7342_s13 = sld [smem:[#allocation11_spill]]  ;;  %s7343_s17 = sld [smem:[#allocation47_spill]]  ;;  %vm2371_vm1 = vcmask 523264   ;;  %vm2492_vm2 = vcmask 1043456   ;;  %vm2464_vm3 = vcmask 64512   ;;  %vm3692_vm4 = vcmask 1042432  }
  0xaa   : > { %s7346_s24 = sld [smem:[#allocation13_spill]]  ;;  %v6595_v63 = vshrl.u32 %v1620_v62, 7  ;;  %s7348_s20 = sld [smem:[#allocation15_spill]]  ;;  %vm3733_vm5 = vcmask 1041408   ;;  %vm3774_vm8 = vcmask 1040384   ;;  %vm3836_vm9 = vcmask 1046528  }
  0xab   : > { %s7350_s11 = sld [smem:[#allocation16_spill]]  ;;  %s7351_s15 = sld [smem:[#allocation17_spill]]  ;;  %vm3877_vm12 = vcmask 1045504   ;;  %vm3918_vm14 = vcmask 1044480  }
  0xac   : > { %v6598_v0 = vsub.s32 0, %v6595_v63  ;;  %s7352_s1 = sld [smem:[#allocation48_spill]]  ;;  %s7353_s28 = sld [smem:[#allocation49_spill]] }
  0xad   : > { %1564 = vadd.xlane.f32.xlu0 %v6550_v3 }
  0xae   : > { %v5801_v4 = vld [vmem:[%s7340_s5 + $0x4] ss:$8 sps:$4 sm:$0xff]   ;;  %v5803_v5 = vld [vmem:[%s7340_s5] ss:$8 sps:$4 sm:$0xff]   ;;  %v5804_v6 = vld [vmem:[%s7340_s5 + $0x14] ss:$8 sps:$4 sm:$0xff]   ;;  %s7344_s25 = scalar_lea.vmem %s7341_s9, %s6451_s16 }
  0xaf   : > { %1710 = vmatprep.subr.bf16.mxu0 %v5801_v4  ;;  %v5806_v15 = vld [vmem:[%s7340_s5 + $0x10] ss:$8 sps:$4 sm:$0xff]   ;;  %v5807_v16 = vld [vmem:[%s7340_s5 + $0x24] ss:$8 sps:$4 sm:$0xff]   ;;  %v5809_v17 = vld [vmem:[%s7340_s5 + $0x20] ss:$8 sps:$4 sm:$0xff]   ;;  %s7345_s8 = scalar_lea.vmem %s7342_s13, %s6451_s16 }
  0xb0   : > { %1711 = vmatpush1.bf16.msra.mxu0 %v5803_v5  ;;  %v5810_v18 = vld [vmem:[%s7340_s5 + $0x34] ss:$8 sps:$4 sm:$0xff]   ;;  %v5812_v19 = vld [vmem:[%s7340_s5 + $0x30] ss:$8 sps:$4 sm:$0xff]   ;;  %v5813_v20 = vld [vmem:[%s7340_s5 + $0x44] ss:$8 sps:$4 sm:$0xff]   ;;  %s7347_s30 = scalar_lea.vmem %s7346_s24, %s6461_s22  ;;  %s7349_s27 = scalar_lea.vmem %s7348_s20, %s6451_s16 }
  0xb1   : > { %1712 = vmatprep.subr.bf16.mxu0 %v5804_v6  ;;  %v5815_v21 = vld [vmem:[%s7340_s5 + $0x40] ss:$8 sps:$4 sm:$0xff]   ;;  %v5816_v22 = vld [vmem:[%s7340_s5 + $0x54] ss:$8 sps:$4 sm:$0xff]   ;;  %v5818_v24 = vld [vmem:[%s7340_s5 + $0x50] ss:$8 sps:$4 sm:$0xff]   ;;  %s7354_s4 = scalar_lea.vmem %s7350_s11, %s6451_s16 }
  0xb2   : > { %v5819_v25 = vld [vmem:[%s7340_s5 + $0x64] ss:$8 sps:$4 sm:$0xff]   ;;  %v5821_v26 = vld [vmem:[%s7340_s5 + $0x60] ss:$8 sps:$4 sm:$0xff]   ;;  %v5822_v27 = vld [vmem:[%s7340_s5 + $0x74] ss:$8 sps:$4 sm:$0xff]  }
  0xb3   : > { %v5824_v28 = vld [vmem:[%s7340_s5 + $0x70] ss:$8 sps:$4 sm:$0xff]   ;;  %v5102_v37 = vld [vmem:[%s7344_s25] ss:$0 sm:$0xff]  ;;  %v5827_v48 = vld [vmem:[%s7343_s17 + $0x48] sm:$0xff]   ;;  %v6604_v4 = vsub.s32 1, %v6595_v63  ;;  %s7355_s5 = scalar_lea.vmem %s7351_s15, %s6451_s16 }
  0xb4   : > { %1713 = vmatpush1.bf16.msra.mxu0 %v5806_v15  ;;  %v5103_v41 = vld [vmem:[%s7345_s8] ss:$0 sm:$0xff]  ;;  %v5828_v49 = vld [vmem:[%s7343_s17 + $0x8] sm:$0xff]   ;;  %v5829_v50 = vld [vmem:[%s7343_s17 + $0x50] sm:$0xff]   ;;  %s7356_s9 = sld [smem:[#allocation18_spill]]  ;;  %s7357_s13 = sld [smem:[#allocation19_spill]] }
  0xb5   : > { %1714 = vmatprep.subr.bf16.mxu0 %v5807_v16  ;;  %v5825_v46 = vld [vmem:[%s7343_s17 + $0x40] sm:$0xff]   ;;  %v5830_v51 = vld [vmem:[%s7343_s17 + $0x10] sm:$0xff]   ;;  %v5831_v52 = vld [vmem:[%s7343_s17 + $0x58] sm:$0xff]   ;;  %s7361_s24 = sld [smem:[#allocation51_spill]]  ;;  %s7363_s20 = sld [smem:[#allocation25_spill]] }
  0xb6   : > { %v5826_v47 = vld [vmem:[%s7343_s17] sm:$0xff]   ;;  %5377 = vmatprep.subr.bf16.mxu1 %v5825_v46  ;;  %v5832_v53 = vld [vmem:[%s7343_s17 + $0x18] sm:$0xff]   ;;  %v5835_v56 = vld [vmem:[%s7343_s17 + $0x68] sm:$0xff]  }
  0xb7   : > { %5378 = vmatpush3.bf16.msra.mxu1 %v5826_v47  ;;  %v5833_v54 = vld [vmem:[%s7343_s17 + $0x60] sm:$0xff]   ;;  %v5836_v57 = vld [vmem:[%s7343_s17 + $0x28] sm:$0xff]   ;;  %v5837_v58 = vld [vmem:[%s7343_s17 + $0x70] sm:$0xff]  }
  0xb8   : > { %1715 = vmatpush1.bf16.msra.mxu0 %v5809_v17  ;;  %5379 = vmatprep.subr.bf16.mxu1 %v5827_v48  ;;  %v5834_v55 = vld [vmem:[%s7343_s17 + $0x20] sm:$0xff]   ;;  %v5838_v59 = vld [vmem:[%s7343_s17 + $0x30] sm:$0xff]   ;;  %v5839_v60 = vld [vmem:[%s7343_s17 + $0x78] sm:$0xff]  }
  0xb9   : > { %1716 = vmatprep.subr.bf16.mxu0 %v5810_v18  ;;  %v5840_v61 = vld [vmem:[%s7343_s17 + $0x38] sm:$0xff]   ;;  %v1618_v1 = vld [vmem:[%s7347_s30] sm:$0x3]  ;;  %s7358_s17 = sld [smem:[#allocation50_spill]]  ;;  %s7362_s30 = sld [smem:[#allocation24_spill]] }
  0xba   : > { %v1623_v5 = vrot.slane %v1618_v1, %v6598_v0  ;;  %v1627_v6 = vrot.slane %v1618_v1, %v6604_v4  ;;  %s7359_s25 = scalar_lea.vmem %s7356_s9, %s6451_s16  ;;  %s7360_s8 = scalar_lea.vmem %s7357_s13, %s6451_s16 }
  0xbb   : > { %5380 = vmatpush3.bf16.msra.mxu1 %v5828_v49  ;;  %s7366_s15 = scalar_lea.vmem %s7363_s20, %s6451_s16 }
  0xbc   : > { %1717 = vmatpush1.bf16.msra.mxu0 %v5812_v19  ;;  %5381 = vmatprep.subr.bf16.mxu1 %v5829_v50 }
  0xbd   : > { %1718 = vmatprep.subr.bf16.mxu0 %v5813_v20 }
  0xbf   : > { %5382 = vmatpush3.bf16.msra.mxu1 %v5830_v51  ;;  %s7365_s11 = scalar_lea.vmem %s7362_s30, %s6451_s16 }
  0xc0   : > { %1719 = vmatpush1.bf16.msra.mxu0 %v5815_v21  ;;  %5383 = vmatprep.subr.bf16.mxu1 %v5831_v52 }
  0xc1   : > { %1720 = vmatprep.subr.bf16.mxu0 %v5816_v22 }
  0xc3   : > { %5384 = vmatpush3.bf16.msra.mxu1 %v5832_v53 }
  0xc4   : > { %1721 = vmatpush1.bf16.msra.mxu0 %v5818_v24  ;;  %5385 = vmatprep.subr.bf16.mxu1 %v5833_v54 }
  0xc5   : > { %1722 = vmatprep.subr.bf16.mxu0 %v5819_v25 }
  0xc7   : > { %5386 = vmatpush3.bf16.msra.mxu1 %v5834_v55 }
  0xc8   : > { %1723 = vmatpush1.bf16.msra.mxu0 %v5821_v26  ;;  %5387 = vmatprep.subr.bf16.mxu1 %v5835_v56  ;;  %v5120_v56 = vld [vmem:[%s7349_s27] ss:$0 sm:$0xff]  ;;  %s7364_s27 = sld [smem:[#allocation52_spill]] }
  0xc9   : > { %1724 = vmatprep.subr.bf16.mxu0 %v5822_v27 }
  0xcb   : > { %5388 = vmatpush3.bf16.msra.mxu1 %v5836_v57 }
  0xcc   : > { %1725 = vmatpush1.bf16.msra.mxu0 %v5824_v28  ;;  %5389 = vmatprep.subr.bf16.mxu1 %v5837_v58 }
  0xcf   : > { %5390 = vmatpush3.bf16.msra.mxu1 %v5838_v59 }
  0xd0   : > { %5391 = vmatprep.subr.bf16.mxu1 %v5839_v60 }
  0xd3   : > { %5392 = vmatpush3.bf16.msra.mxu1 %v5840_v61 }
 0x136   : > { %v1563_v7 = vpop.xlane.xlu0 %1562 }
 0x137   : > { %v1567_v8 = vmul.f32 0.0078125, %v1563_v7 }
 0x139   : > { %v1569_v9 = vsub.f32 %v6548_v2, %v1567_v8 }
 0x13a   : > { %v1565_v10 = vpop.xlane.xlu0 %1564 }
 0x13b   : > { %v1568_v11 = vmul.f32 0.0078125, %v1565_v10  ;;  %v1571_v12 = vmul.f32 %v1569_v9, %v1569_v9 }
 0x13d   : > { %v1570_v13 = vsub.f32 %v6550_v3, %v1568_v11  ;;  %1573 = vadd.xlane.f32.xlu1 %v1571_v12 }
 0x13f   : > { %v1572_v14 = vmul.f32 %v1570_v13, %v1570_v13 }
 0x141   : > { %1575 = vadd.xlane.f32.xlu1 %v1572_v14 }
 0x1ca   : > { %v1574_v29 = vpop.xlane.xlu1 %1573 }
 0x1cb   : > { %v1577_v30 = vmul.f32 0.0078125, %v1574_v29 }
 0x1cd   : > { %v1579_v31 = vadd.f32 1e-05, %v1577_v30 }
 0x1ce   : > { %v1576_v32 = vpop.xlane.xlu1 %1575 }
 0x1cf   : > { %6001 = vrsqrt.f32 %v1579_v31  ;;  %v1578_v33 = vmul.f32 0.0078125, %v1576_v32 }
 0x1d1   : > { %v1580_v34 = vadd.f32 1e-05, %v1578_v33 }
 0x1d3   : > { %6003 = vrsqrt.f32 %v1580_v34 }
 0x1d9   : > { %v6002_v35 = vpop.eup %6001 }
 0x1da   : > { %v1583_v36 = vmul.f32 %v6002_v35, %v1569_v9 }
 0x1dc   : > { %v1591_v40 = vmul.f32 %v5102_v37, %v1583_v36 }
 0x1dd   : > { %v6004_v38 = vpop.eup %6003 }
 0x1de   : > { %v1584_v39 = vmul.f32 %v6004_v38, %v1570_v13  ;;  %v1599_v43 = vadd.f32 %v5103_v41, %v1591_v40 }
 0x1e0   : > { %v1592_v42 = vmul.f32 %v5102_v37, %v1584_v39 }
 0x1e2   : > { %v1600_v44 = vadd.f32 %v5103_v41, %v1592_v42 }
 0x1e4   : > { %v1617_v45 = vpack.c.bf16 %v1600_v44, %v1599_v43 }
 0x1e6   : > { %1743 = vmatmul.mubr.bf16.vlgmr.msra.gmra.mrb[0].mxu0 %v1617_v45 }
 0x2b9   : > { %v1744_v7 = vpop.f32.mrb[0].mxu0 }
 0x2ba   : > { %v1745_v8 = vadd.f32 %v1744_v7, %v1623_v5  ;;  %v1746_v9 = vpop.f32.mrb[1].mxu0 }
 0x2bb   : > { %v1747_v10 = vadd.f32 %v1746_v9, %v1627_v6  ;;  %v1748_v11 = vpop.f32.mrb[2].mxu0 }
 0x2bc   : > { %v1757_v12 = vmul.f32 0.044715, %v1745_v8  ;;  %v1749_v13 = vadd.f32 %v1748_v11, %v1623_v5  ;;  %v1750_v14 = vpop.f32.mrb[3].mxu0  ;;  %v1753_v42 = vmul.f32 0.5, %v1745_v8 }
 0x2bd   : > { %v1758_v15 = vmul.f32 0.044715, %v1747_v10  ;;  %v1751_v16 = vadd.f32 %v1750_v14, %v1627_v6  ;;  %v1754_v45 = vmul.f32 0.5, %v1747_v10 }
 0x2be   : > { %v1761_v17 = vmul.f32 %v1757_v12, %v1745_v8  ;;  %v1759_v18 = vmul.f32 0.044715, %v1749_v13  ;;  %v1755_v43 = vmul.f32 0.5, %v1749_v13 }
 0x2bf   : > { %v1760_v19 = vmul.f32 0.044715, %v1751_v16  ;;  %v1762_v20 = vmul.f32 %v1758_v15, %v1747_v10  ;;  %v1756_v46 = vmul.f32 0.5, %v1751_v16 }
 0x2c0   : > { %v1765_v21 = vmul.f32 %v1761_v17, %v1745_v8  ;;  %v1763_v22 = vmul.f32 %v1759_v18, %v1749_v13 }
 0x2c1   : > { %v1764_v24 = vmul.f32 %v1760_v19, %v1751_v16  ;;  %v1766_v25 = vmul.f32 %v1762_v20, %v1747_v10  ;;  %v5137_v19 = vld [vmem:[%s7354_s4] ss:$0 sm:$0xff] }
 0x2c2   : > { %v1767_v26 = vmul.f32 %v1763_v22, %v1749_v13  ;;  %v1769_v27 = vadd.f32 %v1765_v21, %v1745_v8  ;;  %v5138_v22 = vld [vmem:[%s7355_s5] ss:$0 sm:$0xff] }
 0x2c3   : > { %v1768_v28 = vmul.f32 %v1764_v24, %v1751_v16  ;;  %v1770_v29 = vadd.f32 %v1766_v25, %v1747_v10 }
 0x2c4   : > { %v1771_v30 = vadd.f32 %v1767_v26, %v1749_v13  ;;  %v1773_v31 = vmul.f32 0.7978846, %v1769_v27 }
 0x2c5   : > { %v1772_v32 = vadd.f32 %v1768_v28, %v1751_v16  ;;  %v1774_v33 = vmul.f32 0.7978846, %v1770_v29 }
 0x2c6   : > { %v1775_v34 = vmul.f32 0.7978846, %v1771_v30  ;;  %6005 = vtanh.f32 %v1773_v31  ;;  %v5841_v31 = vld [vmem:[%s7352_s1] sm:$0xff]  }
 0x2c7   : > { %v1776_v35 = vmul.f32 0.7978846, %v1772_v32  ;;  %6007 = vtanh.f32 %v1774_v33  ;;  %v5842_v32 = vld [vmem:[%s7353_s28] sm:$0xff]   ;;  %v6216_v33 = vmov 0.0  }
 0x2c8   : > { %6009 = vtanh.f32 %v1775_v34  ;;  %5523 = vmatprep.subr.bf16.mxu0 %v6216_v33  ;;  %5543 = vmatprep.subr.bf16.mxu1 %v6216_v33  ;;  %v5843_v34 = vld [vmem:[%s7352_s1 + $0x8] sm:$0xff]  }
 0x2c9   : > { %6011 = vtanh.f32 %v1776_v35  ;;  %5524 = vmatpush3.bf16.msra.mxu0 %v5841_v31  ;;  %5539 = vmatprep.mubr.msk.bf16.mxu0 %vm6217_vm0, %v6216_v33  ;;  %v5873_v31 = vld [vmem:[%s7358_s17 + $0x40] sm:$0xff]  }
 0x2ca   : > { %5525 = vmatprep.subr.bf16.mxu0 %v6216_v33 }
 0x2cd   : > { %5526 = vmatpush3.bf16.msra.mxu0 %v5843_v34  ;;  %v5875_v34 = vld [vmem:[%s7358_s17 + $0x50] sm:$0xff]  }
 0x2ce   : > { %5527 = vmatprep.subr.bf16.mxu0 %v6216_v33 }
 0x2d0   : > { %v6006_v36 = vpop.eup %6005 }
 0x2d1   : > { %v6008_v37 = vpop.eup %6007  ;;  %v1781_v38 = vadd.f32 1.0, %v6006_v36 }
 0x2d2   : > { %v6010_v39 = vpop.eup %6009  ;;  %v1782_v40 = vadd.f32 1.0, %v6008_v37 }
 0x2d3   : > { %v6012_v41 = vpop.eup %6011  ;;  %v1783_v44 = vadd.f32 1.0, %v6010_v39  ;;  %v1785_v48 = vmul.f32 %v1781_v38, %v1753_v42  ;;  %v5845_v42 = vld [vmem:[%s7352_s1 + $0x10] sm:$0xff]  }
 0x2d4   : > { %v1784_v47 = vadd.f32 1.0, %v6012_v41  ;;  %v1786_v50 = vmul.f32 %v1782_v40, %v1754_v45  ;;  %5528 = vmatpush3.bf16.msra.mxu0 %v5845_v42  ;;  %v5848_v45 = vld [vmem:[%s7353_s28 + $0x18] sm:$0xff]  }
 0x2d5   : > { %v1787_v49 = vmul.f32 %v1783_v44, %v1755_v43  ;;  %v5846_v43 = vld [vmem:[%s7353_s28 + $0x10] sm:$0xff]   ;;  %5529 = vmatprep.subr.bf16.mxu0 %v6216_v33  ;;  %v5847_v44 = vld [vmem:[%s7352_s1 + $0x18] sm:$0xff]  }
 0x2d6   : > { %v1788_v51 = vmul.f32 %v1784_v47, %v1756_v46  ;;  %v5849_v46 = vld [vmem:[%s7352_s1 + $0x20] sm:$0xff]  }
 0x2d7   : > { %v1821_v52 = vpack.c.bf16 %v1787_v49, %v1785_v48  ;;  %v5850_v47 = vld [vmem:[%s7353_s28 + $0x20] sm:$0xff]   ;;  %v5851_v48 = vld [vmem:[%s7352_s1 + $0x28] sm:$0xff]  }
 0x2d8   : > { %v1822_v53 = vpack.c.bf16 %v1788_v51, %v1786_v50  ;;  %5530 = vmatpush3.bf16.msra.mxu0 %v5847_v44  ;;  %v5852_v49 = vld [vmem:[%s7353_s28 + $0x28] sm:$0xff]   ;;  %v5853_v50 = vld [vmem:[%s7352_s1 + $0x30] sm:$0xff]  }
 0x2d9   : > { %5531 = vmatprep.subr.bf16.mxu0 %v6216_v33  ;;  %v5854_v51 = vld [vmem:[%s7353_s28 + $0x30] sm:$0xff]  }
 0x2da   : > { %1958 = vmatprep.mubr.bf16.mxu1 %v1822_v53  ;;  %v5856_v53 = vld [vmem:[%s7353_s28 + $0x38] sm:$0xff]  }
 0x2db   : > { %1959 = vmatmul.mubr.bf16.vlgmr.msra.gmra.mrb[0].mxu1 %v1821_v52  ;;  %v5855_v52 = vld [vmem:[%s7352_s1 + $0x38] sm:$0xff]  }
 0x2dc   : > { %5544 = vmatpush3.bf16.msra.mxu1 %v5842_v32  ;;  %5532 = vmatpush3.bf16.msra.mxu0 %v5849_v46  ;;  %v5874_v32 = vld [vmem:[%s7358_s17 + $0x48] sm:$0xff]  }
 0x2dd   : > { %5545 = vmatprep.subr.bf16.mxu1 %v6216_v33  ;;  %5533 = vmatprep.subr.bf16.mxu0 %v6216_v33 }
 0x2de   : > { %5559 = vmatprep.mubr.msk.bf16.mxu1 %vm6217_vm0, %v6216_v33 }
 0x2e0   : > { %5534 = vmatpush3.bf16.msra.mxu0 %v5851_v48 }
 0x2e1   : > { %5535 = vmatprep.subr.bf16.mxu0 %v6216_v33 }
 0x2e4   : > { %5536 = vmatpush3.bf16.msra.mxu0 %v5853_v50 }
 0x2e5   : > { %5537 = vmatprep.subr.bf16.mxu0 %v6216_v33 }
 0x2e8   : > { %5538 = vmatpush3.bf16.msra.mxu0 %v5855_v52 }
 0x2e9   : > { %5563 = vmatprep.subr.bf16.mxu0 %v6216_v33 }
 0x3ae   : > { %v5393_v54 = vpop.f32.mrb[0].mxu1 }
 0x3af   : > { %v5394_v55 = vpop.f32.mrb[1].mxu1 }
 0x3b0   : > { %v5395_v57 = vadd.f32 %v5394_v55, %v5393_v54  ;;  %v5396_v58 = vpop.f32.mrb[2].mxu1 }
 0x3b1   : > { %v5397_v59 = vpop.f32.mrb[3].mxu1 }
 0x3b2   : > { %v5398_v60 = vadd.f32 %v5397_v59, %v5396_v58  ;;  %v1961_v61 = vadd.f32 %v5395_v57, %v5120_v56 }
 0x3b4   : > { %1969 = vadd.xlane.f32.xlu0 %v1961_v61  ;;  %v1964_v62 = vadd.f32 %v5398_v60, %v5120_v56 }
 0x3b6   : > { %1971 = vadd.xlane.f32.xlu1 %v1964_v62 }
 0x441   : > { %v1970_v1 = vpop.xlane.xlu0 %1969 }
 0x442   : > { %v1973_v5 = vmul.f32 0.0078125, %v1970_v1 }
 0x443   : > { %v1972_v6 = vpop.xlane.xlu1 %1971 }
 0x444   : > { %v1975_v7 = vsub.f32 %v1961_v61, %v1973_v5  ;;  %v1974_v8 = vmul.f32 0.0078125, %v1972_v6  ;;  %v5139_v61 = vld [vmem:[%s7359_s25] ss:$0 sm:$0xff] }
 0x446   : > { %v1976_v9 = vsub.f32 %v1964_v62, %v1974_v8  ;;  %v1977_v10 = vmul.f32 %v1975_v7, %v1975_v7 }
 0x448   : > { %1979 = vadd.xlane.f32.xlu0 %v1977_v10  ;;  %v1978_v11 = vmul.f32 %v1976_v9, %v1976_v9 }
 0x44a   : > { %1981 = vadd.xlane.f32.xlu1 %v1978_v11  ;;  %v5857_v11 = vld [vmem:[%s7358_s17] sm:$0xff]  }
 0x4d5   : > { %v1980_v12 = vpop.xlane.xlu0 %1979 }
 0x4d6   : > { %v1983_v13 = vmul.f32 0.0078125, %v1980_v12 }
 0x4d7   : > { %v1982_v14 = vpop.xlane.xlu1 %1981 }
 0x4d8   : > { %v1985_v15 = vadd.f32 1e-05, %v1983_v13  ;;  %v1984_v16 = vmul.f32 0.0078125, %v1982_v14  ;;  %v5858_v13 = vld [vmem:[%s7358_s17 + $0x8] sm:$0xff]   ;;  %v5859_v14 = vld [vmem:[%s7358_s17 + $0x10] sm:$0xff]  }
 0x4da   : > { %6013 = vrsqrt.f32 %v1985_v15  ;;  %v1986_v17 = vadd.f32 1e-05, %v1984_v16  ;;  %v5860_v15 = vld [vmem:[%s7358_s17 + $0x18] sm:$0xff]   ;;  %v5861_v16 = vld [vmem:[%s7358_s17 + $0x20] sm:$0xff]  }
 0x4dc   : > { %6015 = vrsqrt.f32 %v1986_v17  ;;  %v5862_v17 = vld [vmem:[%s7358_s17 + $0x28] sm:$0xff]  }
 0x4e4   : > { %v6014_v18 = vpop.eup %6013 }
 0x4e5   : > { %v1989_v20 = vmul.f32 %v6014_v18, %v1975_v7  ;;  %v5140_v7 = vld [vmem:[%s7360_s8] ss:$0 sm:$0xff]  ;;  %v5863_v18 = vld [vmem:[%s7358_s17 + $0x30] sm:$0xff]  }
 0x4e6   : > { %v6016_v21 = vpop.eup %6015 }
 0x4e7   : > { %v1997_v24 = vmul.f32 %v5137_v19, %v1989_v20  ;;  %v1990_v25 = vmul.f32 %v6016_v21, %v1976_v9  ;;  %v5865_v20 = vld [vmem:[%s7352_s1 + $0x40] sm:$0xff]   ;;  %v5866_v21 = vld [vmem:[%s7352_s1 + $0x48] sm:$0xff]  }
 0x4e9   : > { %v2005_v26 = vadd.f32 %v5138_v22, %v1997_v24  ;;  %v1998_v27 = vmul.f32 %v5137_v19, %v1990_v25  ;;  %v5864_v19 = vld [vmem:[%s7358_s17 + $0x38] sm:$0xff]   ;;  %v5869_v25 = vld [vmem:[%s7352_s1 + $0x60] sm:$0xff]  }
 0x4ea   : > { %v5868_v24 = vld [vmem:[%s7352_s1 + $0x58] sm:$0xff]  }
 0x4eb   : > { %v6618_v28 = vadd.f32 %v2005_v26, %v6548_v2  ;;  %v2006_v29 = vadd.f32 %v5138_v22, %v1998_v27  ;;  %v5844_v2 = vld [vmem:[%s7353_s28 + $0x8] sm:$0xff]   ;;  %v5867_v22 = vld [vmem:[%s7352_s1 + $0x50] sm:$0xff]  }
 0x4ec   : > { %5546 = vmatpush3.bf16.msra.mxu1 %v5844_v2  ;;  %v5870_v26 = vld [vmem:[%s7352_s1 + $0x68] sm:$0xff]   ;;  %v5871_v27 = vld [vmem:[%s7352_s1 + $0x70] sm:$0xff]   ;;  %v5876_v2 = vld [vmem:[%s7358_s17 + $0x58] sm:$0xff]  }
 0x4ed   : > { %2011 = vadd.xlane.f32.xlu0 %v6618_v28  ;;  %v6622_v30 = vadd.f32 %v2006_v29, %v6550_v3  ;;  %5547 = vmatprep.subr.bf16.mxu1 %v6216_v33  ;;  %v5872_v29 = vld [vmem:[%s7352_s1 + $0x78] sm:$0xff]   ;;  %s7367_s1 = sld [smem:[#allocation26_spill]] }
 0x4ef   : > { %2013 = vadd.xlane.f32.xlu1 %v6622_v30 }
 0x4f0   : > { %5548 = vmatpush3.bf16.msra.mxu1 %v5846_v43 }
 0x4f1   : > { %5549 = vmatprep.subr.bf16.mxu1 %v6216_v33 }
 0x4f3   : > { %s7369_s4 = scalar_lea.vmem %s7367_s1, %s6451_s16 }
 0x4f4   : > { %5550 = vmatpush3.bf16.msra.mxu1 %v5848_v45 }
 0x4f5   : > { %5551 = vmatprep.subr.bf16.mxu1 %v6216_v33 }
 0x4f8   : > { %5552 = vmatpush3.bf16.msra.mxu1 %v5850_v47 }
 0x4f9   : > { %5553 = vmatprep.subr.bf16.mxu1 %v6216_v33 }
 0x4fc   : > { %5554 = vmatpush3.bf16.msra.mxu1 %v5852_v49 }
 0x4fd   : > { %5555 = vmatprep.subr.bf16.mxu1 %v6216_v33 }
 0x500   : > { %5556 = vmatpush3.bf16.msra.mxu1 %v5854_v51 }
 0x501   : > { %5557 = vmatprep.subr.bf16.mxu1 %v6216_v33 }
 0x504   : > { %5558 = vmatpush3.bf16.msra.mxu1 %v5856_v53 }
 0x505   : > { %5583 = vmatprep.subr.bf16.mxu1 %v6216_v33 }
 0x57a   : > { %v2012_v3 = vpop.xlane.xlu0 %2011 }
 0x57b   : > { %v2015_v35 = vmul.f32 0.0078125, %v2012_v3  ;;  %v5877_v3 = vld [vmem:[%s7358_s17 + $0x60] sm:$0xff]  }
 0x57c   : > { %v2014_v36 = vpop.xlane.xlu1 %2013 }
 0x57d   : > { %v2017_v37 = vsub.f32 %v6618_v28, %v2015_v35  ;;  %v2016_v38 = vmul.f32 0.0078125, %v2014_v36  ;;  %v5878_v35 = vld [vmem:[%s7358_s17 + $0x68] sm:$0xff]   ;;  %v5879_v36 = vld [vmem:[%s7358_s17 + $0x70] sm:$0xff]  }
 0x57f   : > { %v2018_v39 = vsub.f32 %v6622_v30, %v2016_v38  ;;  %v2019_v40 = vmul.f32 %v2017_v37, %v2017_v37 }
 0x581   : > { %2021 = vadd.xlane.f32.xlu0 %v2019_v40  ;;  %v2020_v41 = vmul.f32 %v2018_v39, %v2018_v39 }
 0x583   : > { %2023 = vadd.xlane.f32.xlu1 %v2020_v41 }
 0x60e   : > { %v2022_v54 = vpop.xlane.xlu0 %2021 }
 0x60f   : > { %v2025_v55 = vmul.f32 0.0078125, %v2022_v54 }
 0x610   : > { %v2024_v56 = vpop.xlane.xlu1 %2023 }
 0x611   : > { %v2027_v57 = vadd.f32 1e-05, %v2025_v55  ;;  %v2026_v58 = vmul.f32 0.0078125, %v2024_v56 }
 0x613   : > { %6017 = vrsqrt.f32 %v2027_v57  ;;  %v2028_v59 = vadd.f32 1e-05, %v2026_v58 }
 0x615   : > { %6019 = vrsqrt.f32 %v2028_v59 }
 0x61d   : > { %v6018_v60 = vpop.eup %6017 }
 0x61e   : > { %v2031_v62 = vmul.f32 %v6018_v60, %v2017_v37  ;;  %v5880_v37 = vld [vmem:[%s7358_s17 + $0x78] sm:$0xff]  }
 0x61f   : > { %v6020_v1 = vpop.eup %6019 }
 0x620   : > { %v2039_v5 = vmul.f32 %v5139_v61, %v2031_v62  ;;  %v2032_v6 = vmul.f32 %v6020_v1, %v2018_v39 }
 0x622   : > { %v2040_v8 = vmul.f32 %v5139_v61, %v2032_v6  ;;  %v2047_v9 = vadd.f32 %v5140_v7, %v2039_v5 }
 0x624   : > { %v2048_v10 = vadd.f32 %v5140_v7, %v2040_v8 }
 0x626   : > { %v6672_v12 = vpack.c.bf16 %v2048_v10, %v2047_v9 }
 0x628   : > { %5540 = vmatmul.mubr.bf16.vlgmr.msra.gmra.mrb[4].mxu0 %v6672_v12  ;;  %5560 = vmatmul.mubr.bf16.vlgmr.msra.gmra.mrb[4].mxu1 %v6672_v12 }
 0x629   : > { %5564 = vmatpush3.bf16.msra.mxu0 %v5857_v11  ;;  %5579 = vmatprep.mubr.msk.bf16.mxu0 %vm6217_vm0, %v6216_v33 }
 0x62a   : > { %5565 = vmatprep.subr.bf16.mxu0 %v6216_v33  ;;  %5585 = vmatprep.mubr.msk.bf16.mxu1 %vm6217_vm0, %v6216_v33 }
 0x62d   : > { %5566 = vmatpush3.bf16.msra.mxu0 %v5858_v13 }
 0x62e   : > { %5567 = vmatprep.subr.bf16.mxu0 %v6216_v33 }
 0x631   : > { %5568 = vmatpush3.bf16.msra.mxu0 %v5859_v14 }
 0x632   : > { %5569 = vmatprep.subr.bf16.mxu0 %v6216_v33 }
 0x635   : > { %5570 = vmatpush3.bf16.msra.mxu0 %v5860_v15 }
 0x636   : > { %5571 = vmatprep.subr.bf16.mxu0 %v6216_v33 }
 0x639   : > { %5572 = vmatpush3.bf16.msra.mxu0 %v5861_v16 }
 0x63a   : > { %5573 = vmatprep.subr.bf16.mxu0 %v6216_v33 }
 0x63d   : > { %5574 = vmatpush3.bf16.msra.mxu0 %v5862_v17 }
 0x63e   : > { %5575 = vmatprep.subr.bf16.mxu0 %v6216_v33 }
 0x641   : > { %5576 = vmatpush3.bf16.msra.mxu0 %v5863_v18 }
 0x642   : > { %5577 = vmatprep.subr.bf16.mxu0 %v6216_v33 }
 0x645   : > { %5578 = vmatpush3.bf16.msra.mxu0 %v5864_v19 }
 0x646   : > { %5607 = vmatprep.subr.bf16.mxu0 %v6216_v33 }
 0x648   : > { %5580 = vmatmul.mubr.bf16.vlgmr.msra.gmra.mrb[8].mxu0 %v6672_v12 }
 0x649   : > { %5608 = vmatpush3.bf16.msra.mxu0 %v5865_v20  ;;  %5623 = vmatprep.mubr.msk.bf16.mxu0 %vm6217_vm0, %v6216_v33 }
 0x64a   : > { %5609 = vmatprep.subr.bf16.mxu0 %v6216_v33 }
 0x64d   : > { %5610 = vmatpush3.bf16.msra.mxu0 %v5866_v21 }
 0x64e   : > { %5611 = vmatprep.subr.bf16.mxu0 %v6216_v33 }
 0x651   : > { %5612 = vmatpush3.bf16.msra.mxu0 %v5867_v22 }
 0x652   : > { %5613 = vmatprep.subr.bf16.mxu0 %v6216_v33 }
 0x655   : > { %5614 = vmatpush3.bf16.msra.mxu0 %v5868_v24 }
 0x656   : > { %5615 = vmatprep.subr.bf16.mxu0 %v6216_v33 }
 0x659   : > { %5616 = vmatpush3.bf16.msra.mxu0 %v5869_v25 }
 0x65a   : > { %5617 = vmatprep.subr.bf16.mxu0 %v6216_v33 }
 0x65d   : > { %5618 = vmatpush3.bf16.msra.mxu0 %v5870_v26 }
 0x65e   : > { %5619 = vmatprep.subr.bf16.mxu0 %v6216_v33 }
 0x661   : > { %5620 = vmatpush3.bf16.msra.mxu0 %v5871_v27 }
 0x662   : > { %5621 = vmatprep.subr.bf16.mxu0 %v6216_v33 }
 0x665   : > { %5622 = vmatpush3.bf16.msra.mxu0 %v5872_v29 }
 0x666   : > { %5647 = vmatprep.subr.bf16.mxu0 %v6216_v33 }
 0x668   : > { %5624 = vmatmul.mubr.bf16.vlgmr.msra.gmra.mrb[12].mxu0 %v6672_v12 }
 0x669   : > { %5648 = vmatpush3.bf16.msra.mxu0 %v5873_v31  ;;  %5663 = vmatprep.mubr.msk.bf16.mxu0 %vm6217_vm0, %v6216_v33 }
 0x66a   : > { %5649 = vmatprep.subr.bf16.mxu0 %v6216_v33 }
 0x66d   : > { %5650 = vmatpush3.bf16.msra.mxu0 %v5874_v32 }
 0x66e   : > { %5651 = vmatprep.subr.bf16.mxu0 %v6216_v33 }
 0x671   : > { %5652 = vmatpush3.bf16.msra.mxu0 %v5875_v34 }
 0x672   : > { %5653 = vmatprep.subr.bf16.mxu0 %v6216_v33 }
 0x675   : > { %5654 = vmatpush3.bf16.msra.mxu0 %v5876_v2 }
 0x676   : > { %5655 = vmatprep.subr.bf16.mxu0 %v6216_v33 }
 0x679   : > { %5656 = vmatpush3.bf16.msra.mxu0 %v5877_v3 }
 0x67a   : > { %5657 = vmatprep.subr.bf16.mxu0 %v6216_v33 }
 0x67d   : > { %5658 = vmatpush3.bf16.msra.mxu0 %v5878_v35 }
 0x67e   : > { %5659 = vmatprep.subr.bf16.mxu0 %v6216_v33 }
 0x681   : > { %5660 = vmatpush3.bf16.msra.mxu0 %v5879_v36 }
 0x682   : > { %5661 = vmatprep.subr.bf16.mxu0 %v6216_v33 }
 0x685   : > { %5662 = vmatpush3.bf16.msra.mxu0 %v5880_v37 }
 0x686   : > { %5691 = vmatprep.subr.bf16.mxu0 %v6216_v33 }
 0x688   : > { %5664 = vmatmul.mubr.bf16.vlgmr.msra.gmra.mrb[16].mxu0 %v6672_v12 }
 0x689   : > { %5699 = vmatprep.mubr.msk.bf16.mxu0 %vm6217_vm0, %v6216_v33 }
 0x6fb   : > { %v2148_v38 = vpop.f32.mrb[4].mxu0  ;;  %v2253_v39 = vpop.f32.mrb[4].mxu1 }
 0x6fc   : > { %v2367_v40 = vpack.c.bf16 %v2253_v39, %v2253_v39  ;;  %v5541_v41 = vpop.f32.mrb[5].mxu0  ;;  %v5561_v42 = vpop.f32.mrb[5].mxu1  ;;  %v2365_v49 = vpack.c.bf16 %v2148_v38, %v2148_v38  ;;  %v5881_v39 = vld [vmem:[%s7353_s28 + $0x40] sm:$0xff]  }
 0x6fd   : > { %v2151_v43 = vpop.f32.mrb[6].mxu0  ;;  %v2256_v44 = vpop.f32.mrb[6].mxu1  ;;  %v5882_v41 = vld [vmem:[%s7353_s28 + $0x48] sm:$0xff]   ;;  %v5883_v42 = vld [vmem:[%s7353_s28 + $0x50] sm:$0xff]  }
 0x6fe   : > { %v2376_v45 = vsel %vm2371_vm1, %v2367_v40, 0  ;;  %v5542_v46 = vpop.f32.mrb[7].mxu0  ;;  %v5562_v47 = vpop.f32.mrb[7].mxu1  ;;  %v2368_v48 = vpack.c.bf16 %v2256_v44, %v2256_v44  ;;  %v2366_v51 = vpack.c.bf16 %v2151_v43, %v2151_v43  ;;  %v5884_v43 = vld [vmem:[%s7353_s28 + $0x58] sm:$0xff]   ;;  %v5885_v44 = vld [vmem:[%s7353_s28 + $0x60] sm:$0xff]  }
 0x6ff   : > { %5584 = vmatpush3.bf16.xpose.msra.mxu1 %v2376_v45  ;;  %v5886_v45 = vld [vmem:[%s7353_s28 + $0x68] sm:$0xff]   ;;  %v5887_v46 = vld [vmem:[%s7353_s28 + $0x70] sm:$0xff]   ;;  %v5888_v47 = vld [vmem:[%s7353_s28 + $0x78] sm:$0xff]   ;;  %s7368_s28 = sld [smem:[#allocation27_spill]] }
 0x700   : > { %5589 = vmatprep.subr.bf16.mxu1 %v6216_v33  ;;  %v2422_v50 = vsel %vm2371_vm1, %v2368_v48, 0 }
 0x705   : > { %s7370_s5 = scalar_lea.vmem %s7368_s28, %s6451_s16 }
 0x706   : > { %5586 = vmatmul.mubr.msk.bf16.vlgmr.msra.gmra.mrb[8].mxu1 %vm2371_vm1, %v2365_v49 }
 0x707   : > { %5590 = vmatpush3.bf16.xpose.msra.mxu1 %v2422_v50  ;;  %5591 = vmatprep.mubr.msk.bf16.mxu1 %vm6217_vm0, %v6216_v33 }
 0x708   : > { %5595 = vmatprep.subr.bf16.mxu1 %v6216_v33 }
 0x70e   : > { %5592 = vmatmul.mubr.msk.bf16.vlgmr.msra.gmra.mrb[12].mxu1 %vm2371_vm1, %v2366_v51 }
 0x70f   : > { %5597 = vmatprep.mubr.msk.bf16.mxu1 %vm6217_vm0, %v6216_v33 }
 0x71b   : > { %v2358_v52 = vpop.f32.mrb[8].mxu0 }
 0x71c   : > { %v2369_v53 = vpack.c.bf16 %v2358_v52, %v2358_v52  ;;  %v5581_v54 = vpop.f32.mrb[9].mxu0 }
 0x71d   : > { %v2361_v55 = vpop.f32.mrb[10].mxu0 }
 0x71e   : > { %v2494_v56 = vsel %vm2492_vm2, %v2369_v53, 0  ;;  %v5582_v57 = vpop.f32.mrb[11].mxu0  ;;  %v2370_v2 = vpack.c.bf16 %v2361_v55, %v2361_v55 }
 0x71f   : > { %5596 = vmatpush3.bf16.msra.mxu1 %v2494_v56 }
 0x720   : > { %5601 = vmatprep.subr.bf16.mxu1 %v6216_v33  ;;  %v2540_v36 = vsel %vm2492_vm2, %v2370_v2, 0  ;;  %v5889_v2 = vld [vmem:[%s7361_s24 + $0x20] sm:$0xff]  }
 0x721   : > { %5692 = vmatpush3.bf16.msra.mxu0 %v5889_v2  ;;  %v5899_v2 = vld [vmem:[%s7364_s27 + $0x4] ss:$16 sps:$4 sm:$0xff]  }
 0x722   : > { %5693 = vmatprep.subr.bf16.mxu0 %v6216_v33 }
 0x73b   : > { %v6748_v58 = vpop.f32.mrb[12].mxu0 }
 0x73c   : > { %v5625_v59 = vpop.f32.mrb[13].mxu0 }
 0x73d   : > { %v6750_v60 = vpop.f32.mrb[14].mxu0 }
 0x73e   : > { %v5626_v61 = vpop.f32.mrb[15].mxu0 }
 0x75b   : > { %v6752_v62 = vpop.f32.mrb[16].mxu0 }
 0x75c   : > { %v5665_v1 = vpop.f32.mrb[17].mxu0 }
 0x75d   : > { %v6754_v5 = vpop.f32.mrb[18].mxu0 }
 0x75e   : > { %v5666_v6 = vpop.f32.mrb[19].mxu0 }
 0x7d9   : > { %v2412_v7 = vpop.f32.mrb[8].mxu1 }
 0x7da   : > { %v5587_v8 = vpop.f32.mrb[9].mxu1  ;;  %v2465_v9 = vsel %vm2464_vm3, %v2412_v7, -inf }
 0x7db   : > { %2466 = vmax.xlane.f32.xlu0 %v2465_v9  ;;  %v2415_v10 = vpop.f32.mrb[10].mxu1  ;;  %v2909_v8 = vpack.c.bf16 %v6748_v58, %v6748_v58 }
 0x7dc   : > { %v5588_v11 = vpop.f32.mrb[11].mxu1  ;;  %v2913_v10 = vpack.c.bf16 %v6752_v62, %v6752_v62 }
 0x7dd   : > { %v2910_v11 = vpack.c.bf16 %v6750_v60, %v6750_v60 }
 0x7e1   : > { %v2458_v13 = vpop.f32.mrb[12].mxu1 }
 0x7e2   : > { %v5593_v14 = vpop.f32.mrb[13].mxu1  ;;  %v2468_v15 = vsel %vm2464_vm3, %v2458_v13, -inf }
 0x7e3   : > { %2469 = vmax.xlane.f32.xlu1 %v2468_v15  ;;  %v2461_v16 = vpop.f32.mrb[14].mxu1 }
 0x7e4   : > { %v5594_v17 = vpop.f32.mrb[15].mxu1 }
 0x868   : > { %v2467_v18 = vpop.xlane.xlu0 %2466 }
 0x869   : > { %v2471_v19 = vsub.f32 %v2412_v7, %v2467_v18 }
 0x86b   : > { %v2473_v20 = vmul.f32 1.442695, %v2471_v19 }
 0x86d   : > { %6021 = vpow2.f32 %v2473_v20 }
 0x870   : > { %v2470_v21 = vpop.xlane.xlu1 %2469 }
 0x871   : > { %v2472_v22 = vsub.f32 %v2458_v13, %v2470_v21  ;;  %v3035_v13 = vsel %vm2492_vm2, %v2913_v10, 0 }
 0x873   : > { %v2475_v24 = vmul.f32 1.442695, %v2472_v22 }
 0x875   : > { %6023 = vpow2.f32 %v2475_v24 }
 0x877   : > { %v6022_v25 = vpop.eup %6021 }
 0x878   : > { %v2477_v26 = vsel %vm2464_vm3, %v6022_v25, 0.0 }
 0x879   : > { %2478 = vadd.xlane.f32.xlu0 %v2477_v26 }
 0x87f   : > { %v6024_v27 = vpop.eup %6023 }
 0x880   : > { %v2480_v29 = vsel %vm2464_vm3, %v6024_v27, 0.0 }
 0x881   : > { %2481 = vadd.xlane.f32.xlu1 %v2480_v29 }
 0x906   : > { %v2479_v31 = vpop.xlane.xlu0 %2478 }
 0x907   : > { %6025 = vrcp.f32 %v2479_v31 }
 0x90e   : > { %v2482_v32 = vpop.xlane.xlu1 %2481 }
 0x90f   : > { %6027 = vrcp.f32 %v2482_v32 }
 0x911   : > { %v6026_v34 = vpop.eup %6025 }
 0x912   : > { %v2484_v3 = vmul.f32 %v6026_v34, %v6022_v25 }
 0x914   : > { %v2487_v35 = vpack.c.bf16 %v2484_v3, %v2484_v3  ;;  %v5890_v3 = vld [vmem:[%s7361_s24 + $0x28] sm:$0xff]  }
 0x915   : > { %5694 = vmatpush3.bf16.msra.mxu0 %v5890_v3  ;;  %v5900_v3 = vld [vmem:[%s7364_s27 + $0x8] ss:$16 sps:$4 sm:$0xff]  }
 0x916   : > { %5598 = vmatmul.mubr.msk.bf16.vlgmr.msra.gmra.mrb[16].mxu1 %vm2464_vm3, %v2487_v35  ;;  %5695 = vmatprep.subr.bf16.mxu0 %v6216_v33 }
 0x917   : > { %5602 = vmatpush3.bf16.msra.mxu1 %v2540_v36  ;;  %5603 = vmatprep.mubr.msk.bf16.mxu1 %vm6217_vm0, %v6216_v33 }
 0x918   : > { %5627 = vmatprep.subr.bf16.mxu1 %v6216_v33 }
 0x919   : > { %v6028_v37 = vpop.eup %6027 }
 0x91a   : > { %v2486_v38 = vmul.f32 %v6028_v37, %v6024_v27 }
 0x91c   : > { %v2488_v40 = vpack.c.bf16 %v2486_v38, %v2486_v38  ;;  %v2914_v38 = vpack.c.bf16 %v6754_v5, %v6754_v5  ;;  %v5892_v5 = vld [vmem:[%s7361_s24 + $0x38] sm:$0xff]  }
 0x91e   : > { %5604 = vmatmul.mubr.msk.bf16.vlgmr.msra.gmra.mrb[20].mxu1 %vm2464_vm3, %v2488_v40 }
 0x91f   : > { %5628 = vmatpush3.bf16.msra.mxu1 %v5881_v39  ;;  %5643 = vmatprep.mubr.msk.bf16.mxu1 %vm6217_vm0, %v6216_v33 }
 0x920   : > { %5629 = vmatprep.subr.bf16.mxu1 %v6216_v33 }
 0x923   : > { %5630 = vmatpush3.bf16.msra.mxu1 %v5882_v41  ;;  %v3081_v41 = vsel %vm2492_vm2, %v2914_v38, 0  ;;  %v5906_v38 = vld [vmem:[%s7364_s27 + $0x28] ss:$16 sps:$4 sm:$0xff]  }
 0x924   : > { %5631 = vmatprep.subr.bf16.mxu1 %v6216_v33 }
 0x927   : > { %5632 = vmatpush3.bf16.msra.mxu1 %v5883_v42 }
 0x928   : > { %5633 = vmatprep.subr.bf16.mxu1 %v6216_v33 }
 0x92b   : > { %5634 = vmatpush3.bf16.msra.mxu1 %v5884_v43 }
 0x92c   : > { %5635 = vmatprep.subr.bf16.mxu1 %v6216_v33 }
 0x92f   : > { %5636 = vmatpush3.bf16.msra.mxu1 %v5885_v44 }
 0x930   : > { %5637 = vmatprep.subr.bf16.mxu1 %v6216_v33 }
 0x933   : > { %5638 = vmatpush3.bf16.msra.mxu1 %v5886_v45  ;;  %v5891_v45 = vld [vmem:[%s7361_s24 + $0x30] sm:$0xff]  }
 0x934   : > { %5639 = vmatprep.subr.bf16.mxu1 %v6216_v33  ;;  %5696 = vmatpush3.bf16.msra.mxu0 %v5891_v45 }
 0x935   : > { %5697 = vmatprep.subr.bf16.mxu0 %v6216_v33 }
 0x937   : > { %5640 = vmatpush3.bf16.msra.mxu1 %v5887_v46 }
 0x938   : > { %5641 = vmatprep.subr.bf16.mxu1 %v6216_v33  ;;  %5698 = vmatpush3.bf16.msra.mxu0 %v5892_v5  ;;  %v5911_v5 = vld [vmem:[%s7364_s27 + $0x44] ss:$16 sps:$4 sm:$0xff]  }
 0x939   : > { %5703 = vmatprep.subr.bf16.mxu0 %v6216_v33 }
 0x93b   : > { %5642 = vmatpush3.bf16.msra.mxu1 %v5888_v47 }
 0x93c   : > { %5667 = vmatprep.subr.bf16.mxu1 %v6216_v33 }
 0x93e   : > { %5644 = vmatmul.mubr.bf16.vlgmr.msra.gmra.mrb[24].mxu1 %v6672_v12 }
 0x93f   : > { %5669 = vmatprep.mubr.msk.bf16.mxu1 %vm6217_vm0, %v6216_v33 }
 0x9e9   : > { %v6787_v48 = vpop.f32.mrb[16].mxu1 }
 0x9ea   : > { %v5599_v49 = vpop.f32.mrb[17].mxu1 }
 0x9eb   : > { %v2533_v50 = vpop.f32.mrb[18].mxu1 }
 0x9ec   : > { %v5600_v51 = vpop.f32.mrb[19].mxu1 }
 0x9f1   : > { %v6789_v52 = vpop.f32.mrb[20].mxu1 }
 0x9f2   : > { %v2582_v53 = vpack.c.bf16 %v6789_v52, %v6787_v48  ;;  %v5605_v54 = vpop.f32.mrb[21].mxu1 }
 0x9f3   : > { %v2579_v55 = vpop.f32.mrb[22].mxu1  ;;  %v5893_v54 = vld [vmem:[%s7361_s24] sm:$0xff]  }
 0x9f4   : > { %v5606_v56 = vpop.f32.mrb[23].mxu1 }
 0xa11   : > { %v2796_v57 = vpop.f32.mrb[24].mxu1 }
 0xa12   : > { %v2911_v59 = vpack.c.bf16 %v2796_v57, %v2796_v57  ;;  %v5645_v61 = vpop.f32.mrb[25].mxu1 }
 0xa13   : > { %v2799_v12 = vpop.f32.mrb[26].mxu1  ;;  %v5894_v61 = vld [vmem:[%s7361_s24 + $0x8] sm:$0xff]  }
 0xa14   : > { %v2919_v1 = vsel %vm2371_vm1, %v2911_v59, 0  ;;  %v5646_v6 = vpop.f32.mrb[27].mxu1  ;;  %v2912_v7 = vpack.c.bf16 %v2799_v12, %v2799_v12  ;;  %v5895_v12 = vld [vmem:[%s7361_s24 + $0x10] sm:$0xff]  }
 0xa15   : > { %5668 = vmatpush3.bf16.xpose.msra.mxu1 %v2919_v1  ;;  %v5896_v1 = vld [vmem:[%s7361_s24 + $0x18] sm:$0xff]  }
 0xa16   : > { %5673 = vmatprep.subr.bf16.mxu1 %v6216_v33  ;;  %v2965_v9 = vsel %vm2371_vm1, %v2912_v7, 0 }
 0xa1c   : > { %5670 = vmatmul.mubr.msk.bf16.vlgmr.msra.gmra.mrb[28].mxu1 %vm2371_vm1, %v2909_v8 }
 0xa1d   : > { %5674 = vmatpush3.bf16.xpose.msra.mxu1 %v2965_v9  ;;  %5675 = vmatprep.mubr.msk.bf16.mxu1 %vm6217_vm0, %v6216_v33 }
 0xa1e   : > { %5679 = vmatprep.subr.bf16.mxu1 %v6216_v33 }
 0xa24   : > { %5676 = vmatmul.mubr.msk.bf16.vlgmr.msra.gmra.mrb[32].mxu1 %vm2371_vm1, %v2910_v11 }
 0xa25   : > { %5680 = vmatpush3.bf16.msra.mxu1 %v3035_v13  ;;  %5681 = vmatprep.mubr.msk.bf16.mxu1 %vm6217_vm0, %v6216_v33 }
 0xa26   : > { %5685 = vmatprep.subr.bf16.mxu1 %v6216_v33 }
 0xaef   : > { %v2955_v58 = vpop.f32.mrb[28].mxu1 }
 0xaf0   : > { %v5671_v14 = vpop.f32.mrb[29].mxu1  ;;  %v3007_v15 = vsel %vm2464_vm3, %v2955_v58, -inf }
 0xaf1   : > { %3008 = vmax.xlane.f32.xlu0 %v3007_v15  ;;  %v2958_v16 = vpop.f32.mrb[30].mxu1 }
 0xaf2   : > { %v5672_v62 = vpop.f32.mrb[31].mxu1 }
 0xaf7   : > { %v3001_v17 = vpop.f32.mrb[32].mxu1 }
 0xaf8   : > { %v5677_v18 = vpop.f32.mrb[33].mxu1  ;;  %v3010_v60 = vsel %vm2464_vm3, %v3001_v17, -inf }
 0xaf9   : > { %3011 = vmax.xlane.f32.xlu1 %v3010_v60  ;;  %v3004_v19 = vpop.f32.mrb[34].mxu1 }
 0xafa   : > { %v5678_v20 = vpop.f32.mrb[35].mxu1  ;;  %v5263_v19 = vld [vmem:[%s7365_s11] ss:$0 sm:$0xff] }
 0xb7e   : > { %v3009_v21 = vpop.xlane.xlu0 %3008 }
 0xb7f   : > { %v3013_v22 = vsub.f32 %v2955_v58, %v3009_v21 }
 0xb81   : > { %v3015_v24 = vmul.f32 1.442695, %v3013_v22  ;;  %v5264_v22 = vld [vmem:[%s7366_s15] ss:$0 sm:$0xff] }
 0xb83   : > { %6029 = vpow2.f32 %v3015_v24 }
 0xb86   : > { %v3012_v25 = vpop.xlane.xlu1 %3011 }
 0xb87   : > { %v3014_v26 = vsub.f32 %v3001_v17, %v3012_v25 }
 0xb89   : > { %v3017_v27 = vmul.f32 1.442695, %v3014_v26 }
 0xb8b   : > { %6031 = vpow2.f32 %v3017_v27 }
 0xb8d   : > { %v6030_v29 = vpop.eup %6029 }
 0xb8e   : > { %v3019_v31 = vsel %vm2464_vm3, %v6030_v29, 0.0 }
 0xb8f   : > { %3020 = vadd.xlane.f32.xlu0 %v3019_v31 }
 0xb95   : > { %v6032_v32 = vpop.eup %6031 }
 0xb96   : > { %v3022_v34 = vsel %vm2464_vm3, %v6032_v32, 0.0 }
 0xb97   : > { %3023 = vadd.xlane.f32.xlu1 %v3022_v34  ;;  %v5897_v34 = vld [vmem:[%s7364_s27] ss:$16 sps:$4 sm:$0xff]  }
 0xc1c   : > { %v3021_v35 = vpop.xlane.xlu0 %3020 }
 0xc1d   : > { %6033 = vrcp.f32 %v3021_v35  ;;  %v5902_v35 = vld [vmem:[%s7364_s27 + $0xc] ss:$16 sps:$4 sm:$0xff]  }
 0xc24   : > { %v3024_v36 = vpop.xlane.xlu1 %3023 }
 0xc25   : > { %6035 = vrcp.f32 %v3024_v36  ;;  %v5905_v36 = vld [vmem:[%s7364_s27 + $0x24] ss:$16 sps:$4 sm:$0xff]  }
 0xc27   : > { %v6034_v37 = vpop.eup %6033 }
 0xc28   : > { %v3026_v39 = vmul.f32 %v6034_v37, %v6030_v29  ;;  %v5908_v37 = vld [vmem:[%s7364_s27 + $0x2c] ss:$16 sps:$4 sm:$0xff]  }
 0xc2a   : > { %v3029_v40 = vpack.c.bf16 %v3026_v39, %v3026_v39 }
 0xc2c   : > { %5682 = vmatmul.mubr.msk.bf16.vlgmr.msra.gmra.mrb[36].mxu1 %vm2464_vm3, %v3029_v40 }
 0xc2d   : > { %5686 = vmatpush3.bf16.msra.mxu1 %v3081_v41  ;;  %5687 = vmatprep.mubr.msk.bf16.mxu1 %vm6217_vm0, %v6216_v33 }
 0xc2e   : > { %3566 = vmatprep.subr.bf16.mxu1 %v5899_v2  ;;  %v5947_v2 = vld [vmem:[%s6523_s14 + $0x48] sm:$0xff]  }
 0xc2f   : > { %v6036_v42 = vpop.eup %6035 }
 0xc30   : > { %v3028_v43 = vmul.f32 %v6036_v42, %v6032_v32 }
 0xc32   : > { %v3030_v44 = vpack.c.bf16 %v3028_v43, %v3028_v43 }
 0xc34   : > { %5688 = vmatmul.mubr.msk.bf16.vlgmr.msra.gmra.mrb[40].mxu1 %vm2464_vm3, %v3030_v44 }
 0xc35   : > { %3598 = vmatprep.mubr.bf16.mxu1 %v6215_v23  ;;  %3567 = vmatpush1.bf16.msra.mxu1 %v5897_v34  ;;  %v5946_v34 = vld [vmem:[%s6523_s14] sm:$0xff]  }
 0xc36   : > { %3568 = vmatprep.subr.bf16.mxu1 %v5905_v36  ;;  %v5950_v36 = vld [vmem:[%s6523_s14 + $0x10] sm:$0xff]  }
 0xcff   : > { %v3071_v46 = vpop.f32.mrb[36].mxu1 }
 0xd00   : > { %v5683_v47 = vpop.f32.mrb[37].mxu1 }
 0xd01   : > { %v3074_v49 = vpop.f32.mrb[38].mxu1  ;;  %v5909_v47 = vld [vmem:[%s7364_s27 + $0x40] ss:$16 sps:$4 sm:$0xff]  }
 0xd02   : > { %v5684_v50 = vpop.f32.mrb[39].mxu1  ;;  %v5912_v49 = vld [vmem:[%s7364_s27 + $0x48] ss:$16 sps:$4 sm:$0xff]  }
 0xd03   : > { %v5917_v50 = vld [vmem:[%s7364_s27 + $0x64] ss:$16 sps:$4 sm:$0xff]  }
 0xd07   : > { %v3117_v51 = vpop.f32.mrb[40].mxu1 }
 0xd08   : > { %v3123_v55 = vpack.c.bf16 %v3117_v51, %v3071_v46  ;;  %v5689_v56 = vpop.f32.mrb[41].mxu1  ;;  %v5914_v46 = vld [vmem:[%s7364_s27 + $0x4c] ss:$16 sps:$4 sm:$0xff]  }
 0xd09   : > { %v3120_v57 = vpop.f32.mrb[42].mxu1  ;;  %v5920_v51 = vld [vmem:[%s7364_s27 + $0x6c] ss:$16 sps:$4 sm:$0xff]   ;;  %v5923_v56 = vld [vmem:[%s7364_s27 + $0x84] ss:$16 sps:$4 sm:$0xff]  }
 0xd0a   : > { %v5690_v59 = vpop.f32.mrb[43].mxu1  ;;  %5700 = vmatmul.mubr.msk.bf16.vlgmr.msra.gmra.mrb[20].mxu0 %vm2371_vm1, %v3123_v55  ;;  %v5918_v55 = vld [vmem:[%s7364_s27 + $0x68] ss:$16 sps:$4 sm:$0xff]   ;;  %v5926_v57 = vld [vmem:[%s7364_s27 + $0x8c] ss:$16 sps:$4 sm:$0xff]  }
 0xd0b   : > { %5704 = vmatpush3.bf16.msra.mxu0 %v5893_v54  ;;  %5711 = vmatprep.mubr.msk.bf16.mxu0 %vm6217_vm0, %v6216_v33  ;;  %v5915_v54 = vld [vmem:[%s7364_s27 + $0x60] ss:$16 sps:$4 sm:$0xff]  }
 0xd0c   : > { %5705 = vmatprep.subr.bf16.mxu0 %v6216_v33  ;;  %v5921_v59 = vld [vmem:[%s7364_s27 + $0x80] ss:$16 sps:$4 sm:$0xff]  }
 0xd0f   : > { %5706 = vmatpush3.bf16.msra.mxu0 %v5894_v61  ;;  %v5924_v61 = vld [vmem:[%s7364_s27 + $0x88] ss:$16 sps:$4 sm:$0xff]  }
 0xd10   : > { %5707 = vmatprep.subr.bf16.mxu0 %v6216_v33 }
 0xd13   : > { %5708 = vmatpush3.bf16.msra.mxu0 %v5895_v12  ;;  %v5929_v12 = vld [vmem:[%s7364_s27 + $0xa4] ss:$16 sps:$4 sm:$0xff]  }
 0xd14   : > { %5709 = vmatprep.subr.bf16.mxu0 %v6216_v33 }
 0xd17   : > { %5710 = vmatpush3.bf16.msra.mxu0 %v5896_v1  ;;  %v5932_v1 = vld [vmem:[%s7364_s27 + $0xac] ss:$16 sps:$4 sm:$0xff]  }
 0xd18   : > { %3609 = vmatprep.subr.bf16.mxu0 %v5902_v35  ;;  %v5949_v35 = vld [vmem:[%s6523_s14 + $0x50] sm:$0xff]  }
 0xd1a   : > { %5712 = vmatmul.mubr.msk.bf16.vlgmr.msra.gmra.mrb[20].mxu0 %vm2371_vm1, %v2582_v53 }
 0xd1b   : > { %3641 = vmatprep.mubr.bf16.mxu0 %v6215_v23  ;;  %3610 = vmatpush1.bf16.msra.mxu0 %v5900_v3  ;;  %v5948_v3 = vld [vmem:[%s6523_s14 + $0x8] sm:$0xff]  }
 0xd1c   : > { %3611 = vmatprep.subr.bf16.mxu0 %v5908_v37  ;;  %v5951_v37 = vld [vmem:[%s6523_s14 + $0x58] sm:$0xff]  }
 0xd1f   : > { %3612 = vmatpush1.bf16.msra.mxu0 %v5906_v38  ;;  %v5954_v38 = vld [vmem:[%s6523_s14 + $0x20] sm:$0xff]  }
 0xd20   : > { %3613 = vmatprep.subr.bf16.mxu0 %v5914_v46 }
 0xd23   : > { %3614 = vmatpush1.bf16.msra.mxu0 %v5912_v49 }
 0xd24   : > { %3615 = vmatprep.subr.bf16.mxu0 %v5920_v51 }
 0xd27   : > { %3616 = vmatpush1.bf16.msra.mxu0 %v5918_v55 }
 0xd28   : > { %3617 = vmatprep.subr.bf16.mxu0 %v5926_v57 }
 0xd2b   : > { %3618 = vmatpush1.bf16.msra.mxu0 %v5924_v61 }
 0xd2c   : > { %3619 = vmatprep.subr.bf16.mxu0 %v5932_v1 }
 0xded   : > { %v3262_v6 = vpop.f32.mrb[20].mxu0 }
 0xdee   : > { %3271 = vadd.xlane.f32.xlu0 %v3262_v6  ;;  %v5713_v7 = vpop.f32.mrb[21].mxu0 }
 0xdef   : > { %v3265_v8 = vpop.f32.mrb[22].mxu0  ;;  %v5930_v7 = vld [vmem:[%s7364_s27 + $0xa8] ss:$16 sps:$4 sm:$0xff]  }
 0xdf0   : > { %3273 = vadd.xlane.f32.xlu1 %v3265_v8  ;;  %v5714_v9 = vpop.f32.mrb[23].mxu0  ;;  %3620 = vmatpush1.bf16.msra.mxu0 %v5930_v7 }
 0xdf1   : > { %v5938_v9 = vld [vmem:[%s7364_s27 + $0xcc] ss:$16 sps:$4 sm:$0xff]  }
 0xdf2   : > { %3621 = vmatprep.subr.bf16.mxu0 %v5938_v9 }
 0xe7b   : > { %v3272_v10 = vpop.xlane.xlu0 %3271 }
 0xe7c   : > { %v3275_v11 = vmul.f32 0.0078125, %v3272_v10  ;;  %v5933_v10 = vld [vmem:[%s7364_s27 + $0xc0] ss:$16 sps:$4 sm:$0xff]  }
 0xe7d   : > { %v3274_v13 = vpop.xlane.xlu1 %3273 }
 0xe7e   : > { %v3277_v58 = vsub.f32 %v3262_v6, %v3275_v11  ;;  %v3276_v33 = vmul.f32 0.0078125, %v3274_v13  ;;  %v5927_v6 = vld [vmem:[%s7364_s27 + $0xa0] ss:$16 sps:$4 sm:$0xff]   ;;  %v5936_v11 = vld [vmem:[%s7364_s27 + $0xc8] ss:$16 sps:$4 sm:$0xff]  }
 0xe7f   : > { %v5941_v13 = vld [vmem:[%s7364_s27 + $0xe4] ss:$16 sps:$4 sm:$0xff]   ;;  %3622 = vmatpush1.bf16.msra.mxu0 %v5936_v11 }
 0xe80   : > { %v3278_v14 = vsub.f32 %v3265_v8, %v3276_v33  ;;  %v3279_v15 = vmul.f32 %v3277_v58, %v3277_v58  ;;  %v5935_v8 = vld [vmem:[%s7364_s27 + $0xc4] ss:$16 sps:$4 sm:$0xff]   ;;  %v5942_v33 = vld [vmem:[%s7364_s27 + $0xe8] ss:$16 sps:$4 sm:$0xff]  }
 0xe82   : > { %3281 = vadd.xlane.f32.xlu0 %v3279_v15  ;;  %v3280_v48 = vmul.f32 %v3278_v14, %v3278_v14 }
 0xe84   : > { %3283 = vadd.xlane.f32.xlu1 %v3280_v48 }
 0xf0f   : > { %v3282_v52 = vpop.xlane.xlu0 %3281 }
 0xf10   : > { %v3285_v53 = vmul.f32 0.0078125, %v3282_v52 }
 0xf11   : > { %v3284_v16 = vpop.xlane.xlu1 %3283 }
 0xf12   : > { %v3287_v62 = vadd.f32 1e-05, %v3285_v53  ;;  %v3286_v17 = vmul.f32 0.0078125, %v3284_v16 }
 0xf14   : > { %6037 = vrsqrt.f32 %v3287_v62  ;;  %v3288_v18 = vadd.f32 1e-05, %v3286_v17 }
 0xf16   : > { %6039 = vrsqrt.f32 %v3288_v18  ;;  %v5265_v18 = vld [vmem:[%s7369_s4] ss:$0 sm:$0xff] }
 0xf1e   : > { %v6038_v60 = vpop.eup %6037 }
 0xf1f   : > { %v3291_v20 = vmul.f32 %v6038_v60, %v3277_v58  ;;  %v5939_v58 = vld [vmem:[%s7364_s27 + $0xe0] ss:$16 sps:$4 sm:$0xff]  }
 0xf20   : > { %v6040_v21 = vpop.eup %6039 }
 0xf21   : > { %v3299_v24 = vmul.f32 %v5263_v19, %v3291_v20  ;;  %v3292_v25 = vmul.f32 %v6040_v21, %v3278_v14  ;;  %v5944_v14 = vld [vmem:[%s7364_s27 + $0xec] ss:$16 sps:$4 sm:$0xff]  }
 0xf22   : > { %3623 = vmatprep.subr.bf16.mxu0 %v5944_v14 }
 0xf23   : > { %v3307_v26 = vadd.f32 %v5264_v22, %v3299_v24  ;;  %v3300_v27 = vmul.f32 %v5263_v19, %v3292_v25  ;;  %3624 = vmatpush1.bf16.msra.mxu0 %v5942_v33 }
 0xf25   : > { %v6853_v29 = vadd.f32 %v3307_v26, %v6618_v28  ;;  %v3308_v31 = vadd.f32 %v5264_v22, %v3300_v27  ;;  %v5903_v28 = vld [vmem:[%s7364_s27 + $0x20] ss:$16 sps:$4 sm:$0xff]  }
 0xf26   : > { %3569 = vmatpush1.bf16.msra.mxu1 %v5903_v28  ;;  %v5266_v22 = vld [vmem:[%s7370_s5] ss:$0 sm:$0xff] }
 0xf27   : > { %3313 = vadd.xlane.f32.xlu0 %v6853_v29  ;;  %v6857_v32 = vadd.f32 %v3308_v31, %v6622_v30  ;;  %3570 = vmatprep.subr.bf16.mxu1 %v5911_v5  ;;  %v5945_v31 = vld [vmem:[%s6523_s14 + $0x40] sm:$0xff]   ;;  %v3400_v5 = vsub.s32 3, %v6595_v63 }
 0xf28   : > { %v5953_v28 = vld [vmem:[%s6523_s14 + $0x60] sm:$0xff]  }
 0xf29   : > { %3315 = vadd.xlane.f32.xlu1 %v6857_v32 }
 0xf2a   : > { %3571 = vmatpush1.bf16.msra.mxu1 %v5909_v47 }
 0xf2b   : > { %3572 = vmatprep.subr.bf16.mxu1 %v5917_v50 }
 0xf2e   : > { %3573 = vmatpush1.bf16.msra.mxu1 %v5915_v54 }
 0xf2f   : > { %3574 = vmatprep.subr.bf16.mxu1 %v5923_v56 }
 0xf32   : > { %3575 = vmatpush1.bf16.msra.mxu1 %v5921_v59 }
 0xf33   : > { %3576 = vmatprep.subr.bf16.mxu1 %v5929_v12 }
 0xf36   : > { %3577 = vmatpush1.bf16.msra.mxu1 %v5927_v6 }
 0xf37   : > { %3578 = vmatprep.subr.bf16.mxu1 %v5935_v8 }
 0xf3a   : > { %3579 = vmatpush1.bf16.msra.mxu1 %v5933_v10 }
 0xf3b   : > { %3580 = vmatprep.subr.bf16.mxu1 %v5941_v13 }
 0xf3e   : > { %3581 = vmatpush1.bf16.msra.mxu1 %v5939_v58 }
 0xf3f   : > { %5479 = vmatprep.subr.bf16.mxu1 %v5945_v31 }
 0xfb4   : > { %v3314_v30 = vpop.xlane.xlu0 %3313 }
 0xfb5   : > { %v3317_v39 = vmul.f32 0.0078125, %v3314_v30  ;;  %v5955_v30 = vld [vmem:[%s6523_s14 + $0x68] sm:$0xff]  }
 0xfb6   : > { %v3316_v40 = vpop.xlane.xlu1 %3315 }
 0xfb7   : > { %v6869_v41 = vsub.f32 %v6853_v29, %v3317_v39  ;;  %v3318_v42 = vmul.f32 0.0078125, %v3316_v40  ;;  %v5956_v39 = vld [vmem:[%s6523_s14 + $0x28] sm:$0xff]   ;;  %v5957_v40 = vld [vmem:[%s6523_s14 + $0x70] sm:$0xff]  }
 0xfb9   : > { %v6872_v43 = vsub.f32 %v6857_v32, %v3318_v42  ;;  %v3321_v44 = vmul.f32 %v6869_v41, %v6869_v41  ;;  %v5959_v42 = vld [vmem:[%s6523_s14 + $0x78] sm:$0xff]  }
 0xfbb   : > { %3323 = vadd.xlane.f32.xlu0 %v3321_v44  ;;  %v3322_v45 = vmul.f32 %v6872_v43, %v6872_v43  ;;  %v3396_v44 = vsub.s32 2, %v6595_v63 }
 0xfbd   : > { %3325 = vadd.xlane.f32.xlu1 %v3322_v45  ;;  %v3384_v45 = vld [vmem:[%s6513_s23] sm:$0xf] }
 0xfbe   : > { %v3397_v46 = vrot.slane %v3384_v45, %v3396_v44  ;;  %v3401_v47 = vrot.slane %v3384_v45, %v3400_v5 }
0x1048   : > { %v3324_v15 = vpop.xlane.xlu0 %3323 }
0x1049   : > { %v3327_v48 = vmul.f32 0.0078125, %v3324_v15 }
0x104a   : > { %v3326_v52 = vpop.xlane.xlu1 %3325 }
0x104b   : > { %v3329_v53 = vadd.f32 1e-05, %v3327_v48  ;;  %v3328_v16 = vmul.f32 0.0078125, %v3326_v52 }
0x104d   : > { %6041 = vrsqrt.f32 %v3329_v53  ;;  %v3330_v62 = vadd.f32 1e-05, %v3328_v16  ;;  %v6933_v53 = vld [vmem:[%s6517_s19] sm:$0x7f]  ;;  %v3683_v16 = vld [vmem:[%s6517_s19 + $0x8] sm:$0x7f] }
0x104e   : > { %v3720_v31 = vrot.slane %v3683_v16, %v6598_v0 }
0x104f   : > { %6043 = vrsqrt.f32 %v3330_v62  ;;  %v6937_v62 = vadd.s32 4294967293, %v6595_v63 }
0x1051   : > { %vm3704_vm6 = vcmp.ge.s32.totalorder %v6937_v62, 0 }
0x1057   : > { %v6042_v17 = vpop.eup %6041 }
0x1058   : > { %v3333_v60 = vmul.f32 %v6042_v17, %v6869_v41  ;;  %v5958_v41 = vld [vmem:[%s6523_s14 + $0x30] sm:$0xff]   ;;  %v6940_v17 = vadd.s32 4294967294, %v6595_v63 }
0x1059   : > { %v6044_v19 = vpop.eup %6043 }
0x105a   : > { %v3334_v20 = vmul.f32 %v6044_v19, %v6872_v43  ;;  %v3341_v21 = vmul.f32 %v5265_v18, %v3333_v60  ;;  %v5960_v43 = vld [vmem:[%s6523_s14 + $0x38] sm:$0xff]   ;;  %v6944_v60 = vrot.slane %v6933_v53, %v3396_v44  ;;  %v3393_v19 = vrot.slane %v3384_v45, %v6604_v4 }
0x105b   : > { %vm3745_vm7 = vcmp.ge.s32.totalorder %v6940_v17, 0 }
0x105c   : > { %v3342_v24 = vmul.f32 %v5265_v18, %v3334_v20  ;;  %v3349_v25 = vadd.f32 %v5266_v22, %v3341_v21  ;;  %v3389_v18 = vrot.slane %v3384_v45, %v6598_v0  ;;  %v3863_v20 = vsub.s32 4, %v6595_v63 }
0x105d   : > { %v6948_v21 = vrot.slane %v3683_v16, %v3396_v44  ;;  %v6997_v45 = vrot.slane %v6933_v53, %v6604_v4 }
0x105e   : > { %v3350_v26 = vadd.f32 %v5266_v22, %v3342_v24  ;;  %v6951_v22 = vrot.slane %v6933_v53, %v3400_v5  ;;  %v3904_v24 = vsub.s32 5, %v6595_v63 }
0x1060   : > { %v3383_v27 = vpack.c.bf16 %v3350_v26, %v3349_v25  ;;  %v3945_v25 = vsub.s32 6, %v6595_v63  ;;  %v3827_v26 = vrot.slane %v3683_v16, %v3400_v5 }
0x1062   : > { %3599 = vmatmul.mubr.bf16.vlgmr.msra.gmra.mrb[44].mxu1 %v3383_v27  ;;  %3642 = vmatmul.mubr.bf16.vlgmr.msra.gmra.mrb[24].mxu0 %v3383_v27  ;;  %v6956_v27 = vadd.s32 4294967295, %v6595_v63 }
0x1063   : > { %4364 = vmatprep.mubr.bf16.mxu0 %v6215_v23  ;;  %5480 = vmatpush3.bf16.msra.mxu1 %v5946_v34  ;;  %v5952_v23 = vld [vmem:[%s6523_s14 + $0x18] sm:$0xff]   ;;  %v3761_v34 = vrot.slane %v3683_v16, %v6604_v4 }
0x1064   : > { %5481 = vmatprep.subr.bf16.mxu1 %v5947_v2  ;;  %v6963_v2 = vadd.s32 1, %v6595_v63  ;;  %vm3786_vm10 = vcmp.ge.s32.totalorder %v6956_v27, 0 }
0x1066   : > { %vm3853_vm11 = vcmp.lt.s32.totalorder %v6963_v2, 8  ;;  %v3946_v2 = vrot.slane %v6933_v53, %v3945_v25 }
0x1067   : > { %5482 = vmatpush3.bf16.msra.mxu1 %v5948_v3  ;;  %v6968_v3 = vld [vmem:[%s1510_s2] sm:$0x3] }
0x1068   : > { %5483 = vmatprep.subr.bf16.mxu1 %v5949_v35  ;;  %v6993_v44 = vrot.slane %v6968_v3, %v6604_v4 }
0x106b   : > { %5484 = vmatpush3.bf16.msra.mxu1 %v5950_v36  ;;  %v6970_v36 = vrot.slane %v3683_v16, %v3863_v20 }
0x106c   : > { %5485 = vmatprep.subr.bf16.mxu1 %v5951_v37  ;;  %v6973_v37 = vadd.s32 2, %v6595_v63 }
0x106e   : > { %vm3894_vm13 = vcmp.lt.s32.totalorder %v6973_v37, 8 }
0x106f   : > { %5486 = vmatpush3.bf16.msra.mxu1 %v5952_v23  ;;  %v6976_v23 = vadd.s32 3, %v6595_v63 }
0x1070   : > { %5487 = vmatprep.subr.bf16.mxu1 %v5953_v28 }
0x1071   : > { %vm3935_vm15 = vcmp.lt.s32.totalorder %v6976_v23, 8 }
0x1073   : > { %5488 = vmatpush3.bf16.msra.mxu1 %v5954_v38 }
0x1074   : > { %5489 = vmatprep.subr.bf16.mxu1 %v5955_v30  ;;  %v6978_v30 = vrot.slane %v3683_v16, %v3904_v24 }
0x1077   : > { %5490 = vmatpush3.bf16.msra.mxu1 %v5956_v39  ;;  %v6982_v39 = vrot.slane %v3683_v16, %v3945_v25 }
0x1078   : > { %5491 = vmatprep.subr.bf16.mxu1 %v5957_v40  ;;  %v6986_v40 = vrot.slane %v6933_v53, %v6598_v0 }
0x107b   : > { %5492 = vmatpush3.bf16.msra.mxu1 %v5958_v41 }
0x107c   : > { %5493 = vmatprep.subr.bf16.mxu1 %v5959_v42 }
0x107f   : > { %5494 = vmatpush3.bf16.msra.mxu1 %v5960_v43 }
0x1135   : > { %v3600_v49 = vpop.f32.mrb[44].mxu1  ;;  %v3643_v50 = vpop.f32.mrb[24].mxu0 }
0x1136   : > { %v3644_v51 = vadd.f32 %v3643_v50, %v3397_v46  ;;  %v3602_v54 = vpop.f32.mrb[45].mxu1  ;;  %v3645_v55 = vpop.f32.mrb[25].mxu0  ;;  %v3601_v35 = vadd.f32 %v3600_v49, %v3389_v18  ;;  %v7004_v49 = vrot.slane %v6933_v53, %v3863_v20  ;;  %v7007_v50 = vrot.slane %v6933_v53, %v3904_v24 }
0x1137   : > { %v3646_v56 = vadd.f32 %v3645_v55, %v3401_v47  ;;  %v3604_v57 = vpop.f32.mrb[46].mxu1  ;;  %v3647_v59 = vpop.f32.mrb[26].mxu0  ;;  %v3603_v38 = vadd.f32 %v3602_v54, %v3393_v19 }
0x1138   : > { %v5299_v61 = vmul.f32 -1.442695, %v3644_v51  ;;  %v3648_v12 = vadd.f32 %v3647_v59, %v3397_v46  ;;  %v6930_v1 = vpop.f32.mrb[47].mxu1  ;;  %v3649_v6 = vpop.f32.mrb[27].mxu0  ;;  %v3605_v43 = vadd.f32 %v3604_v57, %v3389_v18 }
0x1139   : > { %v5300_v7 = vmul.f32 -1.442695, %v3646_v56  ;;  %v3650_v8 = vadd.f32 %v3649_v6, %v3401_v47  ;;  %v3607_v47 = vadd.f32 %v6930_v1, %v3393_v19 }
0x113a   : > { %6045 = vpow2.f32 %v5299_v61  ;;  %v5301_v9 = vmul.f32 -1.442695, %v3648_v12 }
0x113b   : > { %6047 = vpow2.f32 %v5300_v7  ;;  %v5302_v10 = vmul.f32 -1.442695, %v3650_v8 }
0x113c   : > { %6049 = vpow2.f32 %v5301_v9 }
0x113d   : > { %6051 = vpow2.f32 %v5302_v10 }
0x1144   : > { %v6046_v11 = vpop.eup %6045 }
0x1145   : > { %v6048_v13 = vpop.eup %6047  ;;  %v3664_v58 = vadd.f32 1.0, %v6046_v11 }
0x1146   : > { %v6050_v33 = vpop.eup %6049  ;;  %v3665_v14 = vadd.f32 1.0, %v6048_v13 }
0x1147   : > { %v6052_v15 = vpop.eup %6051  ;;  %6053 = vrcp.f32 %v3664_v58  ;;  %v3666_v48 = vadd.f32 1.0, %v6050_v33 }
0x1148   : > { %6055 = vrcp.f32 %v3665_v14  ;;  %v3667_v52 = vadd.f32 1.0, %v6052_v15 }
0x1149   : > { %6057 = vrcp.f32 %v3666_v48 }
0x114a   : > { %6059 = vrcp.f32 %v3667_v52 }
0x1151   : > { %v6054_v28 = vpop.eup %6053 }
0x1152   : > { %v6056_v41 = vpop.eup %6055  ;;  %v6988_v42 = vmul.f32 %v6054_v28, %v3601_v35 }
0x1153   : > { %v6058_v5 = vpop.eup %6057  ;;  %v6999_v46 = vmul.f32 %v6056_v41, %v3603_v38 }
0x1154   : > { %v6060_v51 = vpop.eup %6059  ;;  %v7011_v54 = vmul.f32 %v6951_v22, %v6988_v42  ;;  %v7013_v55 = vmul.f32 %v6058_v5, %v3605_v43  ;;  %v3693_v56 = vrot.slane %v6988_v42, 5  ;;  %v3734_v57 = vrot.slane %v6988_v42, 6 }
0x1155   : > { %v3829_v59 = vmul.f32 %v3827_v26, %v6999_v46  ;;  %v3679_v61 = vmul.f32 %v6060_v51, %v3607_v47  ;;  %v3694_v12 = vrot.slane %v6999_v46, 5  ;;  %v3735_v1 = vrot.slane %v6999_v46, 6 }
0x1156   : > { %v3776_v6 = vrot.slane %v6999_v46, 7  ;;  %v3840_v7 = vrot.slane %v6999_v46, 1  ;;  %v3881_v8 = vrot.slane %v6999_v46, 2  ;;  %v3922_v9 = vrot.slane %v6999_v46, 3 }
0x1157   : > { %v3687_v10 = vrot.slane %v3679_v61, 5  ;;  %v3730_v11 = vrot.slane %v3679_v61, 6  ;;  %v3771_v13 = vrot.slane %v3679_v61, 7  ;;  %v3831_v58 = vmul.f32 %v3827_v26, %v3679_v61 }
0x1158   : > { %v3841_v33 = vrot.slane %v3679_v61, 1  ;;  %v3882_v14 = vrot.slane %v3679_v61, 2  ;;  %v3923_v15 = vrot.slane %v3679_v61, 3  ;;  %v3686_v48 = vrot.slane %v7013_v55, 5 }
0x1159   : > { %v3696_v52 = vsel %vm3692_vm4, %v3694_v12, %v3687_v10  ;;  %v3702_v16 = vsel %vm3692_vm4, %v3687_v10, %v3694_v12  ;;  %v3737_v18 = vsel %vm3733_vm5, %v3735_v1, %v3730_v11  ;;  %v3743_v19 = vsel %vm3733_vm5, %v3730_v11, %v3735_v1 }
0x115a   : > { %v3710_v20 = vsel %vm3704_vm6, %v3702_v16, 0.0  ;;  %v3712_v24 = vsel %vm3704_vm6, %v3696_v52, 0.0  ;;  %v3751_v26 = vsel %vm3745_vm7, %v3743_v19, 0.0  ;;  %v3753_v35 = vsel %vm3745_vm7, %v3737_v18, 0.0 }
0x115b   : > { %v3722_v28 = vmul.f32 %v3720_v31, %v3710_v20  ;;  %v3724_v38 = vmul.f32 %v3720_v31, %v3712_v24  ;;  %v3763_v41 = vmul.f32 %v3761_v34, %v3751_v26  ;;  %v3765_v43 = vmul.f32 %v3761_v34, %v3753_v35 }
0x115c   : > { %v3778_v5 = vsel %vm3774_vm8, %v3776_v6, %v3771_v13  ;;  %v3784_v46 = vsel %vm3774_vm8, %v3771_v13, %v3776_v6  ;;  %v3842_v47 = vsel %vm3836_vm9, %v3840_v7, %v3841_v33  ;;  %v3850_v51 = vsel %vm3836_vm9, %v3841_v33, %v3840_v7 }
0x115d   : > { %v3767_v61 = vadd.f32 %v3763_v41, %v3722_v28  ;;  %v3769_v12 = vadd.f32 %v3765_v43, %v3724_v38  ;;  %v3792_v1 = vsel %vm3786_vm10, %v3784_v46, 0.0  ;;  %v3794_v10 = vsel %vm3786_vm10, %v3778_v5, 0.0 }
0x115e   : > { %v3804_v31 = vmul.f32 %v6948_v21, %v3792_v1  ;;  %v3806_v34 = vmul.f32 %v6948_v21, %v3794_v10  ;;  %v3858_v11 = vsel %vm3853_vm11, %v3842_v47, 0.0  ;;  %v3860_v6 = vsel %vm3853_vm11, %v3850_v51, 0.0 }
0x115f   : > { %v3870_v7 = vmul.f32 %v6970_v36, %v3858_v11  ;;  %v3872_v13 = vmul.f32 %v6970_v36, %v3860_v6  ;;  %v3883_v33 = vsel %vm3877_vm12, %v3881_v8, %v3882_v14  ;;  %v3891_v52 = vsel %vm3877_vm12, %v3882_v14, %v3881_v8 }
0x1160   : > { %v3808_v16 = vadd.f32 %v3804_v31, %v3767_v61  ;;  %v3810_v18 = vadd.f32 %v3806_v34, %v3769_v12  ;;  %v3899_v19 = vsel %vm3894_vm13, %v3883_v33, 0.0  ;;  %v3901_v21 = vsel %vm3894_vm13, %v3891_v52, 0.0 }
0x1161   : > { %v3911_v20 = vmul.f32 %v6978_v30, %v3899_v19  ;;  %v3913_v24 = vmul.f32 %v6978_v30, %v3901_v21  ;;  %v3924_v26 = vsel %vm3918_vm14, %v3922_v9, %v3923_v15  ;;  %v3932_v36 = vsel %vm3918_vm14, %v3923_v15, %v3922_v9 }
0x1162   : > { %v3833_v35 = vadd.f32 %v3829_v59, %v3808_v16  ;;  %v3835_v28 = vadd.f32 %v3831_v58, %v3810_v18  ;;  %v3940_v8 = vsel %vm3935_vm15, %v3924_v26, 0.0  ;;  %v3942_v14 = vsel %vm3935_vm15, %v3932_v36, 0.0 }
0x1163   : > { %v3952_v38 = vmul.f32 %v6982_v39, %v3940_v8  ;;  %v3954_v41 = vmul.f32 %v6982_v39, %v3942_v14  ;;  %v3695_v30 = vsel %vm3692_vm4, %v3693_v56, %v3686_v48  ;;  %v3701_v9 = vsel %vm3692_vm4, %v3686_v48, %v3693_v56 }
0x1164   : > { %v3874_v59 = vadd.f32 %v3870_v7, %v3833_v35  ;;  %v3876_v58 = vadd.f32 %v3872_v13, %v3835_v28  ;;  %v3709_v15 = vsel %vm3704_vm6, %v3701_v9, 0.0  ;;  %v3711_v43 = vsel %vm3704_vm6, %v3695_v30, 0.0 }
0x1165   : > { %v3721_v5 = vmul.f32 %v6986_v40, %v3709_v15  ;;  %v3723_v39 = vmul.f32 %v6986_v40, %v3711_v43  ;;  %v3729_v46 = vrot.slane %v7013_v55, 6  ;;  %v3770_v47 = vrot.slane %v7013_v55, 7 }
0x1166   : > { %v3915_v51 = vadd.f32 %v3911_v20, %v3874_v59  ;;  %v3917_v61 = vadd.f32 %v3913_v24, %v3876_v58  ;;  %v3775_v56 = vrot.slane %v6988_v42, 7  ;;  %v3830_v48 = vmul.f32 %v6951_v22, %v7013_v55 }
0x1167   : > { %v3736_v62 = vsel %vm3733_vm5, %v3734_v57, %v3729_v46  ;;  %v3742_v12 = vsel %vm3733_vm5, %v3729_v46, %v3734_v57  ;;  %v3837_v40 = vrot.slane %v6988_v42, 1  ;;  %v3838_v1 = vrot.slane %v7013_v55, 1 }
0x1168   : > { %v3956_v10 = vadd.f32 %v3952_v38, %v3915_v51  ;;  %v3958_v31 = vadd.f32 %v3954_v41, %v3917_v61  ;;  %v3750_v34 = vsel %vm3745_vm7, %v3742_v12, 0.0  ;;  %v3752_v22 = vsel %vm3745_vm7, %v3736_v62, 0.0 }
0x1169   : > { %v3762_v11 = vmul.f32 %v6997_v45, %v3750_v34  ;;  %v3764_v6 = vmul.f32 %v6997_v45, %v3752_v22  ;;  %v3777_v7 = vsel %vm3774_vm8, %v3775_v56, %v3770_v47  ;;  %v3783_v57 = vsel %vm3774_vm8, %v3770_v47, %v3775_v56 }
0x116a   : > { %v3972_v13 = vadd.f32 %v6993_v44, %v3956_v10  ;;  %v3974_v33 = vadd.f32 %v6993_v44, %v3958_v31  ;;  %v3791_v52 = vsel %vm3786_vm10, %v3783_v57, 0.0  ;;  %v3793_v16 = vsel %vm3786_vm10, %v3777_v7, 0.0 }
0x116b   : > { %v3766_v17 = vadd.f32 %v3762_v11, %v3721_v5  ;;  %v3768_v18 = vadd.f32 %v3764_v6, %v3723_v39  ;;  %v3803_v19 = vmul.f32 %v6944_v60, %v3791_v52  ;;  %v3805_v45 = vmul.f32 %v6944_v60, %v3793_v16 }
0x116c   : > { %v5304_v21 = vmul.f32 -1.442695, %v3972_v13  ;;  %v5306_v20 = vmul.f32 -1.442695, %v3974_v33  ;;  %v3839_v24 = vsel %vm3836_vm9, %v3837_v40, %v3838_v1  ;;  %v3849_v26 = vsel %vm3836_vm9, %v3838_v1, %v3837_v40 }
0x116d   : > { %v3807_v36 = vadd.f32 %v3803_v19, %v3766_v17  ;;  %v3809_v44 = vadd.f32 %v3805_v45, %v3768_v18  ;;  %v3857_v35 = vsel %vm3853_vm11, %v3839_v24, 0.0  ;;  %v3859_v27 = vsel %vm3853_vm11, %v3849_v26, 0.0 }
0x116e   : > { %6061 = vpow2.f32 %v5304_v21  ;;  %v3869_v28 = vmul.f32 %v7004_v49, %v3857_v35  ;;  %v3871_v8 = vmul.f32 %v7004_v49, %v3859_v27  ;;  %v3878_v60 = vrot.slane %v6988_v42, 2  ;;  %v5307_v21 = vld [vmem:[%s1518_s18] ss:$0 sm:$0xff] }
0x116f   : > { %6063 = vpow2.f32 %v5306_v20  ;;  %v3832_v14 = vadd.f32 %v7011_v54, %v3807_v36  ;;  %v3834_v38 = vadd.f32 %v3830_v48, %v3809_v44  ;;  %v3879_v41 = vrot.slane %v7013_v55, 2 }
0x1170   : > { %v3919_v30 = vrot.slane %v6988_v42, 3  ;;  %v3920_v9 = vrot.slane %v7013_v55, 3  ;;  %v3964_v39 = vrot.slane %v6968_v3, %v6598_v0 }
0x1171   : > { %v3873_v59 = vadd.f32 %v3869_v28, %v3832_v14  ;;  %v3875_v58 = vadd.f32 %v3871_v8, %v3834_v38  ;;  %v3880_v49 = vsel %vm3877_vm12, %v3878_v60, %v3879_v41  ;;  %v3890_v15 = vsel %vm3877_vm12, %v3879_v41, %v3878_v60  ;;  %v5961_v8 = vld [vmem:[%s6533_s26] ss:$8 sps:$4 sm:$0xff]   ;;  %v5963_v60 = vld [vmem:[%s6533_s26 + $0x4] ss:$8 sps:$4 sm:$0xff]   ;;  %v5966_v14 = vld [vmem:[%s6533_s26 + $0x14] ss:$8 sps:$4 sm:$0xff]  }
0x1172   : > { %v3898_v54 = vsel %vm3894_vm13, %v3880_v49, 0.0  ;;  %v3900_v43 = vsel %vm3894_vm13, %v3890_v15, 0.0  ;;  %v3921_v42 = vsel %vm3918_vm14, %v3919_v30, %v3920_v9  ;;  %v3931_v55 = vsel %vm3918_vm14, %v3920_v9, %v3919_v30  ;;  %4332 = vmatprep.subr.bf16.mxu0 %v5963_v60  ;;  %v5964_v38 = vld [vmem:[%s6533_s26 + $0x10] ss:$8 sps:$4 sm:$0xff]   ;;  %v5969_v49 = vld [vmem:[%s6533_s26 + $0x24] ss:$8 sps:$4 sm:$0xff]  }
0x1173   : > { %v3910_v63 = vmul.f32 %v7007_v50, %v3898_v54  ;;  %v3912_v53 = vmul.f32 %v7007_v50, %v3900_v43  ;;  %v3939_v25 = vsel %vm3935_vm15, %v3921_v42, 0.0  ;;  %v3941_v5 = vsel %vm3935_vm15, %v3931_v55, 0.0  ;;  %4333 = vmatpush1.bf16.msra.mxu0 %v5961_v8  ;;  %v5967_v15 = vld [vmem:[%s6533_s26 + $0x20] ss:$8 sps:$4 sm:$0xff]   ;;  %v5972_v54 = vld [vmem:[%s6533_s26 + $0x34] ss:$8 sps:$4 sm:$0xff]  }
0x1174   : > { %v3951_v47 = vmul.f32 %v3946_v2, %v3939_v25  ;;  %v3953_v51 = vmul.f32 %v3946_v2, %v3941_v5  ;;  %4334 = vmatprep.subr.bf16.mxu0 %v5966_v14  ;;  %v5970_v43 = vld [vmem:[%s6533_s26 + $0x30] ss:$8 sps:$4 sm:$0xff]   ;;  %v5975_v42 = vld [vmem:[%s6533_s26 + $0x44] ss:$8 sps:$4 sm:$0xff]   ;;  %v5973_v55 = vld [vmem:[%s6533_s26 + $0x40] ss:$8 sps:$4 sm:$0xff]  }
0x1175   : > { %v3914_v46 = vadd.f32 %v3910_v63, %v3873_v59  ;;  %v3916_v37 = vadd.f32 %v3912_v53, %v3875_v58  ;;  %v5978_v63 = vld [vmem:[%s6533_s26 + $0x54] ss:$8 sps:$4 sm:$0xff]   ;;  %v5976_v53 = vld [vmem:[%s6533_s26 + $0x50] ss:$8 sps:$4 sm:$0xff]   ;;  %v5981_v25 = vld [vmem:[%s6533_s26 + $0x64] ss:$8 sps:$4 sm:$0xff]  }
0x1176   : > { %v5979_v5 = vld [vmem:[%s6533_s26 + $0x60] ss:$8 sps:$4 sm:$0xff]  }
0x1177   : > { %v3955_v61 = vadd.f32 %v3951_v47, %v3914_v46  ;;  %v3957_v56 = vadd.f32 %v3953_v51, %v3916_v37  ;;  %4335 = vmatpush1.bf16.msra.mxu0 %v5964_v38  ;;  %v5982_v46 = vld [vmem:[%s6533_s26 + $0x70] ss:$8 sps:$4 sm:$0xff]  }
0x1178   : > { %v6062_v48 = vpop.eup %6061  ;;  %4336 = vmatprep.subr.bf16.mxu0 %v5969_v49 }
0x1179   : > { %v6064_v62 = vpop.eup %6063  ;;  %v3988_v12 = vadd.f32 1.0, %v6062_v48  ;;  %v3971_v40 = vadd.f32 %v3964_v39, %v3955_v61  ;;  %v3973_v50 = vadd.f32 %v3964_v39, %v3957_v56  ;;  %v5984_v39 = vld [vmem:[%s6533_s26 + $0x74] ss:$8 sps:$4 sm:$0xff]  }
0x117a   : > { %v3990_v1 = vadd.f32 1.0, %v6064_v62 }
0x117b   : > { %6065 = vrcp.f32 %v3988_v12  ;;  %v5303_v10 = vmul.f32 -1.442695, %v3971_v40  ;;  %v5305_v31 = vmul.f32 -1.442695, %v3973_v50  ;;  %4337 = vmatpush1.bf16.msra.mxu0 %v5967_v15  ;;  %v5324_v12 = vld [vmem:[%s1521_s21] ss:$0 sm:$0xff] }
0x117c   : > { %6067 = vrcp.f32 %v3990_v1  ;;  %4338 = vmatprep.subr.bf16.mxu0 %v5972_v54 }
0x117d   : > { %6069 = vpow2.f32 %v5303_v10 }
0x117e   : > { %6071 = vpow2.f32 %v5305_v31  ;;  %v5325_v31 = vld [vmem:[%s1524_s7] ss:$0 sm:$0xff]  ;;  %s7378_s7 = sld [smem:[#allocation42_spill]] }
0x117f   : > { %4339 = vmatpush1.bf16.msra.mxu0 %v5970_v43 }
0x1180   : > { %4340 = vmatprep.subr.bf16.mxu0 %v5975_v42 }
0x1183   : > { %4341 = vmatpush1.bf16.msra.mxu0 %v5973_v55 }
0x1184   : > { %4342 = vmatprep.subr.bf16.mxu0 %v5978_v63  ;;  %p5361_p6 = scmp.ne.s32.totalorder %s7378_s7, 1 }
0x1185   : > { %v6066_v23 = vpop.eup %6065 }
0x1186   : > { %v6068_v3 = vpop.eup %6067  ;;  %v4000_v34 = vmul.f32 %v6066_v23, %v3972_v13 }
0x1187   : > { %v6070_v22 = vpop.eup %6069  ;;  %v4002_v11 = vmul.f32 %v6068_v3, %v3974_v33  ;;  %4343 = vmatpush1.bf16.msra.mxu0 %v5976_v53 }
0x1188   : > { %v6072_v6 = vpop.eup %6071  ;;  %v3987_v7 = vadd.f32 1.0, %v6070_v22  ;;  %4344 = vmatprep.subr.bf16.mxu0 %v5981_v25 }
0x1189   : > { %v4036_v57 = vpack.c.bf16 %v4002_v11, %v4000_v34  ;;  %v3989_v52 = vadd.f32 1.0, %v6072_v6  ;;  %v5985_v11 = vld [vmem:[%s6539_s29 + $0x40] sm:$0xff]  }
0x118a   : > { %6073 = vrcp.f32 %v3987_v7  ;;  %v5986_v6 = vld [vmem:[%s6539_s29] sm:$0xff]   ;;  %5501 = vmatprep.subr.bf16.mxu1 %v5985_v11  ;;  %v5987_v7 = vld [vmem:[%s6539_s29 + $0x48] sm:$0xff]  }
0x118b   : > { %4172 = vmatprep.mubr.bf16.mxu1 %v4036_v57  ;;  %6075 = vrcp.f32 %v3989_v52  ;;  %4345 = vmatpush1.bf16.msra.mxu0 %v5979_v5  ;;  %v5988_v57 = vld [vmem:[%s6539_s29 + $0x8] sm:$0xff]   ;;  %v5989_v52 = vld [vmem:[%s6539_s29 + $0x50] sm:$0xff]  }
0x118c   : > { %4346 = vmatprep.subr.bf16.mxu0 %v5984_v39 }
0x118f   : > { %4347 = vmatpush1.bf16.msra.mxu0 %v5982_v46 }
0x1194   : > { %v6074_v16 = vpop.eup %6073 }
0x1195   : > { %v6076_v17 = vpop.eup %6075  ;;  %v3999_v18 = vmul.f32 %v6074_v16, %v3971_v40  ;;  %v5990_v16 = vld [vmem:[%s6539_s29 + $0x10] sm:$0xff]  }
0x1196   : > { %v4001_v19 = vmul.f32 %v6076_v17, %v3973_v50  ;;  %v5991_v17 = vld [vmem:[%s6539_s29 + $0x58] sm:$0xff]  }
0x1198   : > { %v4035_v45 = vpack.c.bf16 %v4001_v19, %v3999_v18  ;;  %v5992_v18 = vld [vmem:[%s6539_s29 + $0x18] sm:$0xff]   ;;  %v5993_v19 = vld [vmem:[%s6539_s29 + $0x60] sm:$0xff]  }
0x119a   : > { %4173 = vmatmul.mubr.bf16.vlgmr.msra.gmra.mrb[48].mxu1 %v4035_v45  ;;  %v5994_v45 = vld [vmem:[%s6539_s29 + $0x20] sm:$0xff]  }
0x119b   : > { %5502 = vmatpush3.bf16.msra.mxu1 %v5986_v6 }
0x119c   : > { %5503 = vmatprep.subr.bf16.mxu1 %v5987_v7 }
0x119f   : > { %5504 = vmatpush3.bf16.msra.mxu1 %v5988_v57 }
0x11a0   : > { %5505 = vmatprep.subr.bf16.mxu1 %v5989_v52 }
0x11a3   : > { %5506 = vmatpush3.bf16.msra.mxu1 %v5990_v16  ;;  %v5342_v16 = vld [vmem:[%s1541_s0] ss:$0 sm:$0xff] }
0x11a4   : > { %5507 = vmatprep.subr.bf16.mxu1 %v5991_v17 }
0x11a7   : > { %5508 = vmatpush3.bf16.msra.mxu1 %v5992_v18 }
0x11a8   : > { %5509 = vmatprep.subr.bf16.mxu1 %v5993_v19 }
0x11ab   : > { %5510 = vmatpush3.bf16.msra.mxu1 %v5994_v45 }
0x126d   : > { %v5495_v13 = vpop.f32.mrb[48].mxu1 }
0x126e   : > { %v5496_v33 = vpop.f32.mrb[49].mxu1 }
0x126f   : > { %v5497_v20 = vadd.f32 %v5496_v33, %v5495_v13  ;;  %v5498_v24 = vpop.f32.mrb[50].mxu1  ;;  %v5995_v13 = vld [vmem:[%s6539_s29 + $0x68] sm:$0xff]   ;;  %v5997_v33 = vld [vmem:[%s6539_s29 + $0x70] sm:$0xff]  }
0x1270   : > { %v5499_v26 = vpop.f32.mrb[51].mxu1  ;;  %5511 = vmatprep.subr.bf16.mxu1 %v5995_v13 }
0x1271   : > { %v4175_v36 = vadd.f32 %v5497_v20, %v5307_v21  ;;  %v5500_v44 = vadd.f32 %v5499_v26, %v5498_v24  ;;  %v5998_v20 = vld [vmem:[%s6539_s29 + $0x30] sm:$0xff]   ;;  %v5999_v24 = vld [vmem:[%s6539_s29 + $0x78] sm:$0xff]  }
0x1272   : > { %v6000_v26 = vld [vmem:[%s6539_s29 + $0x38] sm:$0xff]  }
0x1273   : > { %v4178_v35 = vadd.f32 %v5500_v44, %v5307_v21  ;;  %v7148_v27 = vadd.f32 %v4175_v36, %v6853_v29  ;;  %v5996_v21 = vld [vmem:[%s6539_s29 + $0x28] sm:$0xff]   ;;  %v4240_v36 = vld [vmem:[%s1533_s6] sm:$0x3] }
0x1274   : > { %5512 = vmatpush3.bf16.msra.mxu1 %v5996_v21  ;;  %v4245_v44 = vrot.slane %v4240_v36, %v6598_v0 }
0x1275   : > { %4185 = vadd.xlane.f32.xlu0 %v7148_v27  ;;  %v7152_v28 = vadd.f32 %v4178_v35, %v6857_v32  ;;  %5513 = vmatprep.subr.bf16.mxu1 %v5997_v33  ;;  %v4249_v35 = vrot.slane %v4240_v36, %v6604_v4 }
0x1277   : > { %4187 = vadd.xlane.f32.xlu1 %v7152_v28 }
0x1278   : > { %5514 = vmatpush3.bf16.msra.mxu1 %v5998_v20 }
0x1279   : > { %5515 = vmatprep.subr.bf16.mxu1 %v5999_v24 }
0x127c   : > { %5516 = vmatpush3.bf16.msra.mxu1 %v6000_v26 }
0x1302   : > { %v4186_v29 = vpop.xlane.xlu0 %4185 }
0x1303   : > { %v4189_v41 = vmul.f32 0.0078125, %v4186_v29 }
0x1304   : > { %v4188_v30 = vpop.xlane.xlu1 %4187 }
0x1305   : > { %v4191_v32 = vsub.f32 %v7148_v27, %v4189_v41  ;;  %v4190_v9 = vmul.f32 0.0078125, %v4188_v30 }
0x1307   : > { %v4192_v2 = vsub.f32 %v7152_v28, %v4190_v9  ;;  %v4193_v59 = vmul.f32 %v4191_v32, %v4191_v32 }
0x1309   : > { %4195 = vadd.xlane.f32.xlu0 %v4193_v59  ;;  %v4194_v58 = vmul.f32 %v4192_v2, %v4192_v2 }
0x130b   : > { %4197 = vadd.xlane.f32.xlu1 %v4194_v58 }
0x1396   : > { %v4196_v37 = vpop.xlane.xlu0 %4195 }
0x1397   : > { %v4199_v47 = vmul.f32 0.0078125, %v4196_v37 }
0x1398   : > { %v4198_v51 = vpop.xlane.xlu1 %4197 }
0x1399   : > { %v4201_v61 = vadd.f32 1e-05, %v4199_v47  ;;  %v4200_v56 = vmul.f32 0.0078125, %v4198_v51 }
0x139b   : > { %6077 = vrsqrt.f32 %v4201_v61  ;;  %v4202_v48 = vadd.f32 1e-05, %v4200_v56 }
0x139d   : > { %6079 = vrsqrt.f32 %v4202_v48 }
0x13a5   : > { %v6078_v62 = vpop.eup %6077 }
0x13a6   : > { %v4205_v40 = vmul.f32 %v6078_v62, %v4191_v32 }
0x13a7   : > { %v6080_v50 = vpop.eup %6079 }
0x13a8   : > { %v4206_v1 = vmul.f32 %v6080_v50, %v4192_v2  ;;  %v4213_v10 = vmul.f32 %v5324_v12, %v4205_v40 }
0x13aa   : > { %v4214_v23 = vmul.f32 %v5324_v12, %v4206_v1  ;;  %v4221_v3 = vadd.f32 %v5325_v31, %v4213_v10 }
0x13ac   : > { %v4222_v34 = vadd.f32 %v5325_v31, %v4214_v23 }
0x13ae   : > { %v4239_v22 = vpack.c.bf16 %v4222_v34, %v4221_v3 }
0x13b0   : > { %4365 = vmatmul.mubr.bf16.vlgmr.msra.gmra.mrb[28].mxu0 %v4239_v22 }
0x1483   : > { %v4366_v8 = vpop.f32.mrb[28].mxu0 }
0x1484   : > { %v4367_v60 = vadd.f32 %v4366_v8, %v4245_v44  ;;  %v4368_v14 = vpop.f32.mrb[29].mxu0 }
0x1485   : > { %v4369_v38 = vadd.f32 %v4368_v14, %v4249_v35  ;;  %v4370_v29 = vpop.f32.mrb[30].mxu0 }
0x1486   : > { %v4379_v41 = vmul.f32 0.044715, %v4367_v60  ;;  %v4371_v30 = vadd.f32 %v4370_v29, %v4245_v44  ;;  %v4372_v32 = vpop.f32.mrb[31].mxu0  ;;  %v4375_v40 = vmul.f32 0.5, %v4367_v60 }
0x1487   : > { %v4380_v9 = vmul.f32 0.044715, %v4369_v38  ;;  %v4373_v2 = vadd.f32 %v4372_v32, %v4249_v35  ;;  %v4376_v10 = vmul.f32 0.5, %v4369_v38 }
0x1488   : > { %v4383_v59 = vmul.f32 %v4379_v41, %v4367_v60  ;;  %v4381_v58 = vmul.f32 0.044715, %v4371_v30  ;;  %v4377_v50 = vmul.f32 0.5, %v4371_v30 }
0x1489   : > { %v4384_v49 = vmul.f32 %v4380_v9, %v4369_v38  ;;  %v4382_v15 = vmul.f32 0.044715, %v4373_v2  ;;  %v4378_v31 = vmul.f32 0.5, %v4373_v2  ;;  %v5359_v9 = vld [vmem:[%s1544_s10] ss:$0 sm:$0xff] }
0x148a   : > { %v4387_v54 = vmul.f32 %v4383_v59, %v4367_v60  ;;  %v4385_v43 = vmul.f32 %v4381_v58, %v4371_v30  ;;  %v5360_v58 = vld [vmem:[%s1547_s3] ss:$0 sm:$0xff] }
0x148b   : > { %v4388_v42 = vmul.f32 %v4384_v49, %v4369_v38  ;;  %v4386_v0 = vmul.f32 %v4382_v15, %v4373_v2 }
0x148c   : > { %v4391_v55 = vadd.f32 %v4387_v54, %v4367_v60  ;;  %v4389_v4 = vmul.f32 %v4385_v43, %v4371_v30 }
0x148d   : > { %v4390_v63 = vmul.f32 %v4386_v0, %v4373_v2  ;;  %v4392_v53 = vadd.f32 %v4388_v42, %v4369_v38 }
0x148e   : > { %v4395_v25 = vmul.f32 0.7978846, %v4391_v55  ;;  %v4393_v5 = vadd.f32 %v4389_v4, %v4371_v30 }
0x148f   : > { %v4394_v39 = vadd.f32 %v4390_v63, %v4373_v2  ;;  %v4396_v46 = vmul.f32 0.7978846, %v4392_v53 }
0x1490   : > { %6081 = vtanh.f32 %v4395_v25  ;;  %v4397_v37 = vmul.f32 0.7978846, %v4393_v5 }
0x1491   : > { %v4398_v47 = vmul.f32 0.7978846, %v4394_v39  ;;  %6083 = vtanh.f32 %v4396_v46 }
0x1492   : > { %6085 = vtanh.f32 %v4397_v37 }
0x1493   : > { %6087 = vtanh.f32 %v4398_v47 }
0x149a   : > { %v6082_v51 = vpop.eup %6081 }
0x149b   : > { %v6084_v61 = vpop.eup %6083  ;;  %v4403_v56 = vadd.f32 1.0, %v6082_v51 }
0x149c   : > { %v6086_v48 = vpop.eup %6085  ;;  %v4404_v62 = vadd.f32 1.0, %v6084_v61 }
0x149d   : > { %v6088_v12 = vpop.eup %6087  ;;  %v4405_v1 = vadd.f32 1.0, %v6086_v48  ;;  %v4407_v3 = vmul.f32 %v4403_v56, %v4375_v40 }
0x149e   : > { %v4406_v23 = vadd.f32 1.0, %v6088_v12  ;;  %v4408_v22 = vmul.f32 %v4404_v62, %v4376_v10 }
0x149f   : > { %v4409_v34 = vmul.f32 %v4405_v1, %v4377_v50 }
0x14a0   : > { %v4410_v11 = vmul.f32 %v4406_v23, %v4378_v31 }
0x14a1   : > { %v4443_v6 = vpack.c.bf16 %v4409_v34, %v4407_v3 }
0x14a2   : > { %v4444_v7 = vpack.c.bf16 %v4410_v11, %v4408_v22 }
0x14a4   : > { %4580 = vmatprep.mubr.bf16.mxu1 %v4444_v7 }
0x14a5   : > { %4581 = vmatmul.mubr.bf16.vlgmr.msra.gmra.mrb[52].mxu1 %v4443_v6 }
0x1578   : > { %v5517_v57 = vpop.f32.mrb[52].mxu1 }
0x1579   : > { %v5518_v52 = vpop.f32.mrb[53].mxu1 }
0x157a   : > { %v5519_v17 = vadd.f32 %v5518_v52, %v5517_v57  ;;  %v5520_v18 = vpop.f32.mrb[54].mxu1 }
0x157b   : > { %v5521_v19 = vpop.f32.mrb[55].mxu1 }
0x157c   : > { %v5522_v45 = vadd.f32 %v5521_v19, %v5520_v18  ;;  %v4583_v13 = vadd.f32 %v5519_v17, %v5342_v16 }
0x157e   : > { %4591 = vadd.xlane.f32.xlu0 %v4583_v13  ;;  %v4586_v21 = vadd.f32 %v5522_v45, %v5342_v16 }
0x1580   : > { %4593 = vadd.xlane.f32.xlu1 %v4586_v21 }
0x160b   : > { %v4592_v33 = vpop.xlane.xlu0 %4591 }
0x160c   : > { %v4595_v20 = vmul.f32 0.0078125, %v4592_v33 }
0x160d   : > { %v4594_v24 = vpop.xlane.xlu1 %4593 }
0x160e   : > { %v4597_v26 = vsub.f32 %v4583_v13, %v4595_v20  ;;  %v4596_v36 = vmul.f32 0.0078125, %v4594_v24 }
0x1610   : > { %v4598_v44 = vsub.f32 %v4586_v21, %v4596_v36  ;;  %v4599_v35 = vmul.f32 %v4597_v26, %v4597_v26 }
0x1612   : > { %4601 = vadd.xlane.f32.xlu0 %v4599_v35  ;;  %v4600_v8 = vmul.f32 %v4598_v44, %v4598_v44 }
0x1614   : > { %4603 = vadd.xlane.f32.xlu1 %v4600_v8 }
0x169f   : > { %v4602_v60 = vpop.xlane.xlu0 %4601 }
0x16a0   : > { %v4605_v14 = vmul.f32 0.0078125, %v4602_v60 }
0x16a1   : > { %v4604_v38 = vpop.xlane.xlu1 %4603 }
0x16a2   : > { %v4607_v29 = vadd.f32 1e-05, %v4605_v14  ;;  %v4606_v41 = vmul.f32 0.0078125, %v4604_v38 }
0x16a4   : > { %6089 = vrsqrt.f32 %v4607_v29  ;;  %v4608_v30 = vadd.f32 1e-05, %v4606_v41 }
0x16a6   : > { %6091 = vrsqrt.f32 %v4608_v30 }
0x16ae   : > { %v6090_v32 = vpop.eup %6089 }
0x16af   : > { %v4611_v2 = vmul.f32 %v6090_v32, %v4597_v26 }
0x16b0   : > { %v6092_v59 = vpop.eup %6091 }
0x16b1   : > { %v4619_v49 = vmul.f32 %v5359_v9, %v4611_v2  ;;  %v4612_v15 = vmul.f32 %v6092_v59, %v4598_v44 }
0x16b3   : > { %v4627_v54 = vadd.f32 %v5360_v58, %v4619_v49  ;;  %v4620_v43 = vmul.f32 %v5359_v9, %v4612_v15  ;;  %4636 = sbr.rel (%p5361_p6) target bundleno = 5818 (0x16ba), region = 164 }
0x16b5   : > { %v4629_v42 = vadd.f32 %v4627_v54, %v7148_v27  ;;  %v4628_v0 = vadd.f32 %v5360_v58, %v4620_v43 }
0x16b7   : > { %4631 = vst [vmem:[#allocation2] sm:$0xff] %v4629_v42  ;;  %v4630_v55 = vadd.f32 %v4628_v0, %v7152_v28  ;;  %4637 = vst [vmem:[#allocation6] sm:$0xff] (!%p5361_p6), %v4629_v42 }
0x16b9   : > { %4632 = vst [vmem:[#allocation2 + $0x8] sm:$0xff] %v4630_v55  ;;  %4638 = vst [vmem:[#allocation6 + $0x8] sm:$0xff] (!%p5361_p6), %v4630_v55 }
0x16ba PF: > { %s7379_s22 = sld [smem:[#allocation44_spill]]  ;;  %s6218_s18 = smov [#allocation6]  }
0x16bb   : > { %s4648_s26 = sshll.u32 %s6218_s18, 4  ;;  %s4649_s26 = int_to_ptr.vmem [resolvable:$true] %s4648_s26 }
0x16bc   : > { %s6121_s0 = scalar_lea.vmem %s4649_s26, 256  ;;  %p6128_p13 = scmp.lt.s32.totalorder %s4649_s26, %s4649_s26 }
0x16bd   : > { %p6122_p10 = scmp.ne.s32.totalorder %s4649_s26, %s6121_s0  ;;  %p6129_p0 = scmp.lt.s32.totalorder %s6121_s0, %s6121_s0 }
0x16bf   : > { %p6130_p1 = por %p6129_p0, %p6128_p13 }
0x16c0   : > { %s7380_s16 = sadd.s32 4294967295, %s7379_s22  }
0x16c1   : > { %p7214_p8 = scmp.eq.s32.totalorder %s7380_s16, 1 }
0x16c3   : > { %p6123_p11 = pnand %p6122_p10, %p7214_p8 }
0x16c5   : > { %p6124_p12 = pneg %p6123_p11 }
0x16c7   : > { %p6131_p2 = pnand %p6130_p1, %p6124_p12 }
0x16c9   : > { %6134 = shalt.err (!%p6131_p2)
}
0x16ca   : > { %s7382_s10 = sld [smem:[#allocation41_spill]] }
0x16d0   : > { %s7383_s9 = smov %s7382_s10  ;;  %s6135_s13 = scalar_lea.hbm %s7382_s10, 256 }
0x16d1   : > { %p6136_p5 = scmp.ne.s32.totalorder %s7383_s9, %s6135_s13  ;;  %p6141_p3 = scmp.lt.u32.totalorder %s6135_s13, %s7383_s9 }
0x16d3   : > { %p6137_p7 = pnand %p6136_p5, %p7214_p8 }
0x16d5   : > { %p6138_p9 = pneg %p6137_p7 }
0x16d7   : > { %p6143_p4 = pnand %p6141_p3, %p6138_p9 }
0x16d9   : > { %6146 = shalt.err (!%p6143_p4)
}
0x16da   : > { %s6219_s17 = smov 128   ;;  %s6220_s25 = smov 8  }
0x16db   : > { %5724 = dma.vmem_to_hbm [thread:$0]  (%p7214_p8), %s4649_s26, 256, %s7383_s9, [#allocation5], %s6219_s17, %s6219_s17, %s6220_s25  }
0x16dc   : > { %6164 = dma.done.wait (%p7214_p8), [#allocation5], 256  }
0x16dd   : > { %6166 = vsyncadd (%p7214_p8), [#allocation5], 4294967040 }
0x16de PF: > { %s7384_s8 = sld [smem:[#allocation44_spill]]  ;;  %s7385_s7 = sld [smem:[#allocation43_spill]] }
0x16df   : > { %s7386_s10 = sld [smem:[#allocation45_spill]] }
0x16e4   : > { %s79_s11 = sadd.s32 1, %s7384_s8  }
0x16e5   : > { %p76_p6 = scmp.ge.s32.totalorder %s79_s11, 4  }
0x16e7   :  { %78 = sbr.rel (!%p76_p6) target bundleno = 80 (0x50), region = 324 }
0x16ee   :  { %4664 = vsyncpa [#allocation4], 1 }
0x16ef   :  { %4666 = vsyncpa [#allocation4 + $0x1], 1 }
0x16f0   :  { %4667 = vsyncpa [#allocation5], 1 }
0x16f1   :  { %4669 = vsyncpa [#allocation5 + $0x1], 1 }

</bundles_post_ra>
